<compile_context>
chip_gen: v7x
topology: tpu7x:2x2x1
jax: 0.10.0
libtpu: 0.0.40
codegen_flags: <defaults>
</compile_context>

<pallas_src>
import functools

import jax
import jax.numpy as jnp
from jax import lax
from jax.experimental import pallas as pl
from jax.experimental.pallas import tpu as pltpu

_POOL_RATIO = 0.8
_NEG_BIG = -1e30    # padded-class bias -> exp() underflows to 0 in log_softmax


def _full(shape):
    return pl.BlockSpec(shape, lambda i: (0,) * len(shape))


# ------------------------------ fused kernel ------------------------------- #

def _fused_forward_kernel(x_ref, adj_ref, bm_ref, bt_ref, w_ref, s_ref, o_ref):
    f32 = jnp.float32
    x = x_ref[...]                       # (N, H)  features zero-padded F -> H
    adj = adj_ref[...]                   # (N, N)  A[dst, src] = #edges src->dst
    bm = bm_ref[...]                     # (GP, N) one-hot graph membership
    bt = bt_ref[...]                     # (N, GP) same membership, transposed
    n = adj.shape[0]
    hd = x.shape[1]                      # hidden width H (=128)

    # mean-aggregation normalizer for the unpooled graph (degree clamp >= 1)
    deg = jnp.sum(adj, axis=1, keepdims=True)                        # (N, 1)
    inv_deg = 1.0 / jnp.maximum(deg, 1.0)

    def sage_relu(h, agg_scale, w_lr, bias):
        # relu([mean_agg(h) | h] @ [[wl],[wr]] + bl): lin_l/lin_r fused into a
        # single 2H-deep MXU matmul; agg_scale folds 1/deg (and keep-mask).
        agg = jnp.dot(adj, h, preferred_element_type=f32) * agg_scale
        cat = jnp.concatenate([agg, h], axis=1)                      # (N, 2H)
        out = jnp.dot(cat, w_lr, preferred_element_type=f32) + bias
        return jnp.maximum(out, 0.0)

    h1 = sage_relu(x, inv_deg, w_ref[0:2 * hd, :], s_ref[0:1, :])
    h2 = sage_relu(h1, inv_deg, w_ref[2 * hd:4 * hd, :], s_ref[1:2, :])

    # ---- TopKPooling(0.8): score = tanh(h2 . w / ||w||) --------------------
    wp_row = s_ref[3:4, :]                                           # (1, H)
    wp_col = w_ref[8 * hd:9 * hd, 0:1]                               # (H, 1)
    inv_wnorm = lax.rsqrt(jnp.sum(wp_row * wp_row, axis=1, keepdims=True))
    p_row = lax.dot_general(wp_row, h2, (((1,), (1,)), ((), ())),
                            preferred_element_type=f32)              # (1, N)
    p_col = jnp.dot(h2, wp_col, preferred_element_type=f32)          # (N, 1)
    s_row = jnp.tanh(p_row * inv_wnorm)                              # (1, N)
    s_col = jnp.tanh(p_col * inv_wnorm)                              # (N, 1)

    # per-graph rank[i] = #{ j in graph(i), j != i : s_j > s_i (tie: lower j) }
    ii = lax.broadcasted_iota(jnp.int32, (n, n), 0)
    jj = lax.broadcasted_iota(jnp.int32, (n, n), 1)
    better = (((s_row > s_col) | ((s_row == s_col) & (jj < ii)))
              & (jj != ii)).astype(f32)                              # (N, N)
    # same-graph masking without materializing an (N,N) mask:
    rank = jnp.sum(bt * jnp.dot(better, bt, preferred_element_type=f32),
                   axis=1, keepdims=True)                            # (N, 1)

    cnt = jnp.sum(bm, axis=1, keepdims=True)                         # (GP, 1)
    k_g = jnp.ceil(_POOL_RATIO * cnt)                                # (GP, 1)
    k_node = jnp.dot(bt, k_g, preferred_element_type=f32)            # (N, 1)
    keep = (rank < k_node).astype(f32)                               # (N, 1)
    gate = s_col * keep                                              # (N, 1)

    # ---- conv3 on the pooled graph -----------------------------------------
    # Edge masking folded into scalings: h2g zeroes dropped source rows,
    # scale_p carries keep[i]/pooled_degree[i]; no (N,N) masked adjacency.
    h2g = h2 * gate                                                  # (N, H)
    deg_p = keep * jnp.dot(adj, keep, preferred_element_type=f32)    # (N, 1)
    scale_p = keep / jnp.maximum(deg_p, 1.0)                         # (N, 1)
    h3 = sage_relu(h2g, scale_p, w_ref[4 * hd:6 * hd, :], s_ref[2:3, :])

    # ---- global_mean_pool over kept nodes + MLP + log_softmax --------------
    inv_cnt = 1.0 / jnp.maximum(k_g, 1.0)                            # (GP, 1)
    pooled = jnp.dot(bm, h3 * keep, preferred_element_type=f32) * inv_cnt
    hdn = jnp.maximum(
        jnp.dot(pooled, w_ref[6 * hd:7 * hd, :], preferred_element_type=f32)
        + s_ref[4:5, :], 0.0)                                        # (GP, H)
    logits = (jnp.dot(hdn, w_ref[7 * hd:8 * hd, :], preferred_element_type=f32)
              + s_ref[5:6, :])                                       # (GP, H)
    m = jnp.max(logits, axis=-1, keepdims=True)
    lse = jnp.log(jnp.sum(jnp.exp(logits - m), axis=-1, keepdims=True)) + m
    o_ref[...] = logits - lse                                        # (GP, H)


def graphsage_fused_call(x, adj, bm, bt, w_slab, s_slab, gp, hdim):
    args = (x, adj, bm, bt, w_slab, s_slab)
    # Total VMEM footprint (inputs + intermediates) is well under the scoped
    # default on every chip generation; no vmem_limit_bytes override needed.
    return pl.pallas_call(
        _fused_forward_kernel,
        grid=(1,),
        out_shape=jax.ShapeDtypeStruct((gp, hdim), jnp.float32),
        in_specs=[_full(a.shape) for a in args],
        out_specs=_full((gp, hdim)),
        compiler_params=pltpu.CompilerParams(
            dimension_semantics=("arbitrary",)),
    )(*args)


# ------------------------------- parameters -------------------------------- #

def init_params(key, num_features, num_classes):
    # Mirrors the torch module's tensors (SAGEConv lin_l has bias, lin_r none).
    ks = jax.random.split(key, 15)
    w = lambda k, fi, fo: 0.1 * jax.random.normal(k, (fi, fo), jnp.float32)
    b = lambda k, fo: 0.1 * jax.random.normal(k, (1, fo), jnp.float32)
    return {
        "c1_wl": w(ks[0], num_features, 128), "c1_bl": b(ks[1], 128),
        "c1_wr": w(ks[2], num_features, 128),
        "c2_wl": w(ks[3], 128, 128), "c2_bl": b(ks[4], 128),
        "c2_wr": w(ks[5], 128, 128),
        "pool_w": 0.1 * jax.random.normal(ks[6], (1, 128), jnp.float32),
        "c3_wl": w(ks[7], 128, 128), "c3_bl": b(ks[8], 128),
        "c3_wr": w(ks[9], 128, 128),
        "l1_w": w(ks[10], 128, 64), "l1_b": b(ks[11], 64),
        "l2_w": w(ks[12], 64, num_classes), "l2_b": b(ks[13], num_classes),
    }


def pack_params(p):
    """Pack everything into one (9H,H) weight slab + one (8,H) row slab."""
    f32 = jnp.float32
    hd = p["c2_wl"].shape[0]            # 128
    hd1 = p["l1_w"].shape[1]            # 64
    ncls = p["l2_w"].shape[1]

    def pad_to(a, rows, cols):
        return jnp.zeros((rows, cols), f32).at[:a.shape[0], :a.shape[1]].set(a)

    c1 = jnp.concatenate([pad_to(p["c1_wl"], hd, hd),
                          pad_to(p["c1_wr"], hd, hd)], axis=0)       # (2H, H)
    c2 = jnp.concatenate([p["c2_wl"], p["c2_wr"]], axis=0)           # (2H, H)
    c3 = jnp.concatenate([p["c3_wl"], p["c3_wr"]], axis=0)           # (2H, H)
    l1 = pad_to(p["l1_w"], hd, hd)                                   # (H, H)
    l2 = pad_to(p["l2_w"], hd, hd)                                   # (H, H)
    pool_col = pad_to(p["pool_w"].T, hd, hd)                         # (H, H)
    w_slab = jnp.concatenate([c1, c2, c3, l1, l2, pool_col], axis=0)  # (9H, H)

    s = jnp.zeros((8, hd), f32)
    s = s.at[0, :].set(p["c1_bl"][0])
    s = s.at[1, :].set(p["c2_bl"][0])
    s = s.at[2, :].set(p["c3_bl"][0])
    s = s.at[3, :].set(p["pool_w"][0])
    s = s.at[4, :hd1].set(p["l1_b"][0])
    s = s.at[5, :].set(_NEG_BIG)
    s = s.at[5, :ncls].set(p["l2_b"][0])
    return {"w": w_slab, "s": s}


# ------------------------------- glue / model ------------------------------ #

@functools.partial(jax.jit, static_argnames=("num_graphs", "num_classes"))
def graphsage_forward(packed, x, edge_index, batch, num_graphs, num_classes):
    n, f = x.shape
    hdim = packed["s"].shape[1]
    src, dst = edge_index[0], edge_index[1]
    # TODO(synk): dense adjacency densification (dynamic scatter-add from
    # edge_index) has no clean Pallas primitive; built once in XLA glue.
    adj = jnp.zeros((n, n), jnp.float32).at[dst, src].add(1.0)
    gp = max(8, -(-num_graphs // 8) * 8)            # pad graphs to >=8 rows
    gids = jnp.arange(gp, dtype=batch.dtype)
    bm = (gids[:, None] == batch[None, :]).astype(jnp.float32)       # (GP, N)
    bt = (batch[:, None] == gids[None, :]).astype(jnp.float32)       # (N, GP)
    x_pad = jnp.zeros((n, hdim), jnp.float32).at[:, :f].set(x)
    out = graphsage_fused_call(x_pad, adj, bm, bt,
                               packed["w"], packed["s"], gp, hdim)
    return out[:num_graphs, :num_classes]


if __name__ == "__main__":
    num_features, num_classes = 16, 4
    num_graphs, nodes_per_graph = 4, 32     # N = 128: fills the MXU row tile
    n = num_graphs * nodes_per_graph

    key = jax.random.PRNGKey(0)
    kx, kp = jax.random.split(key)
    x = jax.random.normal(kx, (n, num_features), jnp.float32)
    batch = jnp.repeat(jnp.arange(num_graphs, dtype=jnp.int32), nodes_per_graph)

    # bidirectional ring graph inside each graph
    src, dst = [], []
    for g in range(num_graphs):
        base = g * nodes_per_graph
        for i in range(nodes_per_graph):
            a, b = base + i, base + (i + 1) % nodes_per_graph
            src += [a, b]
            dst += [b, a]
    edge_index = jnp.array([src, dst], dtype=jnp.int32)   # [2, 256]

    packed = pack_params(init_params(kp, num_features, num_classes))

    out = graphsage_forward(packed, x, edge_index, batch,
                            num_graphs, num_classes)
    out = jax.block_until_ready(out)

    assert out.shape == (num_graphs, num_classes)
    assert bool(jnp.all(jnp.isfinite(out)))
    # log_softmax rows exponentiate-sum to 1
    assert bool(jnp.all(jnp.abs(jnp.sum(jnp.exp(out), axis=-1) - 1.0) < 1e-4))
    print("KERNEL_OK")
</pallas_src>

<mosaic_0001>
module attributes {stable_mosaic.version = 11 : i64} {
  func.func private @main(%arg0: i32) attributes {dimension_semantics = [#tpu.dimension_semantics<core_parallel>], iteration_bounds = array<i64: 2>, tpu.core_type = #tpu.core_type<sc_scalar_subcore>, window_params = []} {
    return
  }
}

module attributes {stable_mosaic.version = 11 : i64} {
  func.func private @main(%arg0: i32) attributes {dimension_semantics = [#tpu.dimension_semantics<core_parallel>], iteration_bounds = array<i64: 2>, tpu.core_type = #tpu.core_type<sc_scalar_subcore>, window_params = []} {
    return
  }
}

module attributes {stable_mosaic.version = 11 : i64} {
  func.func @_fused_forward_kernel(%arg0: i32, %arg1: memref<128x128xf32, #tpu.memory_space<vmem>>, %arg2: memref<128x128xf32, #tpu.memory_space<vmem>>, %arg3: memref<8x128xf32, #tpu.memory_space<vmem>>, %arg4: memref<128x8xf32, #tpu.memory_space<vmem>>, %arg5: memref<1152x128xf32, #tpu.memory_space<vmem>>, %arg6: memref<8x128xf32, #tpu.memory_space<vmem>>, %arg7: memref<8x128xf32, #tpu.memory_space<vmem>>) attributes {dimension_semantics = [#tpu.dimension_semantics<arbitrary>], iteration_bounds = array<i64: 1>, scalar_prefetch = 0 : i64, scratch_operands = 0 : i64, tpu.core_type = #tpu.core_type<tc>, window_params = [{pipeline_mode = #tpu.pipeline_mode<synchronous>, transform_indices = @transform_0, window_bounds = array<i64: 128, 128>}, {pipeline_mode = #tpu.pipeline_mode<synchronous>, transform_indices = @transform_1, window_bounds = array<i64: 128, 128>}, {pipeline_mode = #tpu.pipeline_mode<synchronous>, transform_indices = @transform_2, window_bounds = array<i64: 8, 128>}, {pipeline_mode = #tpu.pipeline_mode<synchronous>, transform_indices = @transform_3, window_bounds = array<i64: 128, 8>}, {pipeline_mode = #tpu.pipeline_mode<synchronous>, transform_indices = @transform_4, window_bounds = array<i64: 1152, 128>}, {pipeline_mode = #tpu.pipeline_mode<synchronous>, transform_indices = @transform_5, window_bounds = array<i64: 8, 128>}, {pipeline_mode = #tpu.pipeline_mode<synchronous>, transform_indices = @transform_6, window_bounds = array<i64: 8, 128>}]} {
    %c0 = arith.constant 0 : index
    %c0_0 = arith.constant 0 : index
    %0 = vector.load %arg1[%c0, %c0_0] : memref<128x128xf32, #tpu.memory_space<vmem>>, vector<128x128xf32>
    %c0_1 = arith.constant 0 : index
    %c0_2 = arith.constant 0 : index
    %1 = vector.load %arg2[%c0_1, %c0_2] : memref<128x128xf32, #tpu.memory_space<vmem>>, vector<128x128xf32>
    %c0_3 = arith.constant 0 : index
    %c0_4 = arith.constant 0 : index
    %2 = vector.load %arg3[%c0_3, %c0_4] : memref<8x128xf32, #tpu.memory_space<vmem>>, vector<8x128xf32>
    %c0_5 = arith.constant 0 : index
    %c0_6 = arith.constant 0 : index
    %3 = vector.load %arg4[%c0_5, %c0_6] : memref<128x8xf32, #tpu.memory_space<vmem>>, vector<128x8xf32>
    %cst = arith.constant dense<0.000000e+00> : vector<128xf32>
    %4 = vector.multi_reduction <add>, %1, %cst [1] : vector<128x128xf32> to vector<128xf32>
    %5 = vector.shape_cast %4 : vector<128xf32> to vector<128x1xf32>
    %cst_7 = arith.constant 1.000000e+00 : f32
    %6 = vector.broadcast %cst_7 : f32 to vector<128x1xf32>
    %7 = arith.maximumf %5, %6 : vector<128x1xf32>
    %cst_8 = arith.constant 1.000000e+00 : f32
    %8 = vector.broadcast %cst_8 : f32 to vector<128x1xf32>
    %9 = arith.divf %8, %7 : vector<128x1xf32>
    %c0_9 = arith.constant 0 : index
    %c0_10 = arith.constant 0 : index
    %10 = vector.load %arg5[%c0_9, %c0_10] : memref<1152x128xf32, #tpu.memory_space<vmem>>, vector<256x128xf32>
    %c0_11 = arith.constant 0 : index
    %c0_12 = arith.constant 0 : index
    %11 = vector.load %arg6[%c0_11, %c0_12] : memref<8x128xf32, #tpu.memory_space<vmem>>, vector<1x128xf32>
    %cst_13 = arith.constant dense<0.000000e+00> : vector<128x128xf32>
    %12 = tpu.matmul %1, %0, %cst_13 {dimension_numbers = #tpu.dot_dimension_numbers<[1], [0], [0], [1], [0, 0, 1, 1], [], []>} : vector<128x128xf32>, vector<128x128xf32>, vector<128x128xf32> -> vector<128x128xf32>
    %13 = vector.broadcast %9 : vector<128x1xf32> to vector<128x128xf32>
    %14 = arith.mulf %12, %13 : vector<128x128xf32>
    %15 = tpu.concatenate %14, %0 in 1 : vector<128x128xf32>, vector<128x128xf32> -> vector<128x256xf32>
    %cst_14 = arith.constant dense<0.000000e+00> : vector<128x128xf32>
    %16 = tpu.matmul %15, %10, %cst_14 {dimension_numbers = #tpu.dot_dimension_numbers<[1], [0], [0], [1], [0, 0, 1, 1], [], []>} : vector<128x256xf32>, vector<256x128xf32>, vector<128x128xf32> -> vector<128x128xf32>
    %17 = vector.broadcast %11 : vector<1x128xf32> to vector<128x128xf32>
    %18 = arith.addf %16, %17 : vector<128x128xf32>
    %cst_15 = arith.constant 0.000000e+00 : f32
    %19 = vector.broadcast %cst_15 : f32 to vector<128x128xf32>
    %20 = arith.maximumf %18, %19 : vector<128x128xf32>
    %c256 = arith.constant 256 : index
    %c0_16 = arith.constant 0 : index
    %21 = vector.load %arg5[%c256, %c0_16] : memref<1152x128xf32, #tpu.memory_space<vmem>>, vector<256x128xf32>
    %c1 = arith.constant 1 : index
    %c0_17 = arith.constant 0 : index
    %22 = vector.load %arg6[%c1, %c0_17] : memref<8x128xf32, #tpu.memory_space<vmem>>, vector<1x128xf32>
    %cst_18 = arith.constant dense<0.000000e+00> : vector<128x128xf32>
    %23 = tpu.matmul %1, %20, %cst_18 {dimension_numbers = #tpu.dot_dimension_numbers<[1], [0], [0], [1], [0, 0, 1, 1], [], []>} : vector<128x128xf32>, vector<128x128xf32>, vector<128x128xf32> -> vector<128x128xf32>
    %24 = vector.broadcast %9 : vector<128x1xf32> to vector<128x128xf32>
    %25 = arith.mulf %23, %24 : vector<128x128xf32>
    %26 = tpu.concatenate %25, %20 in 1 : vector<128x128xf32>, vector<128x128xf32> -> vector<128x256xf32>
    %cst_19 = arith.constant dense<0.000000e+00> : vector<128x128xf32>
    %27 = tpu.matmul %26, %21, %cst_19 {dimension_numbers = #tpu.dot_dimension_numbers<[1], [0], [0], [1], [0, 0, 1, 1], [], []>} : vector<128x256xf32>, vector<256x128xf32>, vector<128x128xf32> -> vector<128x128xf32>
    %28 = vector.broadcast %22 : vector<1x128xf32> to vector<128x128xf32>
    %29 = arith.addf %27, %28 : vector<128x128xf32>
    %cst_20 = arith.constant 0.000000e+00 : f32
    %30 = vector.broadcast %cst_20 : f32 to vector<128x128xf32>
    %31 = arith.maximumf %29, %30 : vector<128x128xf32>
    %c3 = arith.constant 3 : index
    %c0_21 = arith.constant 0 : index
    %32 = vector.load %arg6[%c3, %c0_21] : memref<8x128xf32, #tpu.memory_space<vmem>>, vector<1x128xf32>
    %c1024 = arith.constant 1024 : index
    %c0_22 = arith.constant 0 : index
    %33 = vector.load %arg5[%c1024, %c0_22] : memref<1152x128xf32, #tpu.memory_space<vmem>>, vector<128x1xf32>
    %34 = arith.mulf %32, %32 : vector<1x128xf32>
    %cst_23 = arith.constant dense<0.000000e+00> : vector<1xf32>
    %35 = vector.multi_reduction <add>, %34, %cst_23 [1] : vector<1x128xf32> to vector<1xf32>
    %36 = vector.shape_cast %35 : vector<1xf32> to vector<1x1xf32>
    %37 = math.rsqrt %36 : vector<1x1xf32>
    %cst_24 = arith.constant dense<0.000000e+00> : vector<1x128xf32>
    %38 = tpu.matmul %32, %31, %cst_24 {dimension_numbers = #tpu.dot_dimension_numbers<[1], [1], [0], [0], [0, 0, 1, 0], [], []>} : vector<1x128xf32>, vector<128x128xf32>, vector<1x128xf32> -> vector<1x128xf32>
    %cst_25 = arith.constant dense<0.000000e+00> : vector<128x1xf32>
    %39 = tpu.matmul %31, %33, %cst_25 {dimension_numbers = #tpu.dot_dimension_numbers<[1], [0], [0], [1], [0, 0, 1, 1], [], []>} : vector<128x128xf32>, vector<128x1xf32>, vector<128x1xf32> -> vector<128x1xf32>
    %40 = vector.broadcast %37 : vector<1x1xf32> to vector<1x128xf32>
    %41 = arith.mulf %38, %40 : vector<1x128xf32>
    %42 = math.tanh %41 : vector<1x128xf32>
    %43 = vector.broadcast %37 : vector<1x1xf32> to vector<128x1xf32>
    %44 = arith.mulf %39, %43 : vector<128x1xf32>
    %45 = math.tanh %44 : vector<128x1xf32>
    %46 = tpu.iota {dimensions = array<i32: 0>} : vector<128x128xi32>
    %47 = tpu.iota {dimensions = array<i32: 1>} : vector<128x128xi32>
    %48 = vector.broadcast %42 : vector<1x128xf32> to vector<128x128xf32>
    %49 = vector.broadcast %45 : vector<128x1xf32> to vector<128x128xf32>
    %50 = arith.cmpf ogt, %48, %49 : vector<128x128xf32>
    %51 = vector.broadcast %42 : vector<1x128xf32> to vector<128x128xf32>
    %52 = vector.broadcast %45 : vector<128x1xf32> to vector<128x128xf32>
    %53 = arith.cmpf oeq, %51, %52 : vector<128x128xf32>
    %54 = arith.cmpi slt, %47, %46 : vector<128x128xi32>
    %55 = arith.andi %53, %54 : vector<128x128xi1>
    %56 = arith.ori %50, %55 : vector<128x128xi1>
    %57 = arith.cmpi ne, %47, %46 : vector<128x128xi32>
    %58 = arith.andi %56, %57 : vector<128x128xi1>
    %59 = arith.extui %58 : vector<128x128xi1> to vector<128x128xi32>
    %60 = arith.sitofp %59 : vector<128x128xi32> to vector<128x128xf32>
    %cst_26 = arith.constant dense<0.000000e+00> : vector<128x8xf32>
    %61 = tpu.matmul %60, %3, %cst_26 {dimension_numbers = #tpu.dot_dimension_numbers<[1], [0], [0], [1], [0, 0, 1, 1], [], []>} : vector<128x128xf32>, vector<128x8xf32>, vector<128x8xf32> -> vector<128x8xf32>
    %62 = arith.mulf %3, %61 : vector<128x8xf32>
    %cst_27 = arith.constant dense<0.000000e+00> : vector<128xf32>
    %63 = vector.multi_reduction <add>, %62, %cst_27 [1] : vector<128x8xf32> to vector<128xf32>
    %64 = vector.shape_cast %63 : vector<128xf32> to vector<128x1xf32>
    %cst_28 = arith.constant dense<0.000000e+00> : vector<8xf32>
    %65 = vector.multi_reduction <add>, %2, %cst_28 [1] : vector<8x128xf32> to vector<8xf32>
    %66 = vector.shape_cast %65 : vector<8xf32> to vector<8x1xf32>
    %cst_29 = arith.constant 8.000000e-01 : f32
    %67 = vector.broadcast %cst_29 : f32 to vector<8x1xf32>
    %68 = arith.mulf %67, %66 : vector<8x1xf32>
    %69 = math.ceil %68 : vector<8x1xf32>
    %cst_30 = arith.constant dense<0.000000e+00> : vector<128x1xf32>
    %70 = tpu.matmul %3, %69, %cst_30 {dimension_numbers = #tpu.dot_dimension_numbers<[1], [0], [0], [1], [0, 0, 1, 1], [], []>} : vector<128x8xf32>, vector<8x1xf32>, vector<128x1xf32> -> vector<128x1xf32>
    %71 = arith.cmpf olt, %64, %70 : vector<128x1xf32>
    %72 = arith.extui %71 : vector<128x1xi1> to vector<128x1xi32>
    %73 = arith.sitofp %72 : vector<128x1xi32> to vector<128x1xf32>
    %74 = arith.mulf %45, %73 : vector<128x1xf32>
    %75 = vector.broadcast %74 : vector<128x1xf32> to vector<128x128xf32>
    %76 = arith.mulf %31, %75 : vector<128x128xf32>
    %cst_31 = arith.constant dense<0.000000e+00> : vector<128x1xf32>
    %77 = tpu.matmul %1, %73, %cst_31 {dimension_numbers = #tpu.dot_dimension_numbers<[1], [0], [0], [1], [0, 0, 1, 1], [], []>} : vector<128x128xf32>, vector<128x1xf32>, vector<128x1xf32> -> vector<128x1xf32>
    %78 = arith.mulf %73, %77 : vector<128x1xf32>
    %cst_32 = arith.constant 1.000000e+00 : f32
    %79 = vector.broadcast %cst_32 : f32 to vector<128x1xf32>
    %80 = arith.maximumf %78, %79 : vector<128x1xf32>
    %81 = arith.divf %73, %80 : vector<128x1xf32>
    %c512 = arith.constant 512 : index
    %c0_33 = arith.constant 0 : index
    %82 = vector.load %arg5[%c512, %c0_33] : memref<1152x128xf32, #tpu.memory_space<vmem>>, vector<256x128xf32>
    %c2 = arith.constant 2 : index
    %c0_34 = arith.constant 0 : index
    %83 = vector.load %arg6[%c2, %c0_34] : memref<8x128xf32, #tpu.memory_space<vmem>>, vector<1x128xf32>
    %cst_35 = arith.constant dense<0.000000e+00> : vector<128x128xf32>
    %84 = tpu.matmul %1, %76, %cst_35 {dimension_numbers = #tpu.dot_dimension_numbers<[1], [0], [0], [1], [0, 0, 1, 1], [], []>} : vector<128x128xf32>, vector<128x128xf32>, vector<128x128xf32> -> vector<128x128xf32>
    %85 = vector.broadcast %81 : vector<128x1xf32> to vector<128x128xf32>
    %86 = arith.mulf %84, %85 : vector<128x128xf32>
    %87 = tpu.concatenate %86, %76 in 1 : vector<128x128xf32>, vector<128x128xf32> -> vector<128x256xf32>
    %cst_36 = arith.constant dense<0.000000e+00> : vector<128x128xf32>
    %88 = tpu.matmul %87, %82, %cst_36 {dimension_numbers = #tpu.dot_dimension_numbers<[1], [0], [0], [1], [0, 0, 1, 1], [], []>} : vector<128x256xf32>, vector<256x128xf32>, vector<128x128xf32> -> vector<128x128xf32>
    %89 = vector.broadcast %83 : vector<1x128xf32> to vector<128x128xf32>
    %90 = arith.addf %88, %89 : vector<128x128xf32>
    %cst_37 = arith.constant 0.000000e+00 : f32
    %91 = vector.broadcast %cst_37 : f32 to vector<128x128xf32>
    %92 = arith.maximumf %90, %91 : vector<128x128xf32>
    %cst_38 = arith.constant 1.000000e+00 : f32
    %93 = vector.broadcast %cst_38 : f32 to vector<8x1xf32>
    %94 = arith.maximumf %69, %93 : vector<8x1xf32>
    %cst_39 = arith.constant 1.000000e+00 : f32
    %95 = vector.broadcast %cst_39 : f32 to vector<8x1xf32>
    %96 = arith.divf %95, %94 : vector<8x1xf32>
    %97 = vector.broadcast %73 : vector<128x1xf32> to vector<128x128xf32>
    %98 = arith.mulf %92, %97 : vector<128x128xf32>
    %cst_40 = arith.constant dense<0.000000e+00> : vector<8x128xf32>
    %99 = tpu.matmul %2, %98, %cst_40 {dimension_numbers = #tpu.dot_dimension_numbers<[1], [0], [0], [1], [0, 0, 1, 1], [], []>} : vector<8x128xf32>, vector<128x128xf32>, vector<8x128xf32> -> vector<8x128xf32>
    %100 = vector.broadcast %96 : vector<8x1xf32> to vector<8x128xf32>
    %101 = arith.mulf %99, %100 : vector<8x128xf32>
    %c768 = arith.constant 768 : index
    %c0_41 = arith.constant 0 : index
    %102 = vector.load %arg5[%c768, %c0_41] : memref<1152x128xf32, #tpu.memory_space<vmem>>, vector<128x128xf32>
    %cst_42 = arith.constant dense<0.000000e+00> : vector<8x128xf32>
    %103 = tpu.matmul %101, %102, %cst_42 {dimension_numbers = #tpu.dot_dimension_numbers<[1], [0], [0], [1], [0, 0, 1, 1], [], []>} : vector<8x128xf32>, vector<128x128xf32>, vector<8x128xf32> -> vector<8x128xf32>
    %c4 = arith.constant 4 : index
    %c0_43 = arith.constant 0 : index
    %104 = vector.load %arg6[%c4, %c0_43] : memref<8x128xf32, #tpu.memory_space<vmem>>, vector<1x128xf32>
    %105 = vector.broadcast %104 : vector<1x128xf32> to vector<8x128xf32>
    %106 = arith.addf %103, %105 : vector<8x128xf32>
    %cst_44 = arith.constant 0.000000e+00 : f32
    %107 = vector.broadcast %cst_44 : f32 to vector<8x128xf32>
    %108 = arith.maximumf %106, %107 : vector<8x128xf32>
    %c896 = arith.constant 896 : index
    %c0_45 = arith.constant 0 : index
    %109 = vector.load %arg5[%c896, %c0_45] : memref<1152x128xf32, #tpu.memory_space<vmem>>, vector<128x128xf32>
    %cst_46 = arith.constant dense<0.000000e+00> : vector<8x128xf32>
    %110 = tpu.matmul %108, %109, %cst_46 {dimension_numbers = #tpu.dot_dimension_numbers<[1], [0], [0], [1], [0, 0, 1, 1], [], []>} : vector<8x128xf32>, vector<128x128xf32>, vector<8x128xf32> -> vector<8x128xf32>
    %c5 = arith.constant 5 : index
    %c0_47 = arith.constant 0 : index
    %111 = vector.load %arg6[%c5, %c0_47] : memref<8x128xf32, #tpu.memory_space<vmem>>, vector<1x128xf32>
    %112 = vector.broadcast %111 : vector<1x128xf32> to vector<8x128xf32>
    %113 = arith.addf %110, %112 : vector<8x128xf32>
    %cst_48 = arith.constant dense<0xFF800000> : vector<8xf32>
    %114 = vector.multi_reduction <maximumf>, %113, %cst_48 [1] : vector<8x128xf32> to vector<8xf32>
    %115 = vector.shape_cast %114 : vector<8xf32> to vector<8x1xf32>
    %116 = vector.broadcast %115 : vector<8x1xf32> to vector<8x128xf32>
    %117 = arith.subf %113, %116 : vector<8x128xf32>
    %118 = math.exp %117 : vector<8x128xf32>
    %cst_49 = arith.constant dense<0.000000e+00> : vector<8xf32>
    %119 = vector.multi_reduction <add>, %118, %cst_49 [1] : vector<8x128xf32> to vector<8xf32>
    %120 = vector.shape_cast %119 : vector<8xf32> to vector<8x1xf32>
    %121 = math.log %120 : vector<8x1xf32>
    %122 = arith.addf %121, %115 : vector<8x1xf32>
    %123 = vector.broadcast %122 : vector<8x1xf32> to vector<8x128xf32>
    %124 = arith.subf %113, %123 : vector<8x128xf32>
    %c0_50 = arith.constant 0 : index
    %c0_51 = arith.constant 0 : index
    %125 = vector.load %arg7[%c0_50, %c0_51] : memref<8x128xf32, #tpu.memory_space<vmem>>, vector<8x128xf32>
    tpu.vector_store %arg7[%c0_50, %c0_51], %124 {strides = array<i32>} : memref<8x128xf32, #tpu.memory_space<vmem>>, vector<8x128xf32>,
    return
  }
  func.func @transform_0(%arg0: i32) -> (i32, i32) {
    %c0_i32 = arith.constant 0 : i32
    %c0_i32_0 = arith.constant 0 : i32
    %c0_i32_1 = arith.constant 0 : i32
    return %c0_i32, %c0_i32_0 : i32, i32
  }
  func.func @transform_1(%arg0: i32) -> (i32, i32) {
    %c0_i32 = arith.constant 0 : i32
    %c0_i32_0 = arith.constant 0 : i32
    %c0_i32_1 = arith.constant 0 : i32
    return %c0_i32, %c0_i32_0 : i32, i32
  }
  func.func @transform_2(%arg0: i32) -> (i32, i32) {
    %c0_i32 = arith.constant 0 : i32
    %c0_i32_0 = arith.constant 0 : i32
    %c0_i32_1 = arith.constant 0 : i32
    return %c0_i32, %c0_i32_0 : i32, i32
  }
  func.func @transform_3(%arg0: i32) -> (i32, i32) {
    %c0_i32 = arith.constant 0 : i32
    %c0_i32_0 = arith.constant 0 : i32
    %c0_i32_1 = arith.constant 0 : i32
    return %c0_i32, %c0_i32_0 : i32, i32
  }
  func.func @transform_4(%arg0: i32) -> (i32, i32) {
    %c0_i32 = arith.constant 0 : i32
    %c0_i32_0 = arith.constant 0 : i32
    %c0_i32_1 = arith.constant 0 : i32
    return %c0_i32, %c0_i32_0 : i32, i32
  }
  func.func @transform_5(%arg0: i32) -> (i32, i32) {
    %c0_i32 = arith.constant 0 : i32
    %c0_i32_0 = arith.constant 0 : i32
    %c0_i32_1 = arith.constant 0 : i32
    return %c0_i32, %c0_i32_0 : i32, i32
  }
  func.func @transform_6(%arg0: i32) -> (i32, i32) {
    %c0_i32 = arith.constant 0 : i32
    %c0_i32_0 = arith.constant 0 : i32
    %c0_i32_1 = arith.constant 0 : i32
    return %c0_i32, %c0_i32_0 : i32, i32
  }
}

</mosaic_0001>

<bundles_post_ra>
// kernel: graphsage_forward.1
= control target key start
LH: loop header
LB: loop body
LE: loop exit
PB: predicated region body
PF: predicated region fallthrough
CT: control target
= control target key end

     0   :  { %11 = vsyncpa [#allocation3], 0  ;;  %s4678_s21 = smov [#allocation2]   ;;  %s6444_s0 = inlined_call_operand.vmem [shape: f32[128,128], index: 0, kind: input, shape index: {}]   ;;  %s6445_s1 = inlined_call_operand.hbm [shape: f32[128,128], index: 1, kind: input, shape index: {}]   ;;  %s6446_s2 = inlined_call_operand.vmem [shape: f32[8,128], index: 2, kind: input, shape index: {}]   ;;  %s6447_s3 = inlined_call_operand.vmem [shape: f32[128,8], index: 3, kind: input, shape index: {}]   ;;  %s6448_s4 = inlined_call_operand.vmem [shape: f32[1152,128], index: 4, kind: input, shape index: {}]   ;;  %s6449_s5 = inlined_call_operand.vmem [shape: f32[8,128], index: 5, kind: input, shape index: {}]   ;;  %s6450_s6 = inlined_call_operand.vmem [shape: f32[8,128], index: 6, kind: output, shape index: {}]  }
   0x1   :  { %s19_s22 = sshll.u32 %s4678_s21, 4  ;;  %s4654_s25 = scalar_lea.hbm %s6445_s1, 2048  ;;  %s20_s22 = int_to_ptr.vmem [resolvable:$true] %s19_s22 }
   0x2   :  { %p4655_p0 = scmp.ne.s32.totalorder %s6445_s1, %s4654_s25  ;;  %p4658_p1 = scmp.lt.u32.totalorder %s4654_s25, %s6445_s1 }
   0x4   :  { %p4660_p2 = pnand %p4658_p1, %p4655_p0 }
   0x6   :  { %4663 = shalt.err (!%p4660_p2)
}
   0x7   :  { %s4664_s30 = scalar_lea.vmem %s20_s22, 2048  ;;  %p4669_p4 = scmp.lt.s32.totalorder %s20_s22, %s20_s22 }
   0x8   :  { %p4665_p3 = scmp.ne.s32.totalorder %s20_s22, %s4664_s30  ;;  %p4670_p5 = scmp.lt.s32.totalorder %s4664_s30, %s4664_s30 }
   0xa   :  { %p4671_p6 = por %p4670_p5, %p4669_p4 }
   0xc   :  { %p4672_p7 = pnand %p4671_p6, %p4665_p3 }
   0xe   :  { %4675 = shalt.err (!%p4672_p7)
}
   0xf   :  { %s4679_s7 = smov 128   ;;  %s4680_s8 = smov 8  }
  0x10   :  { %25 = dma.hbm_to_vmem [thread:$0]  %s6445_s1, 2048, %s20_s22, [#allocation3], %s4679_s7, %s4679_s7, %s4680_s8  }
  0x11   :  { %4676 = dma.done.wait [#allocation3], 2048  }
  0x12   :  { %4677 = vsyncadd [#allocation3], 4294965248  ;;  %v37_v0 = vld [vmem:[%s6444_s0] sm:$0xff]  ;;  %v4740_v1 = vld [vmem:[%s6444_s0 + $0x8] sm:$0xff]  ;;  %vm6462_vm0 = vmmov 0   ;;  %vm902_vm1 = vcmask 1040384  }
  0x13   :  { %v4745_v2 = vld [vmem:[%s6444_s0 + $0x10] sm:$0xff]  ;;  %v4096_v3 = vpack.c.bf16 %v4740_v1, %v37_v0  ;;  %v4751_v4 = vld [vmem:[%s6444_s0 + $0x18] sm:$0xff]  ;;  %428 = vmatprep.mubr.f32.mxu1 %v37_v0  ;;  %v4758_v6 = vld [vmem:[%s6444_s0 + $0x20] sm:$0xff]  ;;  %vm6464_vm2 = vcmask 64512  }
  0x14   :  { %v4100_v5 = vpack.c.bf16 %v4751_v4, %v4745_v2  ;;  %v4763_v7 = vld [vmem:[%s6444_s0 + $0x28] sm:$0xff]  ;;  %v4767_v9 = vld [vmem:[#allocation2] sm:$0xff]  ;;  %v4772_v10 = vld [vmem:[%s6444_s0 + $0x30] sm:$0xff] }
  0x15   :  { %4097 = vmatprep.subr.bf16.mxu0 %v4096_v3  ;;  %v4104_v8 = vpack.c.bf16 %v4763_v7, %v4758_v6  ;;  %v4777_v11 = vld [vmem:[%s6444_s0 + $0x38] sm:$0xff]  ;;  %3626 = vmatprep.mubr.f32.mxu0 %v4767_v9  ;;  %v4780_v12 = vld [vmem:[#allocation2 + $0x10] sm:$0xff]  ;;  %v4789_v14 = vld [vmem:[%s6444_s0 + $0x40] sm:$0xff] }
  0x16   :  { %4099 = vmatpush3.bf16.msra.mxu0 %v4096_v3  ;;  %86 = vadd.xlane.f32.xlu0 %v4767_v9  ;;  %v4108_v13 = vpack.c.bf16 %v4777_v11, %v4772_v10  ;;  %v4791_v15 = vld [vmem:[#allocation2 + $0x8] sm:$0xff]  ;;  %v4798_v17 = vld [vmem:[#allocation2 + $0x18] sm:$0xff]  ;;  %v182_v18 = vld [vmem:[%s6448_s4 + $0x80] sm:$0xff] }
  0x17   :  { %4101 = vmatprep.subr.bf16.mxu0 %v4100_v5  ;;  %90 = vadd.xlane.f32.xlu1 %v4780_v12  ;;  %v4796_v16 = vld [vmem:[%s6444_s0 + $0x48] sm:$0xff]  ;;  %v4804_v19 = vld [vmem:[#allocation2 + $0x20] sm:$0xff]  ;;  %v184_v25 = vld [vmem:[%s6448_s4 + $0x90] sm:$0xff] }
  0x18   :  { %v183_v20 = vld [vmem:[%s6448_s4 + $0x88] sm:$0xff]  ;;  %v166_v21 = vld [vmem:[%s6448_s4] sm:$0xff]  ;;  %v185_v26 = vld [vmem:[%s6448_s4 + $0x98] sm:$0xff]  ;;  %v4112_v28 = vpack.c.bf16 %v4796_v16, %v4789_v14 }
  0x19   :  { %v167_v22 = vld [vmem:[%s6448_s4 + $0x8] sm:$0xff]  ;;  %v4128_v23 = vpack.c.bf16 %v183_v20, %v182_v18  ;;  %v168_v27 = vld [vmem:[%s6448_s4 + $0x10] sm:$0xff]  ;;  %v4132_v29 = vpack.c.bf16 %v185_v26, %v184_v25  ;;  %v169_v30 = vld [vmem:[%s6448_s4 + $0x18] sm:$0xff] }
  0x1a   :  { %4103 = vmatpush3.bf16.msra.mxu0 %v4100_v5  ;;  %88 = vadd.xlane.f32.xlu0 %v4791_v15  ;;  %v4130_v24 = vpack.c.bf16 %v167_v22, %v166_v21  ;;  %v186_v31 = vld [vmem:[%s6448_s4 + $0xa0] sm:$0xff]  ;;  %v187_v32 = vld [vmem:[%s6448_s4 + $0xa8] sm:$0xff]  ;;  %v4839_v33 = vld [vmem:[%s6444_s0 + $0x50] sm:$0xff]  ;;  %v4134_v36 = vpack.c.bf16 %v169_v30, %v168_v27 }
  0x1b   :  { %4105 = vmatprep.subr.bf16.mxu0 %v4104_v8  ;;  %92 = vadd.xlane.f32.xlu1 %v4798_v17  ;;  %v4844_v34 = vld [vmem:[%s6444_s0 + $0x58] sm:$0xff]  ;;  %v4846_v35 = vld [vmem:[#allocation2 + $0x28] sm:$0xff]  ;;  %v4136_v37 = vpack.c.bf16 %v187_v32, %v186_v31  ;;  %v170_v38 = vld [vmem:[%s6448_s4 + $0x20] sm:$0xff] }
  0x1c   :  { %4129 = vmatprep.subr.bf16.mxu1 %v4128_v23  ;;  %v171_v39 = vld [vmem:[%s6448_s4 + $0x28] sm:$0xff]  ;;  %v4116_v40 = vpack.c.bf16 %v4844_v34, %v4839_v33  ;;  %v4858_v41 = vld [vmem:[#allocation2 + $0x30] sm:$0xff]  ;;  %v4863_v42 = vld [vmem:[%s6444_s0 + $0x60] sm:$0xff] }
  0x1d   :  { %4131 = vmatpush3.bf16.msra.mxu1 %v4130_v24  ;;  %v4868_v43 = vld [vmem:[%s6444_s0 + $0x68] sm:$0xff]  ;;  %v4870_v44 = vld [vmem:[#allocation2 + $0x38] sm:$0xff]  ;;  %v4138_v45 = vpack.c.bf16 %v171_v39, %v170_v38  ;;  %v4877_v46 = vld [vmem:[%s6444_s0 + $0x70] sm:$0xff] }
  0x1e   :  { %4107 = vmatpush3.bf16.msra.mxu0 %v4104_v8  ;;  %94 = vadd.xlane.f32.xlu0 %v4804_v19  ;;  %v4120_v47 = vpack.c.bf16 %v4868_v43, %v4863_v42  ;;  %v4884_v48 = vld [vmem:[%s6444_s0 + $0x78] sm:$0xff]  ;;  %v4886_v49 = vld [vmem:[#allocation2 + $0x40] sm:$0xff]  ;;  %v4888_v50 = vld [vmem:[#allocation2 + $0x48] sm:$0xff] }
  0x1f   :  { %4109 = vmatprep.subr.bf16.mxu0 %v4108_v13  ;;  %96 = vadd.xlane.f32.xlu1 %v4846_v35  ;;  %v188_v51 = vld [vmem:[%s6448_s4 + $0xb0] sm:$0xff]  ;;  %v189_v52 = vld [vmem:[%s6448_s4 + $0xb8] sm:$0xff]  ;;  %v4124_v57 = vpack.c.bf16 %v4884_v48, %v4877_v46  ;;  %v190_v60 = vld [vmem:[%s6448_s4 + $0xc0] sm:$0xff] }
  0x20   :  { %4133 = vmatprep.subr.bf16.mxu1 %v4132_v29  ;;  %v172_v53 = vld [vmem:[%s6448_s4 + $0x30] sm:$0xff]  ;;  %v4140_v54 = vpack.c.bf16 %v189_v52, %v188_v51  ;;  %v173_v55 = vld [vmem:[%s6448_s4 + $0x38] sm:$0xff]  ;;  %v191_v61 = vld [vmem:[%s6448_s4 + $0xc8] sm:$0xff] }
  0x21   :  { %4135 = vmatpush3.bf16.msra.mxu1 %v4134_v36  ;;  %v4142_v56 = vpack.c.bf16 %v173_v55, %v172_v53  ;;  %v4906_v58 = vld [vmem:[#allocation2 + $0x50] sm:$0xff]  ;;  %v4908_v59 = vld [vmem:[#allocation2 + $0x58] sm:$0xff]  ;;  %v174_v62 = vld [vmem:[%s6448_s4 + $0x40] sm:$0xff]  ;;  %v4144_v63 = vpack.c.bf16 %v191_v61, %v190_v60 }
  0x22   :  { %4111 = vmatpush3.bf16.msra.mxu0 %v4108_v13  ;;  %98 = vadd.xlane.f32.xlu0 %v4858_v41  ;;  %v175_v0 = vld [vmem:[%s6448_s4 + $0x48] sm:$0xff]  ;;  %v192_v3 = vld [vmem:[%s6448_s4 + $0xd0] sm:$0xff]  ;;  %v193_v5 = vld [vmem:[%s6448_s4 + $0xd8] sm:$0xff] }
  0x23   :  { %4113 = vmatprep.subr.bf16.mxu0 %v4112_v28  ;;  %100 = vadd.xlane.f32.xlu1 %v4870_v44  ;;  %v4146_v8 = vpack.c.bf16 %v175_v0, %v174_v62  ;;  %v4148_v13 = vpack.c.bf16 %v193_v5, %v192_v3  ;;  %v4930_v18 = vld [vmem:[#allocation2 + $0x60] sm:$0xff]  ;;  %v176_v20 = vld [vmem:[%s6448_s4 + $0x50] sm:$0xff]  ;;  %v177_v21 = vld [vmem:[%s6448_s4 + $0x58] sm:$0xff] }
  0x24   :  { %4137 = vmatprep.subr.bf16.mxu1 %v4136_v37  ;;  %v4938_v22 = vld [vmem:[#allocation2 + $0x68] sm:$0xff]  ;;  %v194_v23 = vld [vmem:[%s6448_s4 + $0xe0] sm:$0xff]  ;;  %v4150_v25 = vpack.c.bf16 %v177_v21, %v176_v20  ;;  %v4948_v26 = vld [vmem:[#allocation2 + $0x70] sm:$0xff] }
  0x25   :  { %4139 = vmatpush3.bf16.msra.mxu1 %v4138_v45  ;;  %v195_v24 = vld [vmem:[%s6448_s4 + $0xe8] sm:$0xff]  ;;  %v4956_v30 = vld [vmem:[#allocation2 + $0x78] sm:$0xff]  ;;  %v196_v32 = vld [vmem:[%s6448_s4 + $0xf0] sm:$0xff] }
  0x26   :  { %4115 = vmatpush3.bf16.msra.mxu0 %v4112_v28  ;;  %102 = vadd.xlane.f32.xlu0 %v4886_v49  ;;  %v4152_v27 = vpack.c.bf16 %v195_v24, %v194_v23  ;;  %v178_v28 = vld [vmem:[%s6448_s4 + $0x60] sm:$0xff]  ;;  %v179_v29 = vld [vmem:[%s6448_s4 + $0x68] sm:$0xff]  ;;  %v197_v36 = vld [vmem:[%s6448_s4 + $0xf8] sm:$0xff] }
  0x27   :  { %4117 = vmatprep.subr.bf16.mxu0 %v4116_v40  ;;  %104 = vadd.xlane.f32.xlu1 %v4888_v50  ;;  %v4154_v31 = vpack.c.bf16 %v179_v29, %v178_v28  ;;  %v4156_v37 = vpack.c.bf16 %v197_v36, %v196_v32  ;;  %v180_v38 = vld [vmem:[%s6448_s4 + $0x70] sm:$0xff]  ;;  %v181_v39 = vld [vmem:[%s6448_s4 + $0x78] sm:$0xff] }
  0x28   :  { %4141 = vmatprep.subr.bf16.mxu1 %v4140_v54 }
  0x29   :  { %4143 = vmatpush3.bf16.msra.mxu1 %v4142_v56 }
  0x2a   :  { %4119 = vmatpush3.bf16.msra.mxu0 %v4116_v40  ;;  %106 = vadd.xlane.f32.xlu0 %v4906_v58  ;;  %v4158_v40 = vpack.c.bf16 %v181_v39, %v180_v38 }
  0x2b   :  { %4121 = vmatprep.subr.bf16.mxu0 %v4120_v47  ;;  %108 = vadd.xlane.f32.xlu1 %v4908_v59 }
  0x2c   :  { %4145 = vmatprep.subr.bf16.mxu1 %v4144_v63 }
  0x2d   :  { %4147 = vmatpush3.bf16.msra.mxu1 %v4146_v8 }
  0x2e   :  { %4123 = vmatpush3.bf16.msra.mxu0 %v4120_v47  ;;  %110 = vadd.xlane.f32.xlu0 %v4930_v18 }
  0x2f   :  { %4125 = vmatprep.subr.bf16.mxu0 %v4124_v57  ;;  %112 = vadd.xlane.f32.xlu1 %v4938_v22 }
  0x30   :  { %4149 = vmatprep.subr.bf16.mxu1 %v4148_v13 }
  0x31   :  { %4151 = vmatpush3.bf16.msra.mxu1 %v4150_v25 }
  0x32   :  { %4127 = vmatpush3.bf16.msra.mxu0 %v4124_v57  ;;  %114 = vadd.xlane.f32.xlu0 %v4948_v26 }
  0x33   :  { %116 = vadd.xlane.f32.xlu1 %v4956_v30  ;;  %4153 = vmatprep.subr.bf16.mxu1 %v4152_v27 }
  0x35   :  { %3627 = vmatmul.mubr.f32.vlgmr.msra.gmra.mrb[0].mxu0 %v4791_v15  ;;  %4155 = vmatpush3.bf16.msra.mxu1 %v4154_v31 }
  0x36   :  { %3629 = vmatprep.mubr.f32.mxu0 %v4780_v12  ;;  %4157 = vmatprep.subr.bf16.mxu1 %v4156_v37 }
  0x39   :  { %3630 = vmatmul.mubr.f32.gmra.mrb[2].mxu0 %v4798_v17  ;;  %4159 = vmatpush3.bf16.msra.mxu1 %v4158_v40 }
  0x3a   :  { %3632 = vmatprep.mubr.f32.mxu0 %v4804_v19 }
  0x3d   :  { %3633 = vmatmul.mubr.f32.gmra.mrb[4].mxu0 %v4846_v35 }
  0x3e   :  { %3635 = vmatprep.mubr.f32.mxu0 %v4858_v41 }
  0x41   :  { %3636 = vmatmul.mubr.f32.gmra.mrb[6].mxu0 %v4870_v44 }
  0x42   :  { %3638 = vmatprep.mubr.f32.mxu0 %v4886_v49 }
  0x45   :  { %3639 = vmatmul.mubr.f32.gmra.mrb[8].mxu0 %v4888_v50 }
  0x46   :  { %3641 = vmatprep.mubr.f32.mxu0 %v4906_v58 }
  0x49   :  { %3642 = vmatmul.mubr.f32.gmra.mrb[10].mxu0 %v4908_v59 }
  0x4a   :  { %3644 = vmatprep.mubr.f32.mxu0 %v4930_v18 }
  0x4d   :  { %3645 = vmatmul.mubr.f32.gmra.mrb[12].mxu0 %v4938_v22 }
  0x4e   :  { %3647 = vmatprep.mubr.f32.mxu0 %v4948_v26 }
  0x51   :  { %3648 = vmatmul.mubr.f32.gmra.mrb[14].mxu0 %v4956_v30 }
  0x52   :  { %3682 = vmatprep.mubr.f32.mxu0 %v4767_v9 }
  0xa3   :  { %v87_v9 = vpop.xlane.xlu0 %86 }
  0xa4   :  { %v118_v45 = vmax.f32 %v87_v9, 1.0  ;;  %v91_v51 = vpop.xlane.xlu1 %90 }
  0xa5   :  { %v120_v53 = vmax.f32 %v91_v51, 1.0 }
  0xa6   :  { %4531 = vrcp.f32 %v118_v45 }
  0xa7   :  { %v89_v47 = vpop.xlane.xlu0 %88 }
  0xa8   :  { %v119_v52 = vmax.f32 %v89_v47, 1.0  ;;  %v93_v54 = vpop.xlane.xlu1 %92 }
  0xa9   :  { %v121_v56 = vmax.f32 %v93_v54, 1.0 }
  0xaa   :  { %4533 = vrcp.f32 %v119_v52 }
  0xab   :  { %4535 = vrcp.f32 %v120_v53  ;;  %v95_v55 = vpop.xlane.xlu0 %94 }
  0xac   :  { %v122_v60 = vmax.f32 %v95_v55, 1.0  ;;  %4537 = vrcp.f32 %v121_v56  ;;  %v97_v0 = vpop.xlane.xlu1 %96 }
  0xad   :  { %v123_v20 = vmax.f32 %v97_v0, 1.0 }
  0xae   :  { %4539 = vrcp.f32 %v122_v60 }
  0xaf   :  { %v99_v8 = vpop.xlane.xlu0 %98  ;;  %4541 = vrcp.f32 %v123_v20 }
  0xb0   :  { %v4988_v57 = vpop.eup %4531  ;;  %v124_v24 = vmax.f32 %v99_v8, 1.0  ;;  %v101_v29 = vpop.xlane.xlu1 %100 }
  0xb1   :  { %v125_v37 = vmax.f32 %v101_v29, 1.0 }
  0xb2   :  { %4543 = vrcp.f32 %v124_v24 }
  0xb3   :  { %v103_v32 = vpop.xlane.xlu0 %102  ;;  %4545 = vrcp.f32 %v125_v37 }
  0xb4   :  { %v4991_v3 = vpop.eup %4533  ;;  %v126_v40 = vmax.f32 %v103_v32, 1.0  ;;  %v105_v47 = vpop.xlane.xlu1 %104 }
  0xb5   :  { %v4993_v13 = vpop.eup %4535  ;;  %v127_v54 = vmax.f32 %v105_v47, 1.0 }
  0xb6   :  { %v4999_v31 = vpop.eup %4537  ;;  %4547 = vrcp.f32 %v126_v40 }
  0xb7   :  { %v107_v52 = vpop.xlane.xlu0 %106  ;;  %4549 = vrcp.f32 %v127_v54 }
  0xb8   :  { %v128_v60 = vmax.f32 %v107_v52, 1.0 }
  0xba   :  { %4551 = vrcp.f32 %v128_v60 }
 0x108   :  { %v3628_v61 = vpop.f32.mrb[0].mxu0 }
 0x109   :  { %v265_v62 = vpop.f32.mrb[1].mxu0  ;;  %v345_v23 = vmul.f32 %v4991_v3, %v3628_v61 }
 0x10a   :  { %v344_v63 = vmul.f32 %v4988_v57, %v265_v62 }
 0x10c   :  { %429 = vmatmul.mubr.f32.vlgmr.msra.gmra.mrb[0].mxu1 %v344_v63  ;;  %v3631_v5 = vpop.f32.mrb[2].mxu0  ;;  %v109_v63 = vpop.xlane.xlu1 %108 }
 0x10d   :  { %433 = vmatprep.mubr.f32.mxu1 %v4740_v1  ;;  %v275_v21 = vpop.f32.mrb[3].mxu0  ;;  %v5001_v1 = vpop.eup %4539  ;;  %v347_v39 = vmul.f32 %v4999_v31, %v3631_v5  ;;  %v129_v20 = vmax.f32 %v109_v63, 1.0 }
 0x10e   :  { %v346_v25 = vmul.f32 %v4993_v13, %v275_v21  ;;  %v5007_v51 = vpop.eup %4541  ;;  %v111_v5 = vpop.xlane.xlu0 %110 }
 0x10f   :  { %v130_v24 = vmax.f32 %v111_v5, 1.0  ;;  %4553 = vrcp.f32 %v129_v20 }
 0x110   :  { %434 = vmatmul.mubr.f32.gmra.mrb[2].mxu1 %v345_v23  ;;  %v3634_v27 = vpop.f32.mrb[4].mxu0 }
 0x111   :  { %438 = vmatprep.mubr.f32.mxu1 %v4745_v2  ;;  %v285_v28 = vpop.f32.mrb[5].mxu0  ;;  %v349_v56 = vmul.f32 %v5007_v51, %v3634_v27  ;;  %4555 = vrcp.f32 %v130_v24 }
 0x112   :  { %v348_v9 = vmul.f32 %v5001_v1, %v285_v28  ;;  %v115_v28 = vpop.xlane.xlu0 %114 }
 0x114   :  { %439 = vmatmul.mubr.f32.gmra.mrb[4].mxu1 %v346_v25  ;;  %v3637_v36 = vpop.f32.mrb[6].mxu0 }
 0x115   :  { %443 = vmatprep.mubr.f32.mxu1 %v4751_v4  ;;  %v295_v38 = vpop.f32.mrb[7].mxu0  ;;  %v5009_v4 = vpop.eup %4543 }
 0x116   :  { %v350_v61 = vmul.f32 %v5009_v4, %v295_v38  ;;  %v5015_v0 = vpop.eup %4545 }
 0x117   :  { %v351_v23 = vmul.f32 %v5015_v0, %v3637_v36  ;;  %v132_v36 = vmax.f32 %v115_v28, 1.0 }
 0x118   :  { %444 = vmatmul.mubr.f32.gmra.mrb[6].mxu1 %v347_v39  ;;  %v3640_v2 = vpop.f32.mrb[8].mxu0 }
 0x119   :  { %448 = vmatprep.mubr.f32.mxu1 %v4758_v6  ;;  %v305_v45 = vpop.f32.mrb[9].mxu0 }
 0x11c   :  { %449 = vmatmul.mubr.f32.gmra.mrb[8].mxu1 %v348_v9  ;;  %v3643_v53 = vpop.f32.mrb[10].mxu0 }
 0x11d   :  { %453 = vmatprep.mubr.f32.mxu1 %v4763_v7  ;;  %v315_v55 = vpop.f32.mrb[11].mxu0  ;;  %v5017_v7 = vpop.eup %4547 }
 0x11e   :  { %v352_v25 = vmul.f32 %v5017_v7, %v305_v45  ;;  %v5023_v27 = vpop.eup %4549 }
 0x11f   :  { %v5025_v29 = vpop.eup %4551 }
 0x120   :  { %454 = vmatmul.mubr.f32.gmra.mrb[10].mxu1 %v349_v56  ;;  %v3646_v6 = vpop.f32.mrb[12].mxu0  ;;  %v354_v37 = vmul.f32 %v5025_v29, %v315_v55  ;;  %v5031_v38 = vpop.eup %4553 }
 0x121   :  { %458 = vmatprep.mubr.f32.mxu1 %v4772_v10  ;;  %v325_v62 = vpop.f32.mrb[13].mxu0  ;;  %v113_v10 = vpop.xlane.xlu1 %112 }
 0x122   :  { %v131_v32 = vmax.f32 %v113_v10, 1.0  ;;  %v5033_v39 = vpop.eup %4555 }
 0x123   :  { %v356_v9 = vmul.f32 %v5033_v39, %v325_v62 }
 0x124   :  { %459 = vmatmul.mubr.f32.gmra.mrb[12].mxu1 %v350_v61  ;;  %v3649_v8 = vpop.f32.mrb[14].mxu0  ;;  %4557 = vrcp.f32 %v131_v32 }
 0x125   :  { %463 = vmatprep.mubr.f32.mxu1 %v4777_v11  ;;  %v335_v21 = vpop.f32.mrb[15].mxu0  ;;  %v353_v11 = vmul.f32 %v5023_v27, %v3640_v2  ;;  %4559 = vrcp.f32 %v132_v36 }
 0x128   :  { %464 = vmatmul.mubr.f32.gmra.mrb[14].mxu1 %v351_v23 }
 0x129   :  { %468 = vmatprep.mubr.f32.mxu1 %v4789_v14  ;;  %v117_v14 = vpop.xlane.xlu1 %116 }
 0x12a   :  { %v133_v40 = vmax.f32 %v117_v14, 1.0 }
 0x12c   :  { %469 = vmatmul.mubr.f32.gmra.mrb[16].mxu1 %v352_v25  ;;  %4561 = vrcp.f32 %v133_v40 }
 0x12d   :  { %473 = vmatprep.mubr.f32.mxu1 %v4796_v16  ;;  %v355_v16 = vmul.f32 %v5031_v38, %v3643_v53 }
 0x12e   :  { %v5039_v2 = vpop.eup %4557 }
 0x12f   :  { %v357_v45 = vmul.f32 %v5039_v2, %v3646_v6 }
 0x130   :  { %474 = vmatmul.mubr.f32.gmra.mrb[18].mxu1 %v353_v11 }
 0x131   :  { %478 = vmatprep.mubr.f32.mxu1 %v4839_v33  ;;  %v5041_v33 = vpop.eup %4559 }
 0x132   :  { %v358_v47 = vmul.f32 %v5041_v33, %v335_v21 }
 0x134   :  { %479 = vmatmul.mubr.f32.gmra.mrb[20].mxu1 %v354_v37 }
 0x135   :  { %483 = vmatprep.mubr.f32.mxu1 %v4844_v34 }
 0x136   :  { %v5047_v34 = vpop.eup %4561 }
 0x138   :  { %484 = vmatmul.mubr.f32.gmra.mrb[22].mxu1 %v355_v16 }
 0x139   :  { %488 = vmatprep.mubr.f32.mxu1 %v4863_v42  ;;  %v359_v42 = vmul.f32 %v5047_v34, %v3649_v8 }
 0x13c   :  { %489 = vmatmul.mubr.f32.gmra.mrb[24].mxu1 %v356_v9 }
 0x13d   :  { %493 = vmatprep.mubr.f32.mxu1 %v4868_v43  ;;  %v5054_v43 = vld [vmem:[%s6449_s5] ss:$0 sm:$0xff] }
 0x140   :  { %494 = vmatmul.mubr.f32.gmra.mrb[26].mxu1 %v357_v45 }
 0x141   :  { %498 = vmatprep.mubr.f32.mxu1 %v4877_v46 }
 0x144   :  { %499 = vmatmul.mubr.f32.gmra.mrb[28].mxu1 %v358_v47 }
 0x145   :  { %503 = vmatprep.mubr.f32.mxu1 %v4884_v48 }
 0x148   :  { %504 = vmatmul.mubr.f32.gmra.mrb[30].mxu1 %v359_v42 }
 0x1df   :  { %v3141_v52 = vpop.f32.mrb[0].mxu1 }
 0x1e0   :  { %v3142_v53 = vpop.f32.mrb[1].mxu1 }
 0x1e1   :  { %v3143_v54 = vadd.f32 %v3142_v53, %v3141_v52 }
 0x1e3   :  { %v3144_v55 = vpop.f32.mrb[2].mxu1  ;;  %v5057_v46 = vadd.f32 %v3143_v54, %v5054_v43 }
 0x1e4   :  { %v3145_v56 = vpop.f32.mrb[3].mxu1 }
 0x1e5   :  { %v3146_v60 = vadd.f32 %v3145_v56, %v3144_v55  ;;  %v509_v62 = vmax.f32 %v5057_v46, 0.0 }
 0x1e7   :  { %v5060_v61 = vadd.f32 %v3146_v60, %v5054_v43  ;;  %v3147_v48 = vpop.f32.mrb[4].mxu1 }
 0x1e8   :  { %v3148_v6 = vpop.f32.mrb[5].mxu1 }
 0x1e9   :  { %v510_v63 = vmax.f32 %v5060_v61, 0.0  ;;  %v3149_v5 = vadd.f32 %v3148_v6, %v3147_v48 }
 0x1eb   :  { %v3150_v8 = vpop.f32.mrb[6].mxu1  ;;  %v4160_v20 = vpack.c.bf16 %v510_v63, %v509_v62  ;;  %v5069_v23 = vadd.f32 %v3149_v5, %v5054_v43 }
 0x1ec   :  { %v3151_v21 = vpop.f32.mrb[7].mxu1 }
 0x1ed   :  { %v3152_v24 = vadd.f32 %v3151_v21, %v3150_v8  ;;  %4161 = vmatprep.subr.bf16.mxu0 %v4160_v20  ;;  %v511_v32 = vmax.f32 %v5069_v23, 0.0 }
 0x1ee   :  { %4163 = vmatpush3.bf16.msra.mxu0 %v4160_v20 }
 0x1ef   :  { %v5072_v25 = vadd.f32 %v3152_v24, %v5054_v43  ;;  %v3153_v10 = vpop.f32.mrb[8].mxu1 }
 0x1f0   :  { %v3154_v28 = vpop.f32.mrb[9].mxu1 }
 0x1f1   :  { %v512_v11 = vmax.f32 %v5072_v25, 0.0  ;;  %v3155_v36 = vadd.f32 %v3154_v28, %v3153_v10 }
 0x1f3   :  { %v3156_v37 = vpop.f32.mrb[10].mxu1  ;;  %v4164_v14 = vpack.c.bf16 %v512_v11, %v511_v32  ;;  %v5081_v16 = vadd.f32 %v3155_v36, %v5054_v43 }
 0x1f4   :  { %v3157_v40 = vpop.f32.mrb[11].mxu1 }
 0x1f5   :  { %v3158_v9 = vadd.f32 %v3157_v40, %v3156_v37  ;;  %4165 = vmatprep.subr.bf16.mxu0 %v4164_v14  ;;  %v513_v52 = vmax.f32 %v5081_v16, 0.0 }
 0x1f6   :  { %4167 = vmatpush3.bf16.msra.mxu0 %v4164_v14 }
 0x1f7   :  { %v5084_v45 = vadd.f32 %v3158_v9, %v5054_v43  ;;  %v3159_v47 = vpop.f32.mrb[12].mxu1 }
 0x1f8   :  { %v3160_v42 = vpop.f32.mrb[13].mxu1 }
 0x1f9   :  { %v6455_v53 = vmax.f32 %v5084_v45, 0.0  ;;  %v3161_v54 = vadd.f32 %v3160_v42, %v3159_v47 }
 0x1fb   :  { %v3162_v55 = vpop.f32.mrb[14].mxu1  ;;  %v4168_v56 = vpack.c.bf16 %v6455_v53, %v513_v52  ;;  %v5093_v48 = vadd.f32 %v3161_v54, %v5054_v43 }
 0x1fc   :  { %v3163_v60 = vpop.f32.mrb[15].mxu1 }
 0x1fd   :  { %v3164_v6 = vadd.f32 %v3163_v60, %v3162_v55  ;;  %4169 = vmatprep.subr.bf16.mxu0 %v4168_v56  ;;  %v6454_v21 = vmax.f32 %v5093_v48, 0.0 }
 0x1fe   :  { %4171 = vmatpush3.bf16.msra.mxu0 %v4168_v56 }
 0x1ff   :  { %v5096_v5 = vadd.f32 %v3164_v6, %v5054_v43  ;;  %v3165_v8 = vpop.f32.mrb[16].mxu1 }
 0x200   :  { %v3166_v20 = vpop.f32.mrb[17].mxu1 }
 0x201   :  { %v6451_v24 = vmax.f32 %v5096_v5, 0.0  ;;  %v3167_v10 = vadd.f32 %v3166_v20, %v3165_v8 }
 0x203   :  { %v3168_v28 = vpop.f32.mrb[18].mxu1  ;;  %v4172_v36 = vpack.c.bf16 %v6451_v24, %v6454_v21  ;;  %v5105_v14 = vadd.f32 %v3167_v10, %v5054_v43 }
 0x204   :  { %v3169_v37 = vpop.f32.mrb[19].mxu1 }
 0x205   :  { %v3170_v40 = vadd.f32 %v3169_v37, %v3168_v28  ;;  %4173 = vmatprep.subr.bf16.mxu0 %v4172_v36  ;;  %v6453_v54 = vmax.f32 %v5105_v14, 0.0 }
 0x206   :  { %4175 = vmatpush3.bf16.msra.mxu0 %v4172_v36 }
 0x207   :  { %v5108_v9 = vadd.f32 %v3170_v40, %v5054_v43  ;;  %v3171_v47 = vpop.f32.mrb[20].mxu1 }
 0x208   :  { %v3172_v42 = vpop.f32.mrb[21].mxu1 }
 0x209   :  { %v6452_v55 = vmax.f32 %v5108_v9, 0.0  ;;  %v3173_v56 = vadd.f32 %v3172_v42, %v3171_v47 }
 0x20b   :  { %v3174_v60 = vpop.f32.mrb[22].mxu1  ;;  %v4176_v6 = vpack.c.bf16 %v6452_v55, %v6453_v54  ;;  %v5117_v20 = vadd.f32 %v3173_v56, %v5054_v43 }
 0x20c   :  { %v3175_v8 = vpop.f32.mrb[23].mxu1 }
 0x20d   :  { %v3176_v10 = vadd.f32 %v3175_v8, %v3174_v60  ;;  %4177 = vmatprep.subr.bf16.mxu0 %v4176_v6  ;;  %v6461_v40 = vmax.f32 %v5117_v20, 0.0 }
 0x20e   :  { %4179 = vmatpush3.bf16.msra.mxu0 %v4176_v6 }
 0x20f   :  { %v5120_v28 = vadd.f32 %v3176_v10, %v5054_v43  ;;  %v3177_v36 = vpop.f32.mrb[24].mxu1 }
 0x210   :  { %v3178_v37 = vpop.f32.mrb[25].mxu1 }
 0x211   :  { %v6456_v47 = vmax.f32 %v5120_v28, 0.0  ;;  %v3179_v42 = vadd.f32 %v3178_v37, %v3177_v36 }
 0x213   :  { %v3180_v24 = vpop.f32.mrb[26].mxu1  ;;  %v4180_v56 = vpack.c.bf16 %v6456_v47, %v6461_v40  ;;  %v5129_v60 = vadd.f32 %v3179_v42, %v5054_v43  ;;  %v546_v40 = vld [vmem:[%s6448_s4 + $0x1a8] sm:$0xff] }
 0x214   :  { %v3181_v55 = vpop.f32.mrb[27].mxu1 }
 0x215   :  { %v3182_v6 = vadd.f32 %v3181_v55, %v3180_v24  ;;  %4181 = vmatprep.subr.bf16.mxu0 %v4180_v56  ;;  %v6460_v36 = vmax.f32 %v5129_v60, 0.0 }
 0x216   :  { %4183 = vmatpush3.bf16.msra.mxu0 %v4180_v56 }
 0x217   :  { %v5132_v8 = vadd.f32 %v3182_v6, %v5054_v43  ;;  %v3183_v10 = vpop.f32.mrb[28].mxu1  ;;  %v542_v6 = vld [vmem:[%s6448_s4 + $0x188] sm:$0xff] }
 0x218   :  { %v3184_v54 = vpop.f32.mrb[29].mxu1 }
 0x219   :  { %v6457_v37 = vmax.f32 %v5132_v8, 0.0  ;;  %v3185_v21 = vadd.f32 %v3184_v54, %v3183_v10  ;;  %v541_v54 = vld [vmem:[%s6448_s4 + $0x180] sm:$0xff] }
 0x21b   :  { %v3186_v53 = vpop.f32.mrb[30].mxu1  ;;  %v4184_v42 = vpack.c.bf16 %v6457_v37, %v6460_v36  ;;  %v5141_v24 = vadd.f32 %v3185_v21, %v5054_v43  ;;  %v4192_v21 = vpack.c.bf16 %v542_v6, %v541_v54  ;;  %v527_v6 = vld [vmem:[%s6448_s4 + $0x110] sm:$0xff]  ;;  %v545_v36 = vld [vmem:[%s6448_s4 + $0x1a0] sm:$0xff] }
 0x21c   :  { %v3187_v47 = vpop.f32.mrb[31].mxu1 }
 0x21d   :  { %v3188_v55 = vadd.f32 %v3187_v47, %v3186_v53  ;;  %4185 = vmatprep.subr.bf16.mxu0 %v4184_v42  ;;  %v6459_v10 = vmax.f32 %v5141_v24, 0.0  ;;  %v526_v47 = vld [vmem:[%s6448_s4 + $0x108] sm:$0xff] }
 0x21e   :  { %4187 = vmatpush3.bf16.msra.mxu0 %v4184_v42  ;;  %v543_v42 = vld [vmem:[%s6448_s4 + $0x190] sm:$0xff] }
 0x21f   :  { %v5144_v56 = vadd.f32 %v3188_v55, %v5054_v43  ;;  %v525_v43 = vld [vmem:[%s6448_s4 + $0x100] sm:$0xff]  ;;  %v544_v55 = vld [vmem:[%s6448_s4 + $0x198] sm:$0xff] }
 0x220   :  { %v4196_v54 = vpack.c.bf16 %v544_v55, %v543_v42  ;;  %v547_v42 = vld [vmem:[%s6448_s4 + $0x1b0] sm:$0xff] }
 0x221   :  { %v6458_v37 = vmax.f32 %v5144_v56, 0.0 }
 0x223   :  { %v4188_v53 = vpack.c.bf16 %v6458_v37, %v6459_v10  ;;  %v4194_v37 = vpack.c.bf16 %v526_v47, %v525_v43  ;;  %v528_v10 = vld [vmem:[%s6448_s4 + $0x118] sm:$0xff]  ;;  %v529_v43 = vld [vmem:[%s6448_s4 + $0x120] sm:$0xff]  ;;  %v530_v47 = vld [vmem:[%s6448_s4 + $0x128] sm:$0xff] }
 0x225   :  { %4189 = vmatprep.subr.bf16.mxu0 %v4188_v53 }
 0x226   :  { %4191 = vmatpush3.bf16.msra.mxu0 %v4188_v53  ;;  %v4198_v53 = vpack.c.bf16 %v528_v10, %v527_v6  ;;  %v549_v10 = vld [vmem:[%s6448_s4 + $0x1c0] sm:$0xff]  ;;  %v534_v6 = vld [vmem:[%s6448_s4 + $0x148] sm:$0xff] }
 0x227   :  { %4193 = vmatprep.subr.bf16.mxu0 %v4192_v21  ;;  %v4200_v21 = vpack.c.bf16 %v546_v40, %v545_v36  ;;  %v531_v36 = vld [vmem:[%s6448_s4 + $0x130] sm:$0xff] }
 0x229   :  { %3683 = vmatmul.mubr.f32.vlgmr.msra.gmra.mrb[16].mxu0 %v4791_v15  ;;  %v4202_v15 = vpack.c.bf16 %v530_v47, %v529_v43  ;;  %v535_v43 = vld [vmem:[%s6448_s4 + $0x150] sm:$0xff]  ;;  %v536_v47 = vld [vmem:[%s6448_s4 + $0x158] sm:$0xff] }
 0x22a   :  { %3685 = vmatprep.mubr.f32.mxu0 %v4780_v12  ;;  %4195 = vmatpush3.bf16.msra.mxu0 %v4194_v37  ;;  %v548_v12 = vld [vmem:[%s6448_s4 + $0x1b8] sm:$0xff] }
 0x22b   :  { %4197 = vmatprep.subr.bf16.mxu0 %v4196_v54  ;;  %v4204_v40 = vpack.c.bf16 %v548_v12, %v547_v42  ;;  %v532_v37 = vld [vmem:[%s6448_s4 + $0x138] sm:$0xff]  ;;  %v533_v54 = vld [vmem:[%s6448_s4 + $0x140] sm:$0xff] }
 0x22c   :  { %v553_v42 = vld [vmem:[%s6448_s4 + $0x1e0] sm:$0xff] }
 0x22d   :  { %3686 = vmatmul.mubr.f32.gmra.mrb[18].mxu0 %v4798_v17  ;;  %v550_v17 = vld [vmem:[%s6448_s4 + $0x1c8] sm:$0xff] }
 0x22e   :  { %3688 = vmatprep.mubr.f32.mxu0 %v4804_v19  ;;  %4199 = vmatpush3.bf16.msra.mxu0 %v4198_v53  ;;  %v4206_v19 = vpack.c.bf16 %v532_v37, %v531_v36  ;;  %v4208_v55 = vpack.c.bf16 %v550_v17, %v549_v10  ;;  %v551_v53 = vld [vmem:[%s6448_s4 + $0x1d0] sm:$0xff] }
 0x22f   :  { %4201 = vmatprep.subr.bf16.mxu0 %v4200_v21 }
 0x231   :  { %3689 = vmatmul.mubr.f32.gmra.mrb[20].mxu0 %v4846_v35  ;;  %v552_v35 = vld [vmem:[%s6448_s4 + $0x1d8] sm:$0xff] }
 0x232   :  { %3691 = vmatprep.mubr.f32.mxu0 %v4858_v41  ;;  %4203 = vmatpush3.bf16.msra.mxu0 %v4202_v15  ;;  %v4210_v41 = vpack.c.bf16 %v534_v6, %v533_v54  ;;  %v4212_v21 = vpack.c.bf16 %v552_v35, %v551_v53  ;;  %v537_v15 = vld [vmem:[%s6448_s4 + $0x160] sm:$0xff] }
 0x233   :  { %4205 = vmatprep.subr.bf16.mxu0 %v4204_v40  ;;  %v538_v40 = vld [vmem:[%s6448_s4 + $0x168] sm:$0xff] }
 0x235   :  { %3692 = vmatmul.mubr.f32.gmra.mrb[22].mxu0 %v4870_v44  ;;  %v554_v44 = vld [vmem:[%s6448_s4 + $0x1e8] sm:$0xff] }
 0x236   :  { %3694 = vmatprep.mubr.f32.mxu0 %v4886_v49  ;;  %4207 = vmatpush3.bf16.msra.mxu0 %v4206_v19  ;;  %v4214_v49 = vpack.c.bf16 %v536_v47, %v535_v43  ;;  %v4216_v12 = vpack.c.bf16 %v554_v44, %v553_v42  ;;  %v6479_v43 = vmax.f32 %v5117_v20, 0.0 }
 0x237   :  { %4209 = vmatprep.subr.bf16.mxu0 %v4208_v55 }
 0x239   :  { %3695 = vmatmul.mubr.f32.gmra.mrb[24].mxu0 %v4888_v50  ;;  %v4218_v50 = vpack.c.bf16 %v538_v40, %v537_v15 }
 0x23a   :  { %3697 = vmatprep.mubr.f32.mxu0 %v4906_v58  ;;  %4211 = vmatpush3.bf16.msra.mxu0 %v4210_v41  ;;  %v555_v58 = vld [vmem:[%s6448_s4 + $0x1f0] sm:$0xff] }
 0x23b   :  { %4213 = vmatprep.subr.bf16.mxu0 %v4212_v21 }
 0x23d   :  { %3698 = vmatmul.mubr.f32.gmra.mrb[26].mxu0 %v4908_v59  ;;  %v556_v59 = vld [vmem:[%s6448_s4 + $0x1f8] sm:$0xff] }
 0x23e   :  { %3700 = vmatprep.mubr.f32.mxu0 %v4930_v18  ;;  %4215 = vmatpush3.bf16.msra.mxu0 %v4214_v49  ;;  %v4220_v18 = vpack.c.bf16 %v556_v59, %v555_v58 }
 0x23f   :  { %4217 = vmatprep.subr.bf16.mxu0 %v4216_v12 }
 0x241   :  { %3701 = vmatmul.mubr.f32.gmra.mrb[28].mxu0 %v4938_v22  ;;  %v539_v22 = vld [vmem:[%s6448_s4 + $0x170] sm:$0xff] }
 0x242   :  { %3703 = vmatprep.mubr.f32.mxu0 %v4948_v26  ;;  %4219 = vmatpush3.bf16.msra.mxu0 %v4218_v50  ;;  %v540_v26 = vld [vmem:[%s6448_s4 + $0x178] sm:$0xff] }
 0x243   :  { %4221 = vmatprep.subr.bf16.mxu0 %v4220_v18 }
 0x245   :  { %3704 = vmatmul.mubr.f32.gmra.mrb[30].mxu0 %v4956_v30  ;;  %v4222_v30 = vpack.c.bf16 %v540_v26, %v539_v22 }
 0x246   :  { %787 = vmatprep.mubr.f32.mxu0 %v509_v62 }
 0x247   :  { %4223 = vmatpush3.bf16.msra.mxu0 %v4222_v30 }
 0x2fc   :  { %v3684_v46 = vpop.f32.mrb[16].mxu0 }
 0x2fd   :  { %v624_v62 = vpop.f32.mrb[17].mxu0  ;;  %v704_v17 = vmul.f32 %v4991_v3, %v3684_v46 }
 0x2fe   :  { %v703_v36 = vmul.f32 %v4988_v57, %v624_v62 }
 0x300   :  { %v3687_v37 = vpop.f32.mrb[18].mxu0  ;;  %788 = vmatmul.mubr.f32.vlgmr.msra.gmra.mrb[32].mxu0 %v703_v36 }
 0x301   :  { %v634_v10 = vpop.f32.mrb[19].mxu0  ;;  %792 = vmatprep.mubr.f32.mxu0 %v510_v63  ;;  %v706_v57 = vmul.f32 %v4999_v31, %v3687_v37  ;;  %v6475_v31 = vmax.f32 %v5093_v48, 0.0  ;;  %v6478_v48 = vmax.f32 %v5108_v9, 0.0 }
 0x302   :  { %v705_v54 = vmul.f32 %v4993_v13, %v634_v10  ;;  %v6474_v13 = vmax.f32 %v5084_v45, 0.0  ;;  %v6477_v45 = vmax.f32 %v5105_v14, 0.0 }
 0x304   :  { %v3690_v19 = vpop.f32.mrb[20].mxu0  ;;  %793 = vmatmul.mubr.f32.gmra.mrb[34].mxu0 %v704_v17 }
 0x305   :  { %v644_v55 = vpop.f32.mrb[21].mxu0  ;;  %797 = vmatprep.mubr.f32.mxu0 %v511_v32  ;;  %v708_v35 = vmul.f32 %v5007_v51, %v3690_v19 }
 0x306   :  { %v707_v3 = vmul.f32 %v5001_v1, %v644_v55  ;;  %v6476_v1 = vmax.f32 %v5096_v5, 0.0 }
 0x308   :  { %v3693_v6 = vpop.f32.mrb[22].mxu0  ;;  %798 = vmatmul.mubr.f32.gmra.mrb[36].mxu0 %v705_v54 }
 0x309   :  { %v654_v53 = vpop.f32.mrb[23].mxu0  ;;  %802 = vmatprep.mubr.f32.mxu0 %v512_v11  ;;  %v710_v21 = vmul.f32 %v5015_v0, %v3693_v6  ;;  %v6480_v0 = vmax.f32 %v5120_v28, 0.0 }
 0x30a   :  { %v709_v41 = vmul.f32 %v5009_v4, %v654_v53 }
 0x30c   :  { %v3696_v61 = vpop.f32.mrb[24].mxu0  ;;  %803 = vmatmul.mubr.f32.gmra.mrb[38].mxu0 %v706_v57 }
 0x30d   :  { %v664_v63 = vpop.f32.mrb[25].mxu0  ;;  %807 = vmatprep.mubr.f32.mxu0 %v513_v52  ;;  %v712_v4 = vmul.f32 %v5023_v27, %v3696_v61  ;;  %v6482_v27 = vmax.f32 %v5132_v8, 0.0  ;;  %v6467_v8 = vmov 0.0  }
 0x30e   :  { %v711_v51 = vmul.f32 %v5017_v7, %v664_v63  ;;  %v6481_v7 = vmax.f32 %v5129_v60, 0.0  ;;  %3738 = vmatprep.mubr.msk.f32.mxu1 %vm6462_vm0, %v6467_v8 }
 0x310   :  { %v3699_v23 = vpop.f32.mrb[26].mxu0  ;;  %808 = vmatmul.mubr.f32.gmra.mrb[40].mxu0 %v707_v3 }
 0x311   :  { %v674_v32 = vpop.f32.mrb[27].mxu0  ;;  %812 = vmatprep.mubr.f32.mxu0 %v6474_v13  ;;  %v714_v14 = vmul.f32 %v5031_v38, %v3699_v23  ;;  %v6484_v38 = vmax.f32 %v5144_v56, 0.0 }
 0x312   :  { %v713_v5 = vmul.f32 %v5025_v29, %v674_v32  ;;  %v6483_v29 = vmax.f32 %v5141_v24, 0.0 }
 0x314   :  { %v3702_v25 = vpop.f32.mrb[28].mxu0  ;;  %813 = vmatmul.mubr.f32.gmra.mrb[42].mxu0 %v708_v35 }
 0x315   :  { %v684_v11 = vpop.f32.mrb[29].mxu0  ;;  %817 = vmatprep.mubr.f32.mxu0 %v6475_v31  ;;  %v716_v20 = vmul.f32 %v5039_v2, %v3702_v25 }
 0x316   :  { %v715_v9 = vmul.f32 %v5033_v39, %v684_v11  ;;  %v6465_v39 = vmov 0.0|0.0  }
 0x317   :  { %4224 = vmatprep.subr.bf16.mxu1 %v6465_v39 }
 0x318   :  { %v3705_v16 = vpop.f32.mrb[30].mxu0  ;;  %818 = vmatmul.mubr.f32.gmra.mrb[44].mxu0 %v709_v41 }
 0x319   :  { %v694_v52 = vpop.f32.mrb[31].mxu0  ;;  %822 = vmatprep.mubr.f32.mxu0 %v6476_v1  ;;  %v718_v60 = vmul.f32 %v5047_v34, %v3705_v16  ;;  %v5322_v34 = vld [vmem:[%s6449_s5 + $0x3] sm:$0x1] }
 0x31a   :  { %v717_v28 = vmul.f32 %v5041_v33, %v694_v52  ;;  %v5317_v33 = vld [vmem:[%s6449_s5 + $0x1] ss:$0 sm:$0xff]  ;;  %v901_v12 = vmul.f32 %v5322_v34, %v5322_v34 }
 0x31c   :  { %823 = vmatmul.mubr.f32.gmra.mrb[46].mxu0 %v710_v21  ;;  %v903_v50 = vsel %vm902_vm1, %v901_v12, 0.0 }
 0x31d   :  { %827 = vmatprep.mubr.f32.mxu0 %v6477_v45  ;;  %904 = vadd.xlane.f32.xlu0 %v903_v50 }
 0x320   :  { %828 = vmatmul.mubr.f32.gmra.mrb[48].mxu0 %v711_v51 }
 0x321   :  { %832 = vmatprep.mubr.f32.mxu0 %v6478_v48 }
 0x324   :  { %833 = vmatmul.mubr.f32.gmra.mrb[50].mxu0 %v712_v4 }
 0x325   :  { %837 = vmatprep.mubr.f32.mxu0 %v6479_v43 }
 0x328   :  { %838 = vmatmul.mubr.f32.gmra.mrb[52].mxu0 %v713_v5 }
 0x329   :  { %842 = vmatprep.mubr.f32.mxu0 %v6480_v0 }
 0x32c   :  { %843 = vmatmul.mubr.f32.gmra.mrb[54].mxu0 %v714_v14 }
 0x32d   :  { %847 = vmatprep.mubr.f32.mxu0 %v6481_v7 }
 0x330   :  { %848 = vmatmul.mubr.f32.gmra.mrb[56].mxu0 %v715_v9 }
 0x331   :  { %852 = vmatprep.mubr.f32.mxu0 %v6482_v27 }
 0x334   :  { %853 = vmatmul.mubr.f32.gmra.mrb[58].mxu0 %v716_v20 }
 0x335   :  { %857 = vmatprep.mubr.f32.mxu0 %v6483_v29 }
 0x338   :  { %858 = vmatmul.mubr.f32.gmra.mrb[60].mxu0 %v717_v28 }
 0x339   :  { %862 = vmatprep.mubr.f32.mxu0 %v6484_v38 }
 0x33c   :  { %863 = vmatmul.mubr.f32.gmra.mrb[62].mxu0 %v718_v60 }
 0x3d3   :  { %v3253_v2 = vpop.f32.mrb[32].mxu0 }
 0x3d4   :  { %v3254_v24 = vpop.f32.mrb[33].mxu0 }
 0x3d5   :  { %v3255_v47 = vadd.f32 %v3254_v24, %v3253_v2 }
 0x3d7   :  { %v3256_v56 = vpop.f32.mrb[34].mxu0  ;;  %v790_v44 = vadd.f32 %v3255_v47, %v5317_v33 }
 0x3d8   :  { %v3257_v42 = vpop.f32.mrb[35].mxu0 }
 0x3d9   :  { %v3258_v49 = vadd.f32 %v3257_v42, %v3256_v56  ;;  %v5328_v59 = vmax.f32 %v790_v44, 0.0 }
 0x3db   :  { %v795_v15 = vadd.f32 %v3258_v49, %v5317_v33  ;;  %v3259_v40 = vpop.f32.mrb[36].mxu0 }
 0x3dc   :  { %v3260_v58 = vpop.f32.mrb[37].mxu0 }
 0x3dd   :  { %v5330_v18 = vmax.f32 %v795_v15, 0.0  ;;  %v3261_v22 = vadd.f32 %v3260_v58, %v3259_v40 }
 0x3df   :  { %v3262_v26 = vpop.f32.mrb[38].mxu0  ;;  %v4225_v30 = vpack.c.bf16 %v5330_v18, %v5328_v59  ;;  %v800_v62 = vadd.f32 %v3261_v22, %v5317_v33 }
 0x3e0   :  { %v3263_v46 = vpop.f32.mrb[39].mxu0 }
 0x3e1   :  { %v3264_v36 = vadd.f32 %v3263_v46, %v3262_v26  ;;  %4226 = vmatpush3.bf16.xpose.msra.mxu1 %v4225_v30  ;;  %v5337_v19 = vmax.f32 %v800_v62, 0.0 }
 0x3e2   :  { %4227 = vmatprep.subr.bf16.mxu1 %v6465_v39 }
 0x3e3   :  { %v805_v37 = vadd.f32 %v3264_v36, %v5317_v33  ;;  %v3265_v10 = vpop.f32.mrb[40].mxu0 }
 0x3e4   :  { %v3266_v17 = vpop.f32.mrb[41].mxu0 }
 0x3e5   :  { %v5339_v55 = vmax.f32 %v805_v37, 0.0  ;;  %v3267_v54 = vadd.f32 %v3266_v17, %v3265_v10 }
 0x3e7   :  { %v3268_v6 = vpop.f32.mrb[42].mxu0  ;;  %v4228_v53 = vpack.c.bf16 %v5339_v55, %v5337_v19  ;;  %v810_v61 = vadd.f32 %v3267_v54, %v5317_v33 }
 0x3e8   :  { %v3269_v57 = vpop.f32.mrb[43].mxu0 }
 0x3e9   :  { %v3270_v63 = vadd.f32 %v3269_v57, %v3268_v6  ;;  %4229 = vmatpush3.bf16.xpose.msra.mxu1 %v4228_v53  ;;  %v5346_v13 = vmax.f32 %v810_v61, 0.0 }
 0x3ea   :  { %4230 = vmatprep.subr.bf16.mxu1 %v6465_v39 }
 0x3eb   :  { %v815_v3 = vadd.f32 %v3270_v63, %v5317_v33  ;;  %v3271_v23 = vpop.f32.mrb[44].mxu0 }
 0x3ec   :  { %v3272_v32 = vpop.f32.mrb[45].mxu0 }
 0x3ed   :  { %v5348_v35 = vmax.f32 %v815_v3, 0.0  ;;  %v3273_v25 = vadd.f32 %v3272_v32, %v3271_v23  ;;  %v885_v3 = vld [vmem:[%s6448_s4 + $0x400] sm:$0xff]  ;;  %v886_v23 = vld [vmem:[%s6448_s4 + $0x408] sm:$0xff] }
 0x3ef   :  { %v3274_v11 = vpop.f32.mrb[46].mxu0  ;;  %v4231_v31 = vpack.c.bf16 %v5348_v35, %v5346_v13  ;;  %v820_v16 = vadd.f32 %v3273_v25, %v5317_v33 }
 0x3f0   :  { %v3275_v41 = vpop.f32.mrb[47].mxu0 }
 0x3f1   :  { %v3276_v52 = vadd.f32 %v3275_v41, %v3274_v11  ;;  %4232 = vmatpush3.bf16.xpose.msra.mxu1 %v4231_v31  ;;  %v5355_v51 = vmax.f32 %v820_v16, 0.0  ;;  %v4248_v11 = vpack.c.bf16 %v886_v23, %v885_v3  ;;  %v888_v41 = vld [vmem:[%s6448_s4 + $0x418] sm:$0xff] }
 0x3f2   :  { %4233 = vmatprep.subr.bf16.mxu1 %v6465_v39 }
 0x3f3   :  { %v825_v1 = vadd.f32 %v3276_v52, %v5317_v33  ;;  %v3277_v21 = vpop.f32.mrb[48].mxu0  ;;  %v889_v52 = vld [vmem:[%s6448_s4 + $0x420] sm:$0xff] }
 0x3f4   :  { %v3278_v45 = vpop.f32.mrb[49].mxu0 }
 0x3f5   :  { %v5357_v48 = vmax.f32 %v825_v1, 0.0  ;;  %v3279_v4 = vadd.f32 %v3278_v45, %v3277_v21  ;;  %v890_v1 = vld [vmem:[%s6448_s4 + $0x428] sm:$0xff]  ;;  %v891_v45 = vld [vmem:[%s6448_s4 + $0x430] sm:$0xff] }
 0x3f6   :  { %v4256_v21 = vpack.c.bf16 %v890_v1, %v889_v52 }
 0x3f7   :  { %v3280_v43 = vpop.f32.mrb[50].mxu0  ;;  %v4234_v5 = vpack.c.bf16 %v5357_v48, %v5355_v51  ;;  %v830_v14 = vadd.f32 %v3279_v4, %v5317_v33  ;;  %v892_v4 = vld [vmem:[%s6448_s4 + $0x438] sm:$0xff] }
 0x3f8   :  { %v3281_v0 = vpop.f32.mrb[51].mxu0 }
 0x3f9   :  { %v3282_v7 = vadd.f32 %v3281_v0, %v3280_v43  ;;  %4235 = vmatpush3.bf16.xpose.msra.mxu1 %v4234_v5  ;;  %v5364_v29 = vmax.f32 %v830_v14, 0.0  ;;  %v4260_v43 = vpack.c.bf16 %v892_v4, %v891_v45  ;;  %v894_v5 = vld [vmem:[%s6448_s4 + $0x448] sm:$0xff]  ;;  %v895_v14 = vld [vmem:[%s6448_s4 + $0x450] sm:$0xff] }
 0x3fa   :  { %4236 = vmatprep.subr.bf16.mxu1 %v6465_v39 }
 0x3fb   :  { %v835_v9 = vadd.f32 %v3282_v7, %v5317_v33  ;;  %v3283_v27 = vpop.f32.mrb[52].mxu0  ;;  %v896_v7 = vld [vmem:[%s6448_s4 + $0x458] sm:$0xff] }
 0x3fc   :  { %v3284_v20 = vpop.f32.mrb[53].mxu0 }
 0x3fd   :  { %v5366_v28 = vmax.f32 %v835_v9, 0.0  ;;  %v3285_v38 = vadd.f32 %v3284_v20, %v3283_v27  ;;  %v4268_v9 = vpack.c.bf16 %v896_v7, %v895_v14  ;;  %v897_v27 = vld [vmem:[%s6448_s4 + $0x460] sm:$0xff]  ;;  %v898_v20 = vld [vmem:[%s6448_s4 + $0x468] sm:$0xff] }
 0x3ff   :  { %v3286_v60 = vpop.f32.mrb[54].mxu0  ;;  %v4237_v2 = vpack.c.bf16 %v5366_v28, %v5364_v29  ;;  %v840_v47 = vadd.f32 %v3285_v38, %v5317_v33  ;;  %v4272_v38 = vpack.c.bf16 %v898_v20, %v897_v27 }
 0x400   :  { %v3287_v24 = vpop.f32.mrb[55].mxu0 }
 0x401   :  { %v3288_v56 = vadd.f32 %v3287_v24, %v3286_v60  ;;  %4238 = vmatpush3.bf16.xpose.msra.mxu1 %v4237_v2  ;;  %v5373_v12 = vmax.f32 %v840_v47, 0.0  ;;  %v899_v60 = vld [vmem:[%s6448_s4 + $0x470] sm:$0xff]  ;;  %v900_v2 = vld [vmem:[%s6448_s4 + $0x478] sm:$0xff]  ;;  %v4684_v47 = vmov 0  }
 0x402   :  { %4239 = vmatprep.subr.bf16.mxu1 %v6465_v39  ;;  %v4276_v24 = vpack.c.bf16 %v900_v2, %v899_v60  ;;  %4489 = vset.pattern.permute.xlu0 %v4684_v47 }
 0x403   :  { %v845_v42 = vadd.f32 %v3288_v56, %v5317_v33  ;;  %v3289_v44 = vpop.f32.mrb[56].mxu0  ;;  %4490 = vset.pattern.permute.xlu1 %v4684_v47  ;;  %v5465_v56 = vld [vmem:[%s6447_s3] sm:$0xff]  ;;  %v5578_v47 = vld [vmem:[%s6447_s3 + $0x78] sm:$0xff] }
 0x404   :  { %v3290_v49 = vpop.f32.mrb[57].mxu0 }
 0x405   :  { %v5375_v15 = vmax.f32 %v845_v42, 0.0  ;;  %v3291_v40 = vadd.f32 %v3290_v49, %v3289_v44  ;;  %v5470_v42 = vld [vmem:[%s6447_s3 + $0x8] sm:$0xff]  ;;  %v5475_v44 = vld [vmem:[%s6447_s3 + $0x10] sm:$0xff] }
 0x406   :  { %v4280_v49 = vpack.c.bf16 %v5470_v42, %v5465_v56 }
 0x407   :  { %v3292_v50 = vpop.f32.mrb[58].mxu0  ;;  %v4240_v58 = vpack.c.bf16 %v5375_v15, %v5373_v12  ;;  %v850_v26 = vadd.f32 %v3291_v40, %v5317_v33  ;;  %v5482_v40 = vld [vmem:[%s6447_s3 + $0x18] sm:$0xff] }
 0x408   :  { %v3293_v22 = vpop.f32.mrb[59].mxu0  ;;  %4281 = vmatprep.subr.bf16.mxu0 %v4280_v49 }
 0x409   :  { %v3294_v30 = vadd.f32 %v3293_v22, %v3292_v50  ;;  %4241 = vmatpush3.bf16.xpose.msra.mxu1 %v4240_v58  ;;  %v5382_v37 = vmax.f32 %v850_v26, 0.0  ;;  %v4284_v50 = vpack.c.bf16 %v5482_v40, %v5475_v44  ;;  %v5489_v58 = vld [vmem:[%s6447_s3 + $0x20] sm:$0xff]  ;;  %v5494_v22 = vld [vmem:[%s6447_s3 + $0x28] sm:$0xff]  ;;  %4283 = vmatpush3.bf16.msra.mxu0 %v4280_v49 }
 0x40a   :  { %4242 = vmatprep.subr.bf16.mxu1 %v6465_v39  ;;  %v4288_v26 = vpack.c.bf16 %v5494_v22, %v5489_v58 }
 0x40b   :  { %v855_v46 = vadd.f32 %v3294_v30, %v5317_v33  ;;  %v3295_v62 = vpop.f32.mrb[60].mxu0  ;;  %6485 = vst [vmem:[#allocation5_spill] sm:$0xff] %v5382_v37  ;;  %4285 = vmatprep.subr.bf16.mxu0 %v4284_v50  ;;  %v5501_v30 = vld [vmem:[%s6447_s3 + $0x30] sm:$0xff] }
 0x40c   :  { %v3296_v36 = vpop.f32.mrb[61].mxu0 }
 0x40d   :  { %v5384_v10 = vmax.f32 %v855_v46, 0.0  ;;  %v3297_v17 = vadd.f32 %v3296_v36, %v3295_v62  ;;  %v5506_v46 = vld [vmem:[%s6447_s3 + $0x38] sm:$0xff]  ;;  %4287 = vmatpush3.bf16.msra.mxu0 %v4284_v50  ;;  %v5513_v36 = vld [vmem:[%s6447_s3 + $0x40] sm:$0xff] }
 0x40e   :  { %4289 = vmatprep.subr.bf16.mxu0 %v4288_v26  ;;  %v4292_v62 = vpack.c.bf16 %v5506_v46, %v5501_v30 }
 0x40f   :  { %v3298_v54 = vpop.f32.mrb[62].mxu0  ;;  %v4243_v6 = vpack.c.bf16 %v5384_v10, %v5382_v37  ;;  %v860_v57 = vadd.f32 %v3297_v17, %v5317_v33  ;;  %v5518_v17 = vld [vmem:[%s6447_s3 + $0x48] sm:$0xff] }
 0x410   :  { %v3299_v53 = vpop.f32.mrb[63].mxu0 }
 0x411   :  { %v3300_v61 = vadd.f32 %v3299_v53, %v3298_v54  ;;  %4244 = vmatpush3.bf16.xpose.msra.mxu1 %v4243_v6  ;;  %v5397_v32 = vmax.f32 %v860_v57, 0.0  ;;  %4291 = vmatpush3.bf16.msra.mxu0 %v4288_v26  ;;  %v5523_v54 = vld [vmem:[%s6447_s3 + $0x50] sm:$0xff]  ;;  %v4296_v6 = vpack.c.bf16 %v5518_v17, %v5513_v36  ;;  %v5530_v53 = vld [vmem:[%s6447_s3 + $0x58] sm:$0xff] }
 0x412   :  { %4245 = vmatprep.subr.bf16.mxu1 %v6465_v39  ;;  %4293 = vmatprep.subr.bf16.mxu0 %v4292_v62  ;;  %v4300_v57 = vpack.c.bf16 %v5530_v53, %v5523_v54 }
 0x413   :  { %v865_v63 = vadd.f32 %v3300_v61, %v5317_v33  ;;  %6486 = vst [vmem:[#allocation6_spill] sm:$0xff] %v5397_v32  ;;  %v887_v33 = vld [vmem:[%s6448_s4 + $0x410] sm:$0xff]  ;;  %v5537_v61 = vld [vmem:[%s6447_s3 + $0x60] sm:$0xff] }
 0x414   :  { %v4252_v16 = vpack.c.bf16 %v888_v41, %v887_v33  ;;  %v1124_v33 = vlaneseq }
 0x415   :  { %v5399_v25 = vmax.f32 %v865_v63, 0.0  ;;  %4295 = vmatpush3.bf16.msra.mxu0 %v4292_v62  ;;  %v5542_v63 = vld [vmem:[%s6447_s3 + $0x68] sm:$0xff] }
 0x416   :  { %4297 = vmatprep.subr.bf16.mxu0 %v4296_v6  ;;  %v4304_v3 = vpack.c.bf16 %v5542_v63, %v5537_v61  ;;  %v5549_v41 = vshrl.u32 %v1124_v33, 7 }
 0x417   :  { %6487 = vst [vmem:[#allocation7_spill] sm:$0xff] %v5399_v25  ;;  %v4246_v31 = vpack.c.bf16 %v5399_v25, %v5397_v32 }
 0x419   :  { %4247 = vmatpush3.bf16.xpose.msra.mxu1 %v4246_v31  ;;  %4299 = vmatpush3.bf16.msra.mxu0 %v4296_v6  ;;  %v905_v31 = vpop.xlane.xlu0 %904 }
 0x41a   :  { %4249 = vmatprep.subr.bf16.mxu1 %v4248_v11  ;;  %4301 = vmatprep.subr.bf16.mxu0 %v4300_v57  ;;  %4563 = vrsqrt.f32 %v905_v31 }
 0x41d   :  { %4303 = vmatpush3.bf16.msra.mxu0 %v4300_v57 }
 0x41e   :  { %4305 = vmatprep.subr.bf16.mxu0 %v4304_v3 }
 0x420   :  { %3739 = vmatmul.mubr.f32.vlgmr.msra.gmra.mrb[32].mxu1 %v5322_v34  ;;  %v893_v34 = vld [vmem:[%s6448_s4 + $0x440] sm:$0xff] }
 0x421   :  { %4251 = vmatpush3.bf16.msra.mxu1 %v4248_v11  ;;  %3773 = vmatprep.mubr.f32.mxu1 %v5328_v59  ;;  %v4264_v0 = vpack.c.bf16 %v894_v5, %v893_v34 }
 0x422   :  { %4253 = vmatprep.subr.bf16.mxu1 %v4252_v16  ;;  %4307 = vmatpush3.bf16.msra.mxu0 %v4304_v3 }
 0x424   :  { %v5552_v52 = vpop.eup %4563 }
 0x425   :  { %4255 = vmatpush3.bf16.msra.mxu1 %v4252_v16  ;;  %v1126_v16 = vsub.s32 0, %v5549_v41 }
 0x426   :  { %4257 = vmatprep.subr.bf16.mxu1 %v4256_v21 }
 0x427   :  { %v5557_v1 = vrot.slane %v5552_v52, %v1126_v16 }
 0x429   :  { %4259 = vmatpush3.bf16.msra.mxu1 %v4256_v21 }
 0x42a   :  { %4261 = vmatprep.subr.bf16.mxu1 %v4260_v43 }
 0x42d   :  { %4263 = vmatpush3.bf16.msra.mxu1 %v4260_v43 }
 0x42e   :  { %4265 = vmatprep.subr.bf16.mxu1 %v4264_v0 }
 0x431   :  { %4267 = vmatpush3.bf16.msra.mxu1 %v4264_v0 }
 0x432   :  { %4269 = vmatprep.subr.bf16.mxu1 %v4268_v9 }
 0x435   :  { %4271 = vmatpush3.bf16.msra.mxu1 %v4268_v9 }
 0x436   :  { %4273 = vmatprep.subr.bf16.mxu1 %v4272_v38 }
 0x439   :  { %4275 = vmatpush3.bf16.msra.mxu1 %v4272_v38 }
 0x43a   :  { %4277 = vmatprep.subr.bf16.mxu1 %v4276_v24 }
 0x43d   :  { %4279 = vmatpush3.bf16.msra.mxu1 %v4276_v24  ;;  %v5573_v24 = vld [vmem:[%s6447_s3 + $0x70] sm:$0xff] }
 0x43e   :  { %v4308_v26 = vpack.c.bf16 %v5578_v47, %v5573_v24 }
 0x440   :  { %3774 = vmatmul.mubr.f32.vlgmr.msra.gmra.mrb[34].mxu1 %v5330_v18  ;;  %4309 = vmatprep.subr.bf16.mxu0 %v4308_v26 }
 0x441   :  { %3776 = vmatprep.mubr.f32.mxu1 %v5337_v19  ;;  %4311 = vmatpush3.bf16.msra.mxu0 %v4308_v26 }
 0x444   :  { %3777 = vmatmul.mubr.f32.gmra.mrb[36].mxu1 %v5339_v55 }
 0x445   :  { %3779 = vmatprep.mubr.f32.mxu1 %v5346_v13 }
 0x448   :  { %3780 = vmatmul.mubr.f32.gmra.mrb[38].mxu1 %v5348_v35 }
 0x449   :  { %3782 = vmatprep.mubr.f32.mxu1 %v5355_v51 }
 0x44c   :  { %3783 = vmatmul.mubr.f32.gmra.mrb[40].mxu1 %v5357_v48 }
 0x44d   :  { %3785 = vmatprep.mubr.f32.mxu1 %v5364_v29 }
 0x450   :  { %3786 = vmatmul.mubr.f32.gmra.mrb[42].mxu1 %v5366_v28 }
 0x451   :  { %3788 = vmatprep.mubr.f32.mxu1 %v5373_v12 }
 0x454   :  { %3789 = vmatmul.mubr.f32.gmra.mrb[44].mxu1 %v5375_v15 }
 0x455   :  { %3791 = vmatprep.mubr.f32.mxu1 %v5382_v37  ;;  %v6500_v37 = vmov 0 }
 0x458   :  { %3792 = vmatmul.mubr.f32.gmra.mrb[46].mxu1 %v5384_v10 }
 0x459   :  { %3794 = vmatprep.mubr.f32.mxu1 %v5397_v32 }
 0x45c   :  { %3795 = vmatmul.mubr.f32.gmra.mrb[48].mxu1 %v5399_v25  ;;  %v1172_v25 = vadd.s32 88, %v5549_v41 }
 0x45d   :  { %3855 = vmatprep.mubr.msk.f32.mxu1 %vm6464_vm2, %v5465_v56 }
 0x4f3   :  { %v5546_v23 = vpop.f32.mrb[32].mxu1 }
 0x4f4   :  { %v3740_v11 = vpop.f32.mrb[33].mxu1 }
 0x513   :  { %v3775_v21 = vpop.f32.mrb[34].mxu1 }
 0x514   :  { %v1129_v45 = vmul.f32 %v3775_v21, %v5557_v1  ;;  %v1043_v4 = vpop.f32.mrb[35].mxu1 }
 0x515   :  { %v1128_v43 = vmul.f32 %v5557_v1, %v1043_v4 }
 0x516   :  { %4565 = vtanh.f32 %v1129_v45 }
 0x517   :  { %4567 = vtanh.f32 %v1128_v43  ;;  %v3778_v34 = vpop.f32.mrb[36].mxu1 }
 0x518   :  { %v1131_v5 = vmul.f32 %v3778_v34, %v5557_v1  ;;  %v1053_v0 = vpop.f32.mrb[37].mxu1 }
 0x519   :  { %v1130_v14 = vmul.f32 %v5557_v1, %v1053_v0 }
 0x51a   :  { %4569 = vtanh.f32 %v1131_v5 }
 0x51b   :  { %v3781_v7 = vpop.f32.mrb[38].mxu1  ;;  %4571 = vtanh.f32 %v1130_v14 }
 0x51c   :  { %v1063_v9 = vpop.f32.mrb[39].mxu1  ;;  %v1133_v27 = vmul.f32 %v3781_v7, %v5557_v1 }
 0x51d   :  { %v1132_v49 = vmul.f32 %v5557_v1, %v1063_v9 }
 0x51e   :  { %4573 = vtanh.f32 %v1133_v27 }
 0x51f   :  { %v3784_v20 = vpop.f32.mrb[40].mxu1  ;;  %4575 = vtanh.f32 %v1132_v49 }
 0x520   :  { %v5564_v38 = vpop.eup %4565  ;;  %v1073_v60 = vpop.f32.mrb[41].mxu1  ;;  %v1135_v57 = vmul.f32 %v3784_v20, %v5557_v1 }
 0x521   :  { %v5566_v2 = vpop.eup %4567  ;;  %1190 = vperm.xlu0 %4489, %v5564_v38   ;;  %v1134_v45 = vmul.f32 %v5557_v1, %v1073_v60 }
 0x522   :  { %1185 = vperm.xlu1 %4490, %v5566_v2   ;;  %4577 = vtanh.f32 %v1135_v57 }
 0x523   :  { %v3787_v50 = vpop.f32.mrb[42].mxu1 }
 0x524   :  { %v5583_v62 = vpop.eup %4569  ;;  %v1083_v6 = vpop.f32.mrb[43].mxu1  ;;  %v1137_v20 = vmul.f32 %v3787_v50, %v5557_v1 }
 0x525   :  { %v5587_v31 = vpop.eup %4571  ;;  %v1136_v0 = vmul.f32 %v5557_v1, %v1083_v6 }
 0x526   :  { %1200 = vperm.xlu1 %4490, %v5583_v62  }
 0x527   :  { %v3790_v3 = vpop.f32.mrb[44].mxu1 }
 0x528   :  { %v1093_v11 = vpop.f32.mrb[45].mxu1  ;;  %v5592_v34 = vpop.eup %4573  ;;  %v1139_v26 = vmul.f32 %v3790_v3, %v5557_v1 }
 0x529   :  { %v1138_v21 = vmul.f32 %v5557_v1, %v1093_v11  ;;  %v5597_v9 = vpop.eup %4575 }
 0x52a   :  { %1195 = vperm.xlu1 %4490, %v5587_v31  }
 0x52b   :  { %4579 = vtanh.f32 %v1138_v21  ;;  %v3793_v4 = vpop.f32.mrb[46].mxu1 }
 0x52c   :  { %v1103_v43 = vpop.f32.mrb[47].mxu1  ;;  %4581 = vtanh.f32 %v1134_v45  ;;  %v5602_v60 = vpop.eup %4577  ;;  %v1141_v50 = vmul.f32 %v3793_v4, %v5557_v1 }
 0x52d   :  { %v1140_v5 = vmul.f32 %v5557_v1, %v1103_v43 }
 0x52e   :  { %1210 = vperm.xlu1 %4490, %v5592_v34  }
 0x52f   :  { %4583 = vtanh.f32 %v1140_v5  ;;  %v3796_v14 = vpop.f32.mrb[48].mxu1 }
 0x530   :  { %v1113_v7 = vpop.f32.mrb[49].mxu1  ;;  %4585 = vtanh.f32 %v1136_v0  ;;  %v1143_v3 = vmul.f32 %v3796_v14, %v5557_v1  ;;  %v1122_v0 = vmul.f32 %v5552_v52, %v5546_v23  ;;  %v5643_v14 = vand.u32 127, %v1124_v33 }
 0x531   :  { %v1142_v27 = vmul.f32 %v5557_v1, %v1113_v7  ;;  %v69_v1 = vld [vmem:[%s6446_s2] sm:$0xff]  ;;  %v1162_v7 = vadd.s32 8, %v5549_v41  ;;  %v1163_v33 = vadd.s32 16, %v5549_v41  ;;  %v1166_v52 = vadd.s32 40, %v5549_v41 }
 0x532   :  { %1205 = vperm.xlu1 %4490, %v5597_v9   ;;  %vm1295_vm7 = vcmp.lt.s32.totalorder %v5643_v14, %v5549_v41  ;;  %vm1343_vm1 = vcmp.ne.s32.totalorder %v5643_v14, %v5549_v41 }
 0x533   :  { %4587 = vtanh.f32 %v1142_v27  ;;  %vm1296_vm3 = vcmp.lt.s32.totalorder %v5643_v14, %v1162_v7  ;;  %vm1344_vm12 = vcmp.ne.s32.totalorder %v5643_v14, %v1162_v7  ;;  %v1165_v7 = vadd.s32 32, %v5549_v41 }
 0x534   :  { %4589 = vtanh.f32 %v1137_v20 }
 0x535   :  { %v5604_v49 = vpop.eup %4579  ;;  %4591 = vtanh.f32 %v1139_v26 }
 0x536   :  { %1220 = vperm.xlu1 %4490, %v5602_v60   ;;  %1235 = vperm.xlu0 %4489, %v5604_v49   ;;  %v5609_v6 = vpop.eup %4581  ;;  %4593 = vtanh.f32 %v1141_v50  ;;  %v1164_v50 = vadd.s32 24, %v5549_v41 }
 0x537   :  { %4595 = vtanh.f32 %v1143_v3 }
 0x538   :  { %4597 = vtanh.f32 %v1122_v0  ;;  %vm1298_vm11 = vcmp.lt.s32.totalorder %v5643_v14, %v1164_v50  ;;  %v6469_v0 = vmov 1.0  }
 0x539   :  { %v5611_v57 = vpop.eup %4583 }
 0x53a   :  { %1215 = vperm.xlu1 %4490, %v5609_v6   ;;  %1245 = vperm.xlu0 %4489, %v5611_v57   ;;  %v5616_v11 = vpop.eup %4585 }
 0x53d   :  { %v5618_v21 = vpop.eup %4587 }
 0x53e   :  { %1225 = vperm.xlu1 %4490, %v5616_v11   ;;  %1255 = vperm.xlu0 %4489, %v5618_v21   ;;  %v5623_v45 = vpop.eup %4589 }
 0x53f   :  { %v5626_v43 = vpop.eup %4591 }
 0x540   :  { %v5629_v4 = vpop.eup %4593 }
 0x541   :  { %v5632_v5 = vpop.eup %4595 }
 0x542   :  { %1230 = vperm.xlu1 %4490, %v5623_v45   ;;  %v4598_v27 = vpop.eup %4597 }
 0x543   :  { %v5648_v20 = vrot.slane %v4598_v27, %v1126_v16 }
 0x546   :  { %1240 = vperm.xlu1 %4490, %v5626_v43  }
 0x54a   :  { %1250 = vperm.xlu1 %4490, %v5629_v4  }
 0x54e   :  { %1260 = vperm.xlu1 %4490, %v5632_v5  }
 0x55d   :  { %1617 = vadd.xlane.f32.xlu0 %v69_v1  ;;  %v5699_v1 = vadd.s32 80, %v5549_v41 }
 0x5a0   :  { %v1191_v26 = vpop.permute.xlu0 %1190 }
 0x5a1   :  { %vm1264_vm4 = vcmp.gt.f32.partialorder %v5648_v20, %v1191_v26  ;;  %vm1280_vm5 = vcmp.eq.f32.partialorder %v5648_v20, %v1191_v26  ;;  %v1186_v23 = vpop.permute.xlu1 %1185 }
 0x5a2   :  { %vm1312_vm6 = vmand %vm1280_vm5, %vm1296_vm3  ;;  %vm1279_vm8 = vcmp.eq.f32.partialorder %v5648_v20, %v1186_v23  ;;  %vm1263_vm9 = vcmp.gt.f32.partialorder %v5648_v20, %v1186_v23  ;;  %v1168_v23 = vadd.s32 56, %v5549_v41 }
 0x5a3   :  { %vm1328_vm10 = vmor %vm1264_vm4, %vm1312_vm6  ;;  %vm1297_vm4 = vcmp.lt.s32.totalorder %v5643_v14, %v1163_v33 }
 0x5a4   :  { %vm1311_vm13 = vmand %vm1279_vm8, %vm1295_vm7 }
 0x5a5   :  { %v1201_v16 = vpop.permute.xlu1 %1200  ;;  %vm1327_vm14 = vmor %vm1263_vm9, %vm1311_vm13  ;;  %vm1345_vm9 = vcmp.ne.s32.totalorder %v5643_v14, %v1163_v33  ;;  %vm1300_vm13 = vcmp.lt.s32.totalorder %v5643_v14, %v1166_v52  ;;  %v1167_v33 = vadd.s32 48, %v5549_v41 }
 0x5a6   :  { %vm1282_vm15 = vcmp.eq.f32.partialorder %v5648_v20, %v1201_v16  ;;  %vm1266_vm3 = vcmp.gt.f32.partialorder %v5648_v20, %v1201_v16  ;;  %vm1360_vm0 = vmand %vm1328_vm10, %vm1344_vm12 }
 0x5a7   :  { %vm1314_vm5 = vmand %vm1282_vm15, %vm1298_vm11  ;;  %vm1346_vm11 = vcmp.ne.s32.totalorder %v5643_v14, %v1164_v50  ;;  %v5717_v50 = vadd.s32 112, %v5549_v41 }
 0x5a8   :  { %vm1359_vm6 = vmand %vm1327_vm14, %vm1343_vm1 }
 0x5a9   :  { %v1196_v3 = vpop.permute.xlu1 %1195  ;;  %vm5667_vm2 = vmor %vm1266_vm3, %vm1314_vm5  ;;  %3829 = vmatprep.mubr.msk.f32.mxu0 %vm1359_vm6, %v6469_v0  ;;  %vm1299_vm5 = vcmp.lt.s32.totalorder %v5643_v14, %v1165_v7 }
 0x5aa   :  { %vm1265_vm7 = vcmp.gt.f32.partialorder %v5648_v20, %v1196_v3  ;;  %vm1281_vm8 = vcmp.eq.f32.partialorder %v5648_v20, %v1196_v3  ;;  %3830 = vmatmul.mubr.msk.f32.vlgmr.msra.gmra.mrb[64].mxu0 %vm1360_vm0, %v6469_v0  ;;  %vm1362_vm1 = vmand %vm5667_vm2, %vm1346_vm11  ;;  %vm1347_vm2 = vcmp.ne.s32.totalorder %v5643_v14, %v1165_v7 }
 0x5ab   :  { %vm1313_vm10 = vmand %vm1281_vm8, %vm1297_vm4 }
 0x5ac   :  { %vm1329_vm12 = vmor %vm1265_vm7, %vm1313_vm10 }
 0x5ad   :  { %v1211_v27 = vpop.permute.xlu1 %1210  ;;  %vm1361_vm14 = vmand %vm1329_vm12, %vm1345_vm9  ;;  %vm1348_vm9 = vcmp.ne.s32.totalorder %v5643_v14, %v1166_v52  ;;  %vm1302_vm12 = vcmp.lt.s32.totalorder %v5643_v14, %v1168_v23  ;;  %v1169_v52 = vadd.s32 64, %v5549_v41 }
 0x5ae   :  { %vm1284_vm15 = vcmp.eq.f32.partialorder %v5648_v20, %v1211_v27  ;;  %3832 = vmatprep.mubr.msk.f32.mxu0 %vm1361_vm14, %v6469_v0  ;;  %vm1268_vm3 = vcmp.gt.f32.partialorder %v5648_v20, %v1211_v27  ;;  %v5709_v27 = vadd.s32 96, %v5549_v41 }
 0x5af   :  { %vm1316_vm0 = vmand %vm1284_vm15, %vm1300_vm13  ;;  %3833 = vmatmul.mubr.msk.f32.gmra.mrb[66].mxu0 %vm1362_vm1, %v6469_v0  ;;  %vm1301_vm15 = vcmp.lt.s32.totalorder %v5643_v14, %v1167_v33 }
 0x5b0   :  { %vm5686_vm4 = vmor %vm1268_vm3, %vm1316_vm0  ;;  %vm1305_vm0 = vcmp.lt.s32.totalorder %v5643_v14, %v5699_v1 }
 0x5b1   :  { %v1206_v26 = vpop.permute.xlu1 %1205  ;;  %vm1364_vm14 = vmand %vm5686_vm4, %vm1348_vm9 }
 0x5b2   :  { %vm1267_vm6 = vcmp.gt.f32.partialorder %v5648_v20, %v1206_v26  ;;  %vm1283_vm7 = vcmp.eq.f32.partialorder %v5648_v20, %v1206_v26 }
 0x5b3   :  { %vm1315_vm8 = vmand %vm1283_vm7, %vm1299_vm5 }
 0x5b4   :  { %vm1331_vm10 = vmor %vm1267_vm6, %vm1315_vm8  ;;  %vm1303_vm8 = vcmp.lt.s32.totalorder %v5643_v14, %v1169_v52 }
 0x5b5   :  { %v1221_v16 = vpop.permute.xlu1 %1220  ;;  %v1236_v3 = vpop.permute.xlu0 %1235  ;;  %vm1363_vm11 = vmand %vm1331_vm10, %vm1347_vm2 }
 0x5b6   :  { %vm1286_vm13 = vcmp.eq.f32.partialorder %v5648_v20, %v1221_v16  ;;  %3835 = vmatprep.mubr.msk.f32.mxu0 %vm1363_vm11, %v6469_v0  ;;  %vm1270_vm1 = vcmp.gt.f32.partialorder %v5648_v20, %v1221_v16  ;;  %vm1289_vm5 = vcmp.eq.f32.partialorder %v5648_v20, %v1236_v3  ;;  %v6492_v16 = vmov 0 }
 0x5b7   :  { %3836 = vmatmul.mubr.msk.f32.gmra.mrb[68].mxu0 %vm1364_vm14, %v6469_v0  ;;  %vm1318_vm3 = vmand %vm1286_vm13, %vm1302_vm12  ;;  %vm1273_vm9 = vcmp.gt.f32.partialorder %v5648_v20, %v1236_v3  ;;  %vm1307_vm11 = vcmp.lt.s32.totalorder %v5643_v14, %v5709_v27  ;;  %v1170_v0 = vadd.s32 72, %v5549_v41  ;;  %v6496_v3 = vmov 0 }
 0x5b8   :  { %vm5719_vm2 = vmor %vm1270_vm1, %vm1318_vm3  ;;  %vm1309_vm3 = vcmp.lt.s32.totalorder %v5643_v14, %v5717_v50 }
 0x5b9   :  { %v1216_v7 = vpop.permute.xlu1 %1215  ;;  %v1246_v26 = vpop.permute.xlu0 %1245  ;;  %v6493_v16 = vsel %vm5719_vm2, 4294967295, %v6492_v16  ;;  %vm1321_vm10 = vmand %vm1289_vm5, %vm1305_vm0 }
 0x5ba   :  { %vm1285_vm4 = vcmp.eq.f32.partialorder %v5648_v20, %v1216_v7  ;;  %vm1269_vm6 = vcmp.gt.f32.partialorder %v5648_v20, %v1216_v7  ;;  %vm1291_vm12 = vcmp.eq.f32.partialorder %v5648_v20, %v1246_v26  ;;  %vm5738_vm5 = vmor %vm1273_vm9, %vm1321_vm10  ;;  %vm1304_vm9 = vcmp.lt.s32.totalorder %v5643_v14, %v1170_v0 }
 0x5bb   :  { %vm1317_vm7 = vmand %vm1285_vm4, %vm1301_vm15  ;;  %v6497_v3 = vsel %vm5738_vm5, 4294967295, %v6496_v3 }
 0x5bc   :  { %vm5728_vm13 = vmor %vm1269_vm6, %vm1317_vm7  ;;  %vm1349_vm6 = vcmp.ne.s32.totalorder %v5643_v14, %v1167_v33  ;;  %vm1275_vm7 = vcmp.gt.f32.partialorder %v5648_v20, %v1246_v26  ;;  %v6502_v33 = vmov 0  ;;  %v1174_v26 = vadd.s32 104, %v5549_v41 }
 0x5bd   :  { %v1226_v39 = vpop.permute.xlu1 %1225  ;;  %v1256_v7 = vpop.permute.xlu0 %1255  ;;  %vm1323_vm4 = vmand %vm1291_vm12, %vm1307_vm11 }
 0x5be   :  { %vm1271_vm14 = vcmp.gt.f32.partialorder %v5648_v20, %v1226_v39  ;;  %vm1287_vm15 = vcmp.eq.f32.partialorder %v5648_v20, %v1226_v39  ;;  %vm1293_vm0 = vcmp.eq.f32.partialorder %v5648_v20, %v1256_v7  ;;  %vm1365_vm11 = vmand %vm5728_vm13, %vm1349_vm6  ;;  %vm1277_vm5 = vcmp.gt.f32.partialorder %v5648_v20, %v1256_v7 }
 0x5bf   :  { %vm1319_vm1 = vmand %vm1287_vm15, %vm1303_vm8  ;;  %vm1350_vm8 = vcmp.ne.s32.totalorder %v5643_v14, %v1168_v23  ;;  %v6504_v23 = vmov 1.0   ;;  %vm1306_vm13 = vcmp.lt.s32.totalorder %v5643_v14, %v1172_v25 }
 0x5c0   :  { %vm5744_vm2 = vmor %vm1271_vm14, %vm1319_vm1  ;;  %3838 = vmatprep.mubr.msk.f32.mxu0 %vm1365_vm11, %v6504_v23  ;;  %vm6505_vm1 = vnez %v6493_v16  ;;  %vm1352_vm11 = vcmp.ne.s32.totalorder %v5643_v14, %v1170_v0  ;;  %v1176_v0 = vadd.s32 120, %v5549_v41 }
 0x5c1   :  { %v1231_v39 = vpop.permute.xlu1 %1230  ;;  %vm5750_vm15 = vmand %vm1293_vm0, %vm1309_vm3  ;;  %vm1351_vm0 = vcmp.ne.s32.totalorder %v5643_v14, %v1169_v52 }
 0x5c2   :  { %v6501_v37 = vsel %vm5750_vm15, 4294967295, %v6500_v37  ;;  %vm1288_vm10 = vcmp.eq.f32.partialorder %v5648_v20, %v1231_v39  ;;  %vm1272_vm12 = vcmp.gt.f32.partialorder %v5648_v20, %v1231_v39  ;;  %vm5759_vm14 = vmor %vm1275_vm7, %vm1323_vm4 }
 0x5c3   :  { %v6503_v33 = vsel %vm5759_vm14, 4294967295, %v6502_v33  ;;  %vm1366_vm3 = vmand %vm6505_vm1, %vm1350_vm8  ;;  %vm6506_vm1 = vnez %v6501_v37 }
 0x5c4   :  { %3839 = vmatmul.mubr.msk.f32.gmra.mrb[70].mxu0 %vm1366_vm3, %v6504_v23  ;;  %vm1320_vm15 = vmand %vm1288_vm10, %vm1304_vm9 }
 0x5c5   :  { %v1241_v8 = vpop.permute.xlu1 %1240  ;;  %vm1336_vm4 = vmor %vm1272_vm12, %vm1320_vm15  ;;  %vm1353_vm15 = vcmp.ne.s32.totalorder %v5643_v14, %v5699_v1 }
 0x5c6   :  { %vm1274_vm6 = vcmp.gt.f32.partialorder %v5648_v20, %v1241_v8  ;;  %vm1290_vm7 = vcmp.eq.f32.partialorder %v5648_v20, %v1241_v8  ;;  %vm1367_vm8 = vmand %vm5744_vm2, %vm1351_vm0  ;;  %vm1308_vm2 = vcmp.lt.s32.totalorder %v5643_v14, %v1174_v26  ;;  %vm6511_vm0 = vnez %v6497_v3 }
 0x5c7   :  { %vm5778_vm14 = vmor %vm1277_vm5, %vm6506_vm1  ;;  %3841 = vmatprep.mubr.msk.f32.mxu0 %vm1367_vm8, %v6504_v23  ;;  %vm1355_vm8 = vcmp.ne.s32.totalorder %v5643_v14, %v5709_v27 }
 0x5c8   :  { %vm1322_vm9 = vmand %vm1290_vm7, %vm1306_vm13 }
 0x5c9   :  { %vm5785_vm10 = vmor %vm1274_vm6, %vm1322_vm9  ;;  %v1251_v32 = vpop.permute.xlu1 %1250  ;;  %vm1354_vm6 = vcmp.ne.s32.totalorder %v5643_v14, %v1172_v25  ;;  %v4637_v25 = vld [vmem:[#allocation2] sm:$0xff] }
 0x5ca   :  { %vm1368_vm12 = vmand %vm1336_vm4, %vm1352_vm11  ;;  %vm1276_vm5 = vcmp.gt.f32.partialorder %v5648_v20, %v1251_v32  ;;  %vm1292_vm3 = vcmp.eq.f32.partialorder %v5648_v20, %v1251_v32  ;;  %vm1310_vm4 = vcmp.lt.s32.totalorder %v5643_v14, %v1176_v0 }
 0x5cb   :  { %3842 = vmatmul.mubr.msk.f32.gmra.mrb[72].mxu0 %vm1368_vm12, %v6504_v23  ;;  %vm1369_vm13 = vmand %vm6511_vm0, %vm1353_vm15  ;;  %vm6512_vm15 = vnez %v6503_v33 }
 0x5cc   :  { %3844 = vmatprep.mubr.msk.f32.mxu0 %vm1369_vm13, %v6504_v23  ;;  %vm1324_vm7 = vmand %vm1292_vm3, %vm1308_vm2  ;;  %vm1356_vm2 = vcmp.ne.s32.totalorder %v5643_v14, %v1174_v26  ;;  %vm1357_vm3 = vcmp.ne.s32.totalorder %v5643_v14, %v5717_v50 }
 0x5cd   :  { %vm1340_vm1 = vmor %vm1276_vm5, %vm1324_vm7  ;;  %v1261_v37 = vpop.permute.xlu1 %1260 }
 0x5ce   :  { %vm1370_vm11 = vmand %vm5785_vm10, %vm1354_vm6  ;;  %vm1278_vm9 = vcmp.gt.f32.partialorder %v5648_v20, %v1261_v37  ;;  %vm1294_vm12 = vcmp.eq.f32.partialorder %v5648_v20, %v1261_v37  ;;  %vm1358_vm10 = vcmp.ne.s32.totalorder %v5643_v14, %v1176_v0 }
 0x5cf   :  { %3845 = vmatmul.mubr.msk.f32.gmra.mrb[74].mxu0 %vm1370_vm11, %v6504_v23  ;;  %vm1371_vm0 = vmand %vm6512_vm15, %vm1355_vm8 }
 0x5d0   :  { %3847 = vmatprep.mubr.msk.f32.mxu0 %vm1371_vm0, %v6504_v23  ;;  %vm1326_vm5 = vmand %vm1294_vm12, %vm1310_vm4 }
 0x5d1   :  { %vm1342_vm13 = vmor %vm1278_vm9, %vm1326_vm5 }
 0x5d2   :  { %vm1372_vm6 = vmand %vm1340_vm1, %vm1356_vm2  ;;  %vm6513_vm1 = vcmask 64512  }
 0x5d3   :  { %3848 = vmatmul.mubr.msk.f32.gmra.mrb[76].mxu0 %vm1372_vm6, %v6504_v23  ;;  %vm1373_vm7 = vmand %vm5778_vm14, %vm1357_vm3 }
 0x5d4   :  { %3850 = vmatprep.mubr.msk.f32.mxu0 %vm1373_vm7, %v6504_v23  ;;  %vm1374_vm8 = vmand %vm1342_vm13, %vm1358_vm10 }
 0x5d5   :  { %vm6514_vm14 = vmmov %vm6513_vm1 }
 0x5d6   :  { %vm6515_vm4 = vmmov %vm6513_vm1 }
 0x5d7   :  { %3851 = vmatmul.mubr.msk.f32.gmra.mrb[78].mxu0 %vm1374_vm8, %v6504_v23  ;;  %vm6516_vm11 = vmmov %vm6513_vm1 }
 0x5d8   :  { %3911 = vmatprep.mubr.f32.mxu0 %v4637_v25  ;;  %vm6517_vm9 = vmmov %vm6513_vm1 }
 0x5d9   :  { %vm6518_vm12 = vmmov %vm6513_vm1 }
 0x5da   :  { %vm6519_vm15 = vmmov %vm6513_vm1 }
 0x5db   :  { %vm6520_vm0 = vmmov %vm6513_vm1 }
 0x5dc   :  { %vm6521_vm2 = vmmov %vm6520_vm0 }
 0x5dd   :  { %vm6522_vm5 = vmmov %vm6520_vm0 }
 0x5de   :  { %vm6523_vm3 = vmmov %vm6520_vm0 }
 0x5df   :  { %vm6524_vm13 = vmmov %vm6520_vm0 }
 0x5e0   :  { %vm6525_vm10 = vmmov %vm6520_vm0 }
 0x5e1   :  { %vm6526_vm6 = vmmov %vm6520_vm0 }
 0x5e2   :  { %vm6527_vm7 = vmmov %vm6520_vm0 }
 0x5e3   :  { %vm6528_vm8 = vmmov %vm6520_vm0 }
 0x5ea   :  { %v1618_v41 = vpop.xlane.xlu0 %1617 }
 0x5eb   :  { %v1619_v20 = vmul.f32 0.8, %v1618_v41 }
 0x5ed   :  { %v5818_v1 = vceil.f32 %v1619_v20 }
 0x5ef   :  { %3853 = vmatprep.subr.mxu1 %v5818_v1 }
 0x5f0   :  { %3854 = vmatpush3.msra.mxu1 %v5818_v1 }
 0x5f1   :  { %3856 = vmatmul.mubr.msk.f32.vlgmr.msra.gmra.mrb[50].mxu1 %vm6513_vm1, %v5470_v42  ;;  %vm6529_vm1 = vmmov %vm6520_vm0 }
 0x5f2   :  { %3858 = vmatprep.mubr.msk.f32.mxu1 %vm6514_vm14, %v5475_v44  ;;  %vm6530_vm14 = vmmov %vm6520_vm0 }
 0x5f5   :  { %3859 = vmatmul.mubr.msk.f32.gmra.mrb[52].mxu1 %vm6515_vm4, %v5482_v40  ;;  %vm6531_vm4 = vmmov %vm6520_vm0 }
 0x5f6   :  { %3861 = vmatprep.mubr.msk.f32.mxu1 %vm6516_vm11, %v5489_v58  ;;  %vm6532_vm11 = vmmov %vm6520_vm0 }
 0x5f9   :  { %3862 = vmatmul.mubr.msk.f32.gmra.mrb[54].mxu1 %vm6517_vm9, %v5494_v22  ;;  %vm6533_vm9 = vmmov %vm6520_vm0 }
 0x5fa   :  { %3864 = vmatprep.mubr.msk.f32.mxu1 %vm6518_vm12, %v5501_v30  ;;  %vm6534_vm12 = vmmov %vm6520_vm0 }
 0x5fd   :  { %3865 = vmatmul.mubr.msk.f32.gmra.mrb[56].mxu1 %vm6519_vm15, %v5506_v46  ;;  %vm6535_vm15 = vmmov %vm6520_vm0 }
 0x5fe   :  { %3867 = vmatprep.mubr.msk.f32.mxu1 %vm6520_vm0, %v5513_v36 }
 0x601   :  { %3868 = vmatmul.mubr.msk.f32.gmra.mrb[58].mxu1 %vm6521_vm2, %v5518_v17  ;;  %vm6536_vm2 = vmmov %vm6520_vm0 }
 0x602   :  { %3870 = vmatprep.mubr.msk.f32.mxu1 %vm6522_vm5, %v5523_v54  ;;  %vm6537_vm5 = vmmov %vm6520_vm0 }
 0x605   :  { %3871 = vmatmul.mubr.msk.f32.gmra.mrb[60].mxu1 %vm6523_vm3, %v5530_v53  ;;  %vm6538_vm3 = vmmov %vm6520_vm0 }
 0x606   :  { %3873 = vmatprep.mubr.msk.f32.mxu1 %vm6524_vm13, %v5537_v61  ;;  %vm6539_vm13 = vmmov %vm6520_vm0 }
 0x609   :  { %3874 = vmatmul.mubr.msk.f32.gmra.mrb[62].mxu1 %vm6525_vm10, %v5542_v63  ;;  %vm6540_vm10 = vmmov %vm6520_vm0 }
 0x60a   :  { %3876 = vmatprep.mubr.msk.f32.mxu1 %vm6526_vm6, %v5573_v24  ;;  %vm6541_vm6 = vmmov %vm6520_vm0 }
 0x60d   :  { %3877 = vmatmul.mubr.msk.f32.gmra.mrb[64].mxu1 %vm6527_vm7, %v5578_v47  ;;  %vm6542_vm7 = vmmov %vm6520_vm0 }
 0x60e   :  { %3967 = vmatprep.mubr.f32.mxu1 %v4637_v25 }
 0x67d   :  { %v3831_v14 = vpop.f32.mrb[64].mxu0 }
 0x67e   :  { %v1553_v27 = vmul.f32 %v3831_v14, %v5470_v42  ;;  %v1473_v50 = vpop.f32.mrb[65].mxu0 }
 0x67f   :  { %v1552_v7 = vmul.f32 %v1473_v50, %v5465_v56 }
 0x680   :  { %v1572_v3 = vsel %vm6528_vm8, %v1553_v27, 0.0 }
 0x681   :  { %1573 = vadd.xlane.f32.xlu0 %v1572_v3  ;;  %v1569_v39 = vsel %vm6529_vm1, %v1552_v7, 0.0 }
 0x682   :  { %v3834_v33 = vpop.f32.mrb[66].mxu0  ;;  %1570 = vadd.xlane.f32.xlu1 %v1569_v39 }
 0x683   :  { %v1555_v23 = vmul.f32 %v3834_v33, %v5482_v40  ;;  %v1483_v8 = vpop.f32.mrb[67].mxu0 }
 0x684   :  { %v1554_v26 = vmul.f32 %v1483_v8, %v5475_v44 }
 0x685   :  { %v1578_v52 = vsel %vm6530_vm14, %v1555_v23, 0.0 }
 0x686   :  { %v1575_v16 = vsel %vm6531_vm4, %v1554_v26, 0.0  ;;  %1579 = vadd.xlane.f32.xlu1 %v1578_v52 }
 0x687   :  { %1576 = vadd.xlane.f32.xlu0 %v1575_v16 }
 0x68a   :  { %v3837_v42 = vpop.f32.mrb[68].mxu0 }
 0x68b   :  { %v1557_v56 = vmul.f32 %v3837_v42, %v5494_v22  ;;  %v1493_v32 = vpop.f32.mrb[69].mxu0 }
 0x68c   :  { %v1556_v0 = vmul.f32 %v1493_v32, %v5489_v58 }
 0x68d   :  { %v1584_v37 = vsel %vm6532_vm11, %v1557_v56, 0.0 }
 0x68e   :  { %1585 = vadd.xlane.f32.xlu1 %v1584_v37  ;;  %v1581_v40 = vsel %vm6533_vm9, %v1556_v0, 0.0 }
 0x68f   :  { %1582 = vadd.xlane.f32.xlu0 %v1581_v40 }
 0x697   :  { %v3840_v25 = vpop.f32.mrb[70].mxu0 }
 0x698   :  { %v1559_v44 = vmul.f32 %v3840_v25, %v5506_v46  ;;  %v1503_v41 = vpop.f32.mrb[71].mxu0 }
 0x699   :  { %v1558_v20 = vmul.f32 %v1503_v41, %v5501_v30 }
 0x69a   :  { %v1590_v14 = vsel %vm6534_vm12, %v1559_v44, 0.0 }
 0x69b   :  { %1591 = vadd.xlane.f32.xlu1 %v1590_v14  ;;  %v1587_v22 = vsel %vm6535_vm15, %v1558_v20, 0.0 }
 0x69c   :  { %1588 = vadd.xlane.f32.xlu0 %v1587_v22 }
 0x69e   :  { %v3843_v27 = vpop.f32.mrb[72].mxu0 }
 0x69f   :  { %v1561_v58 = vmul.f32 %v3843_v27, %v5518_v17  ;;  %v1513_v50 = vpop.f32.mrb[73].mxu0 }
 0x6a0   :  { %v1560_v7 = vmul.f32 %v1513_v50, %v5513_v36 }
 0x6a1   :  { %v1596_v3 = vsel %vm6520_vm0, %v1561_v58, 0.0 }
 0x6a2   :  { %v3846_v39 = vpop.f32.mrb[74].mxu0  ;;  %1597 = vadd.xlane.f32.xlu1 %v1596_v3  ;;  %v1593_v46 = vsel %vm6536_vm2, %v1560_v7, 0.0 }
 0x6a3   :  { %v1563_v30 = vmul.f32 %v3846_v39, %v5530_v53  ;;  %v1523_v33 = vpop.f32.mrb[75].mxu0  ;;  %1594 = vadd.xlane.f32.xlu0 %v1593_v46 }
 0x6a4   :  { %v1562_v23 = vmul.f32 %v1523_v33, %v5523_v54  ;;  %v6543_v33 = vmov 0.0  }
 0x6a5   :  { %v1602_v8 = vsel %vm6537_vm5, %v1563_v30, 0.0 }
 0x6a6   :  { %v3849_v26 = vpop.f32.mrb[76].mxu0  ;;  %1603 = vadd.xlane.f32.xlu1 %v1602_v8  ;;  %v1599_v17 = vsel %vm6538_vm3, %v1562_v23, 0.0 }
 0x6a7   :  { %v1565_v36 = vmul.f32 %v3849_v26, %v5542_v63  ;;  %v1533_v52 = vpop.f32.mrb[77].mxu0  ;;  %1600 = vadd.xlane.f32.xlu0 %v1599_v17  ;;  %v4686_v17 = vmov 1.0|1.0  }
 0x6a8   :  { %v1564_v16 = vmul.f32 %v1533_v52, %v5537_v61 }
 0x6a9   :  { %v1608_v42 = vsel %vm6539_vm13, %v1565_v36, 0.0 }
 0x6aa   :  { %1609 = vadd.xlane.f32.xlu1 %v1608_v42  ;;  %v3852_v53 = vpop.f32.mrb[78].mxu0  ;;  %v1605_v56 = vsel %vm6540_vm10, %v1564_v16, 0.0 }
 0x6ab   :  { %v1567_v54 = vmul.f32 %v3852_v53, %v5578_v47  ;;  %1606 = vadd.xlane.f32.xlu0 %v1605_v56  ;;  %v1543_v32 = vpop.f32.mrb[79].mxu0 }
 0x6ac   :  { %v1566_v0 = vmul.f32 %v1543_v32, %v5573_v24 }
 0x6ad   :  { %v1614_v37 = vsel %vm6541_vm6, %v1567_v54, 0.0 }
 0x6ae   :  { %1615 = vadd.xlane.f32.xlu1 %v1614_v37  ;;  %v1611_v63 = vsel %vm6542_vm7, %v1566_v0, 0.0 }
 0x6af   :  { %1612 = vadd.xlane.f32.xlu0 %v1611_v63 }
 0x6c4   :  { %v3857_v40 = vpop.f32.mrb[50].mxu1 }
 0x6c5   :  { %v1735_v61 = vpop.f32.mrb[51].mxu1 }
 0x6c8   :  { %v3860_v25 = vpop.f32.mrb[52].mxu1 }
 0x6c9   :  { %v1745_v44 = vpop.f32.mrb[53].mxu1 }
 0x6cc   :  { %v3863_v41 = vpop.f32.mrb[54].mxu1 }
 0x6cd   :  { %v1755_v20 = vpop.f32.mrb[55].mxu1 }
 0x6d0   :  { %v3866_v14 = vpop.f32.mrb[56].mxu1 }
 0x6d1   :  { %v1765_v22 = vpop.f32.mrb[57].mxu1 }
 0x6d4   :  { %v5884_v27 = vpop.f32.mrb[58].mxu1 }
 0x6d5   :  { %v5886_v47 = vpop.f32.mrb[59].mxu1 }
 0x6d8   :  { %v5888_v58 = vpop.f32.mrb[60].mxu1 }
 0x6d9   :  { %v5890_v24 = vpop.f32.mrb[61].mxu1 }
 0x6dc   :  { %v5892_v50 = vpop.f32.mrb[62].mxu1 }
 0x6dd   :  { %v5894_v7 = vpop.f32.mrb[63].mxu1 }
 0x6e0   :  { %v5896_v3 = vpop.f32.mrb[64].mxu1 }
 0x6e1   :  { %v5898_v39 = vpop.f32.mrb[65].mxu1 }
 0x70e   :  { %v1574_v46 = vpop.xlane.xlu0 %1573 }
 0x70f   :  { %vm1815_vm8 = vcmp.lt.f32.partialorder %v1574_v46, %v3857_v40  ;;  %v1571_v30 = vpop.xlane.xlu1 %1570 }
 0x710   :  { %v5901_v23 = vsel %vm1815_vm8, 1.0, %v6543_v33  ;;  %vm1814_vm1 = vcmp.lt.f32.partialorder %v1571_v30, %v1735_v61 }
 0x711   :  { %v5904_v8 = vsel %vm1814_vm1, 1.0, %v6543_v33  ;;  %vm4312_vm14 = vmpackc.low %vm1815_vm8, %vm1814_vm1  ;;  %v1863_v26 = vmul.f32 %v5564_v38, %v5901_v23 }
 0x712   :  { %4313 = vmatprep.subr.msk.bf16.mxu0 %vm4312_vm14, %v4686_v17  ;;  %v1862_v36 = vmul.f32 %v5566_v2, %v5904_v8 }
 0x713   :  { %4315 = vmatpush3.bf16.msk.msra.mxu0 %vm4312_vm14, %v4686_v17  ;;  %1885 = vperm.xlu1 %4490, %v1863_v26   ;;  %v1580_v52 = vpop.xlane.xlu1 %1579 }
 0x714   :  { %v1577_v16 = vpop.xlane.xlu0 %1576  ;;  %1880 = vperm.xlu0 %4489, %v1862_v36   ;;  %vm1817_vm4 = vcmp.lt.f32.partialorder %v1580_v52, %v3860_v25  ;;  %v6010_v52 = vld [vmem:[#allocation2 + $0x18] sm:$0xff] }
 0x715   :  { %vm1816_vm11 = vcmp.lt.f32.partialorder %v1577_v16, %v1745_v44  ;;  %v5913_v42 = vsel %vm1817_vm4, 1.0, %v6543_v33  ;;  %v6022_v16 = vld [vmem:[#allocation2 + $0x38] sm:$0xff] }
 0x716   :  { %v5916_v53 = vsel %vm1816_vm11, 1.0, %v6543_v33  ;;  %vm4316_vm9 = vmpackc.low %vm1817_vm4, %vm1816_vm11  ;;  %v1865_v38 = vmul.f32 %v5583_v62, %v5913_v42 }
 0x717   :  { %4317 = vmatprep.subr.msk.bf16.mxu0 %vm4316_vm9, %v4686_v17  ;;  %v1864_v2 = vmul.f32 %v5587_v31, %v5916_v53 }
 0x718   :  { %4319 = vmatpush3.bf16.msk.msra.mxu0 %vm4316_vm9, %v4686_v17  ;;  %1895 = vperm.xlu0 %4489, %v1865_v38   ;;  %v6025_v38 = vld [vmem:[#allocation2 + $0x40] sm:$0xff] }
 0x719   :  { %1890 = vperm.xlu1 %4490, %v1864_v2   ;;  %v6028_v2 = vld [vmem:[#allocation2 + $0x48] sm:$0xff] }
 0x71b   :  { %v1586_v56 = vpop.xlane.xlu1 %1585 }
 0x71c   :  { %vm1819_vm12 = vcmp.lt.f32.partialorder %v1586_v56, %v3863_v41  ;;  %v1583_v54 = vpop.xlane.xlu0 %1582  ;;  %v6031_v56 = vld [vmem:[#allocation2 + $0x50] sm:$0xff] }
 0x71d   :  { %v5925_v32 = vsel %vm1819_vm12, 1.0, %v6543_v33  ;;  %vm1818_vm15 = vcmp.lt.f32.partialorder %v1583_v54, %v1755_v20  ;;  %v6034_v54 = vld [vmem:[#allocation2 + $0x58] sm:$0xff] }
 0x71e   :  { %v5928_v0 = vsel %vm1818_vm15, 1.0, %v6543_v33  ;;  %vm4320_vm0 = vmpackc.low %vm1819_vm12, %vm1818_vm15  ;;  %v1867_v62 = vmul.f32 %v5592_v34, %v5925_v32 }
 0x71f   :  { %4321 = vmatprep.subr.msk.bf16.mxu0 %vm4320_vm0, %v4686_v17  ;;  %v1866_v31 = vmul.f32 %v5597_v9, %v5928_v0 }
 0x720   :  { %1905 = vperm.xlu0 %4489, %v1867_v62   ;;  %4323 = vmatpush3.bf16.msk.msra.mxu0 %vm4320_vm0, %v4686_v17  ;;  %v6037_v62 = vld [vmem:[#allocation2 + $0x60] sm:$0xff]  ;;  %vm6548_vm0 = vmmov 0  }
 0x721   :  { %1900 = vperm.xlu1 %4490, %v1866_v31   ;;  %v6040_v31 = vld [vmem:[#allocation2 + $0x68] sm:$0xff] }
 0x728   :  { %v1592_v37 = vpop.xlane.xlu1 %1591 }
 0x729   :  { %vm1821_vm2 = vcmp.lt.f32.partialorder %v1592_v37, %v3866_v14  ;;  %v1589_v63 = vpop.xlane.xlu0 %1588  ;;  %v6043_v37 = vld [vmem:[#allocation2 + $0x70] sm:$0xff] }
 0x72a   :  { %v5937_v40 = vsel %vm1821_vm2, 1.0, %v6543_v33  ;;  %vm1820_vm5 = vcmp.lt.f32.partialorder %v1589_v63, %v1765_v22  ;;  %v6046_v63 = vld [vmem:[#allocation2 + $0x78] sm:$0xff] }
 0x72b   :  { %v5940_v61 = vsel %vm1820_vm5, 1.0, %v6543_v33  ;;  %vm4324_vm3 = vmpackc.low %vm1821_vm2, %vm1820_vm5  ;;  %v1869_v34 = vmul.f32 %v5602_v60, %v5937_v40 }
 0x72c   :  { %4325 = vmatprep.subr.msk.bf16.mxu0 %vm4324_vm3, %v4686_v17  ;;  %v1868_v9 = vmul.f32 %v5609_v6, %v5940_v61 }
 0x72d   :  { %1915 = vperm.xlu0 %4489, %v1869_v34   ;;  %4327 = vmatpush3.bf16.msk.msra.mxu0 %vm4324_vm3, %v4686_v17 }
 0x72e   :  { %1910 = vperm.xlu1 %4490, %v1868_v9  }
 0x72f   :  { %v1598_v25 = vpop.xlane.xlu1 %1597 }
 0x730   :  { %vm1823_vm13 = vcmp.lt.f32.partialorder %v1598_v25, %v5884_v27  ;;  %v1595_v44 = vpop.xlane.xlu0 %1594 }
 0x731   :  { %v5950_v41 = vsel %vm1823_vm13, 1.0, %v6543_v33  ;;  %vm1822_vm10 = vcmp.lt.f32.partialorder %v1595_v44, %v5886_v47 }
 0x732   :  { %v5954_v60 = vsel %vm1822_vm10, 1.0, %v6543_v33  ;;  %vm4328_vm6 = vmpackc.low %vm1823_vm13, %vm1822_vm10  ;;  %v1871_v6 = vmul.f32 %v5623_v45, %v5950_v41 }
 0x733   :  { %v1604_v20 = vpop.xlane.xlu1 %1603  ;;  %4329 = vmatprep.subr.msk.bf16.mxu0 %vm4328_vm6, %v4686_v17  ;;  %v1870_v14 = vmul.f32 %v5616_v11, %v5954_v60 }
 0x734   :  { %vm1825_vm7 = vcmp.lt.f32.partialorder %v1604_v20, %v5888_v58  ;;  %1925 = vperm.xlu0 %4489, %v1871_v6   ;;  %4331 = vmatpush3.bf16.msk.msra.mxu0 %vm4328_vm6, %v4686_v17  ;;  %v1601_v22 = vpop.xlane.xlu0 %1600 }
 0x735   :  { %v5964_v27 = vsel %vm1825_vm7, 1.0, %v6543_v33  ;;  %vm1824_vm8 = vcmp.lt.f32.partialorder %v1601_v22, %v5890_v24  ;;  %1920 = vperm.xlu1 %4490, %v1870_v14  }
 0x736   :  { %v5968_v45 = vsel %vm1824_vm8, 1.0, %v6543_v33  ;;  %vm4332_vm1 = vmpackc.low %vm1825_vm7, %vm1824_vm8  ;;  %v1873_v47 = vmul.f32 %v5626_v43, %v5964_v27 }
 0x737   :  { %v1610_v11 = vpop.xlane.xlu1 %1609  ;;  %4333 = vmatprep.subr.msk.bf16.mxu0 %vm4332_vm1, %v4686_v17  ;;  %v1872_v58 = vmul.f32 %v5604_v49, %v5968_v45 }
 0x738   :  { %vm1827_vm14 = vcmp.lt.f32.partialorder %v1610_v11, %v5892_v50  ;;  %1935 = vperm.xlu0 %4489, %v1873_v47   ;;  %4335 = vmatpush3.bf16.msk.msra.mxu0 %vm4332_vm1, %v4686_v17  ;;  %v1607_v24 = vpop.xlane.xlu0 %1606 }
 0x739   :  { %v5978_v46 = vsel %vm1827_vm14, 1.0, %v6543_v33  ;;  %vm1826_vm4 = vcmp.lt.f32.partialorder %v1607_v24, %v5894_v7  ;;  %1930 = vperm.xlu1 %4490, %v1872_v58  }
 0x73a   :  { %v5982_v43 = vsel %vm1826_vm4, 1.0, %v6543_v33  ;;  %vm4336_vm11 = vmpackc.low %vm1827_vm14, %vm1826_vm4  ;;  %v1875_v30 = vmul.f32 %v5629_v4, %v5978_v46 }
 0x73b   :  { %v1616_v49 = vpop.xlane.xlu1 %1615  ;;  %4337 = vmatprep.subr.msk.bf16.mxu0 %vm4336_vm11, %v4686_v17  ;;  %v1874_v50 = vmul.f32 %v5611_v57, %v5982_v43 }
 0x73c   :  { %vm1829_vm9 = vcmp.lt.f32.partialorder %v1616_v49, %v5896_v3  ;;  %1945 = vperm.xlu0 %4489, %v1875_v30   ;;  %4339 = vmatpush3.bf16.msk.msra.mxu0 %vm4336_vm11, %v4686_v17  ;;  %v1613_v7 = vpop.xlane.xlu0 %1612  ;;  %v6004_v3 = vld [vmem:[#allocation2 + $0x8] sm:$0xff] }
 0x73d   :  { %v5992_v26 = vsel %vm1829_vm9, 1.0, %v6543_v33  ;;  %vm1828_vm12 = vcmp.lt.f32.partialorder %v1613_v7, %v5898_v39  ;;  %1940 = vperm.xlu1 %4490, %v1874_v50   ;;  %v6007_v39 = vld [vmem:[#allocation2 + $0x10] sm:$0xff] }
 0x73e   :  { %v5996_v4 = vsel %vm1828_vm12, 1.0, %v6543_v33  ;;  %vm4340_vm15 = vmpackc.low %vm1829_vm9, %vm1828_vm12  ;;  %v1877_v36 = vmul.f32 %v5632_v5, %v5992_v26  ;;  %v6013_v5 = vld [vmem:[#allocation2 + $0x20] sm:$0xff] }
 0x73f   :  { %4341 = vmatprep.subr.msk.bf16.mxu0 %vm4340_vm15, %v4686_v17  ;;  %v1876_v57 = vmul.f32 %v5618_v21, %v5996_v4  ;;  %v6016_v21 = vld [vmem:[#allocation2 + $0x28] sm:$0xff] }
 0x740   :  { %1955 = vperm.xlu0 %4489, %v1877_v36   ;;  %4343 = vmatpush3.bf16.msk.msra.mxu0 %vm4340_vm15, %v4686_v17  ;;  %v6019_v17 = vld [vmem:[#allocation2 + $0x30] sm:$0xff] }
 0x741   :  { %1950 = vperm.xlu1 %4490, %v1876_v57  }
 0x743   :  { %3912 = vmatmul.mubr.f32.vlgmr.msra.gmra.mrb[80].mxu0 %v6004_v3 }
 0x744   :  { %3914 = vmatprep.mubr.f32.mxu0 %v6007_v39 }
 0x747   :  { %3915 = vmatmul.mubr.f32.gmra.mrb[82].mxu0 %v6010_v52 }
 0x748   :  { %3917 = vmatprep.mubr.f32.mxu0 %v6013_v5 }
 0x74b   :  { %3918 = vmatmul.mubr.f32.gmra.mrb[84].mxu0 %v6016_v21 }
 0x74c   :  { %3920 = vmatprep.mubr.f32.mxu0 %v6019_v17 }
 0x74f   :  { %3921 = vmatmul.mubr.f32.gmra.mrb[86].mxu0 %v6022_v16 }
 0x750   :  { %3923 = vmatprep.mubr.f32.mxu0 %v6025_v38 }
 0x753   :  { %3924 = vmatmul.mubr.f32.gmra.mrb[88].mxu0 %v6028_v2 }
 0x754   :  { %3926 = vmatprep.mubr.f32.mxu0 %v6031_v56 }
 0x757   :  { %3927 = vmatmul.mubr.f32.gmra.mrb[90].mxu0 %v6034_v54 }
 0x758   :  { %3929 = vmatprep.mubr.f32.mxu0 %v6037_v62 }
 0x75b   :  { %3930 = vmatmul.mubr.f32.gmra.mrb[92].mxu0 %v6040_v31 }
 0x75c   :  { %3932 = vmatprep.mubr.f32.mxu0 %v6043_v37 }
 0x75f   :  { %3933 = vmatmul.mubr.f32.gmra.mrb[94].mxu0 %v6046_v63 }
 0x792   :  { %v1886_v34 = vpop.permute.xlu1 %1885 }
 0x793   :  { %v6050_v9 = vmul.f32 %v1886_v34, %v5330_v18  ;;  %v1881_v25 = vpop.permute.xlu0 %1880 }
 0x794   :  { %v1958_v44 = vmul.f32 %v1881_v25, %v5328_v59 }
 0x796   :  { %v4344_v6 = vpack.c.bf16 %v6050_v9, %v1958_v44  ;;  %2525 = vmatprep.mubr.f32.mxu0 %v1958_v44 }
 0x797   :  { %v1896_v20 = vpop.permute.xlu0 %1895 }
 0x798   :  { %v1891_v14 = vpop.permute.xlu1 %1890  ;;  %4345 = vmatprep.subr.bf16.mxu1 %v4344_v6  ;;  %v6055_v22 = vmul.f32 %v1896_v20, %v5339_v55 }
 0x799   :  { %v6058_v47 = vmul.f32 %v1891_v14, %v5337_v19  ;;  %4347 = vmatpush3.bf16.msra.mxu1 %v4344_v6  ;;  %v6544_v14 = vld [vmem:[#allocation5_spill] sm:$0xff] }
 0x79b   :  { %v4348_v18 = vpack.c.bf16 %v6055_v22, %v6058_v47 }
 0x79d   :  { %4349 = vmatprep.subr.bf16.mxu1 %v4348_v18 }
 0x79e   :  { %4351 = vmatpush3.bf16.msra.mxu1 %v4348_v18 }
 0x79f   :  { %v1906_v11 = vpop.permute.xlu0 %1905 }
 0x7a0   :  { %v6063_v59 = vmul.f32 %v1906_v11, %v5348_v35  ;;  %v1901_v58 = vpop.permute.xlu1 %1900  ;;  %v6545_v11 = vld [vmem:[#allocation7_spill] sm:$0xff] }
 0x7a1   :  { %v6066_v24 = vmul.f32 %v1901_v58, %v5346_v13 }
 0x7a3   :  { %v4352_v55 = vpack.c.bf16 %v6063_v59, %v6066_v24 }
 0x7a5   :  { %4353 = vmatprep.subr.bf16.mxu1 %v4352_v55 }
 0x7a6   :  { %4355 = vmatpush3.bf16.msra.mxu1 %v4352_v55 }
 0x7ac   :  { %v1916_v19 = vpop.permute.xlu0 %1915 }
 0x7ad   :  { %v6071_v30 = vmul.f32 %v1916_v19, %v5357_v48  ;;  %v1911_v49 = vpop.permute.xlu1 %1910  ;;  %v6546_v19 = vld [vmem:[#allocation6_spill] sm:$0xff] }
 0x7ae   :  { %v6074_v50 = vmul.f32 %v1911_v49, %v5355_v51 }
 0x7b0   :  { %v4356_v35 = vpack.c.bf16 %v6071_v30, %v6074_v50 }
 0x7b2   :  { %4357 = vmatprep.subr.bf16.mxu1 %v4356_v35 }
 0x7b3   :  { %v1926_v7 = vpop.permute.xlu0 %1925  ;;  %4359 = vmatpush3.bf16.msra.mxu1 %v4356_v35  ;;  %v6547_v35 = vmov 0.0|0.0  }
 0x7b4   :  { %v6079_v13 = vmul.f32 %v1926_v7, %v5366_v28  ;;  %v1921_v36 = vpop.permute.xlu1 %1920  ;;  %v2199_v7 = vld [vmem:[%s6448_s4 + $0x280] sm:$0xff] }
 0x7b5   :  { %v6082_v57 = vmul.f32 %v1921_v36, %v5364_v29 }
 0x7b7   :  { %v4360_v48 = vpack.c.bf16 %v6079_v13, %v6082_v57  ;;  %v1936_v34 = vpop.permute.xlu0 %1935 }
 0x7b8   :  { %v6087_v51 = vmul.f32 %v1936_v34, %v5375_v15  ;;  %v1931_v25 = vpop.permute.xlu1 %1930  ;;  %v2203_v34 = vld [vmem:[%s6448_s4 + $0x2a0] sm:$0xff] }
 0x7b9   :  { %v6090_v44 = vmul.f32 %v1931_v25, %v5373_v12  ;;  %4361 = vmatprep.subr.bf16.mxu1 %v4360_v48  ;;  %v2204_v25 = vld [vmem:[%s6448_s4 + $0x2a8] sm:$0xff] }
 0x7ba   :  { %4363 = vmatpush3.bf16.msra.mxu1 %v4360_v48  ;;  %v2185_v48 = vld [vmem:[%s6448_s4 + $0x210] sm:$0xff] }
 0x7bb   :  { %v4364_v28 = vpack.c.bf16 %v6087_v51, %v6090_v44  ;;  %v1946_v6 = vpop.permute.xlu0 %1945 }
 0x7bc   :  { %v6095_v29 = vmul.f32 %v1946_v6, %v5384_v10  ;;  %v1941_v20 = vpop.permute.xlu1 %1940  ;;  %v4384_v6 = vpack.c.bf16 %v2204_v25, %v2203_v34 }
 0x7bd   :  { %v6098_v18 = vmul.f32 %v1941_v20, %v6544_v14  ;;  %4365 = vmatprep.subr.bf16.mxu1 %v4364_v28  ;;  %v2187_v20 = vld [vmem:[%s6448_s4 + $0x220] sm:$0xff]  ;;  %v2188_v14 = vld [vmem:[%s6448_s4 + $0x228] sm:$0xff] }
 0x7be   :  { %4367 = vmatpush3.bf16.msra.mxu1 %v4364_v28 }
 0x7bf   :  { %v4368_v15 = vpack.c.bf16 %v6095_v29, %v6098_v18  ;;  %v1956_v12 = vpop.permute.xlu0 %1955 }
 0x7c0   :  { %v6103_v58 = vmul.f32 %v1956_v12, %v6545_v11  ;;  %v1951_v55 = vpop.permute.xlu1 %1950  ;;  %v2189_v11 = vld [vmem:[%s6448_s4 + $0x230] sm:$0xff] }
 0x7c1   :  { %v6106_v49 = vmul.f32 %v1951_v55, %v6546_v19  ;;  %4369 = vmatprep.subr.bf16.mxu1 %v4368_v15  ;;  %v2190_v55 = vld [vmem:[%s6448_s4 + $0x238] sm:$0xff]  ;;  %v2207_v19 = vld [vmem:[%s6448_s4 + $0x2c0] sm:$0xff] }
 0x7c2   :  { %4371 = vmatpush3.bf16.msra.mxu1 %v4368_v15  ;;  %v2205_v15 = vld [vmem:[%s6448_s4 + $0x2b0] sm:$0xff] }
 0x7c3   :  { %v4372_v10 = vpack.c.bf16 %v6103_v58, %v6106_v49 }
 0x7c5   :  { %4373 = vmatprep.subr.bf16.mxu1 %v4372_v10 }
 0x7c6   :  { %4375 = vmatpush3.bf16.msra.mxu1 %v4372_v10 }
 0x7c7   :  { %4408 = vmatprep.subr.bf16.mxu1 %v6547_v35 }
 0x7c9   :  { %3968 = vmatmul.mubr.f32.vlgmr.msra.gmra.mrb[66].mxu1 %v6004_v3  ;;  %v2200_v3 = vld [vmem:[%s6448_s4 + $0x288] sm:$0xff] }
 0x7ca   :  { %3970 = vmatprep.mubr.f32.mxu1 %v6007_v39  ;;  %v2183_v39 = vld [vmem:[%s6448_s4 + $0x200] sm:$0xff] }
 0x7cd   :  { %3971 = vmatmul.mubr.f32.gmra.mrb[68].mxu1 %v6010_v52  ;;  %v4376_v52 = vpack.c.bf16 %v2200_v3, %v2199_v7  ;;  %v2191_v7 = vld [vmem:[%s6448_s4 + $0x240] sm:$0xff]  ;;  %v2192_v3 = vld [vmem:[%s6448_s4 + $0x248] sm:$0xff] }
 0x7ce   :  { %3973 = vmatprep.mubr.f32.mxu1 %v6013_v5  ;;  %v2184_v5 = vld [vmem:[%s6448_s4 + $0x208] sm:$0xff] }
 0x7cf   :  { %4377 = vmatprep.subr.bf16.mxu0 %v4376_v52 }
 0x7d1   :  { %3974 = vmatmul.mubr.f32.gmra.mrb[70].mxu1 %v6016_v21  ;;  %v2201_v21 = vld [vmem:[%s6448_s4 + $0x290] sm:$0xff] }
 0x7d2   :  { %3976 = vmatprep.mubr.f32.mxu1 %v6019_v17  ;;  %v2202_v17 = vld [vmem:[%s6448_s4 + $0x298] sm:$0xff] }
 0x7d3   :  { %v4380_v36 = vpack.c.bf16 %v2202_v17, %v2201_v21  ;;  %v2194_v21 = vld [vmem:[%s6448_s4 + $0x258] sm:$0xff]  ;;  %v2211_v17 = vld [vmem:[%s6448_s4 + $0x2e0] sm:$0xff] }
 0x7d5   :  { %3977 = vmatmul.mubr.f32.gmra.mrb[72].mxu1 %v6022_v16  ;;  %v4378_v16 = vpack.c.bf16 %v2184_v5, %v2183_v39  ;;  %v2209_v39 = vld [vmem:[%s6448_s4 + $0x2d0] sm:$0xff] }
 0x7d6   :  { %3979 = vmatprep.mubr.f32.mxu1 %v6025_v38  ;;  %v2186_v38 = vld [vmem:[%s6448_s4 + $0x218] sm:$0xff]  ;;  %v2193_v5 = vld [vmem:[%s6448_s4 + $0x250] sm:$0xff] }
 0x7d7   :  { %4379 = vmatpush3.bf16.msra.mxu0 %v4378_v16  ;;  %v4382_v28 = vpack.c.bf16 %v2186_v38, %v2185_v48  ;;  %v4398_v16 = vpack.c.bf16 %v2194_v21, %v2193_v5  ;;  %v2195_v48 = vld [vmem:[%s6448_s4 + $0x260] sm:$0xff]  ;;  %v2196_v38 = vld [vmem:[%s6448_s4 + $0x268] sm:$0xff] }
 0x7d8   :  { %4381 = vmatprep.subr.bf16.mxu0 %v4380_v36  ;;  %v4402_v34 = vpack.c.bf16 %v2196_v38, %v2195_v48 }
 0x7d9   :  { %3980 = vmatmul.mubr.f32.gmra.mrb[74].mxu1 %v6028_v2  ;;  %v2206_v2 = vld [vmem:[%s6448_s4 + $0x2b8] sm:$0xff] }
 0x7da   :  { %3982 = vmatprep.mubr.f32.mxu1 %v6031_v56  ;;  %v4386_v56 = vpack.c.bf16 %v2188_v14, %v2187_v20  ;;  %v4388_v12 = vpack.c.bf16 %v2206_v2, %v2205_v15 }
 0x7db   :  { %4383 = vmatpush3.bf16.msra.mxu0 %v4382_v28 }
 0x7dc   :  { %4385 = vmatprep.subr.bf16.mxu0 %v4384_v6 }
 0x7dd   :  { %3983 = vmatmul.mubr.f32.gmra.mrb[76].mxu1 %v6034_v54  ;;  %v2208_v54 = vld [vmem:[%s6448_s4 + $0x2c8] sm:$0xff] }
 0x7de   :  { %3985 = vmatprep.mubr.f32.mxu1 %v6037_v62  ;;  %v4390_v62 = vpack.c.bf16 %v2190_v55, %v2189_v11  ;;  %v4392_v10 = vpack.c.bf16 %v2208_v54, %v2207_v19  ;;  %v2213_v19 = vld [vmem:[%s6448_s4 + $0x2f0] sm:$0xff]  ;;  %v2214_v54 = vld [vmem:[%s6448_s4 + $0x2f8] sm:$0xff] }
 0x7df   :  { %4387 = vmatpush3.bf16.msra.mxu0 %v4386_v56 }
 0x7e0   :  { %4389 = vmatprep.subr.bf16.mxu0 %v4388_v12 }
 0x7e1   :  { %3986 = vmatmul.mubr.f32.gmra.mrb[78].mxu1 %v6040_v31  ;;  %v2210_v31 = vld [vmem:[%s6448_s4 + $0x2d8] sm:$0xff] }
 0x7e2   :  { %3988 = vmatprep.mubr.f32.mxu1 %v6043_v37  ;;  %v4394_v37 = vpack.c.bf16 %v2192_v3, %v2191_v7  ;;  %v4396_v52 = vpack.c.bf16 %v2210_v31, %v2209_v39  ;;  %v4404_v7 = vpack.c.bf16 %v2214_v54, %v2213_v19 }
 0x7e3   :  { %4391 = vmatpush3.bf16.msra.mxu0 %v4390_v62 }
 0x7e4   :  { %4393 = vmatprep.subr.bf16.mxu0 %v4392_v10 }
 0x7e5   :  { %3989 = vmatmul.mubr.f32.gmra.mrb[80].mxu1 %v6046_v63  ;;  %v2212_v63 = vld [vmem:[%s6448_s4 + $0x2e8] sm:$0xff] }
 0x7e6   :  { %4023 = vmatprep.mubr.msk.f32.mxu1 %vm6548_vm0, %v6543_v33  ;;  %v4400_v36 = vpack.c.bf16 %v2212_v63, %v2211_v17 }
 0x7e7   :  { %4395 = vmatpush3.bf16.msra.mxu0 %v4394_v37 }
 0x7e8   :  { %4397 = vmatprep.subr.bf16.mxu0 %v4396_v52 }
 0x7eb   :  { %4399 = vmatpush3.bf16.msra.mxu0 %v4398_v16 }
 0x7ec   :  { %4401 = vmatprep.subr.bf16.mxu0 %v4400_v36 }
 0x7ef   :  { %4403 = vmatpush3.bf16.msra.mxu0 %v4402_v34 }
 0x7f0   :  { %4405 = vmatprep.subr.bf16.mxu0 %v4404_v7 }
 0x816   :  { %v3913_v25 = vpop.f32.mrb[80].mxu0 }
 0x817   :  { %v2120_v28 = vmul.f32 %v3913_v25, %v5901_v23  ;;  %v2040_v6 = vpop.f32.mrb[81].mxu0 }
 0x818   :  { %v2119_v20 = vmul.f32 %v5904_v8, %v2040_v6 }
 0x819   :  { %v2136_v14 = vmax.f32 %v2120_v28, 1.0 }
 0x81a   :  { %v2135_v15 = vmax.f32 %v2119_v20, 1.0  ;;  %v3916_v2 = vpop.f32.mrb[82].mxu0 }
 0x81b   :  { %4599 = vrcp.f32 %v2136_v14  ;;  %v2122_v56 = vmul.f32 %v3916_v2, %v5913_v42  ;;  %v2050_v12 = vpop.f32.mrb[83].mxu0  ;;  %v2198_v2 = vld [vmem:[%s6448_s4 + $0x278] sm:$0xff] }
 0x81c   :  { %4601 = vrcp.f32 %v2135_v15  ;;  %v2121_v11 = vmul.f32 %v5916_v53, %v2050_v12  ;;  %v2197_v15 = vld [vmem:[%s6448_s4 + $0x270] sm:$0xff] }
 0x81d   :  { %v2138_v55 = vmax.f32 %v2122_v56, 1.0 }
 0x81e   :  { %v2137_v62 = vmax.f32 %v2121_v11, 1.0  ;;  %v3919_v10 = vpop.f32.mrb[84].mxu0  ;;  %v4406_v11 = vpack.c.bf16 %v2198_v2, %v2197_v15 }
 0x81f   :  { %4603 = vrcp.f32 %v2138_v55  ;;  %v2124_v3 = vmul.f32 %v3919_v10, %v5925_v32  ;;  %v2060_v39 = vpop.f32.mrb[85].mxu0 }
 0x820   :  { %4605 = vrcp.f32 %v2137_v62  ;;  %v2123_v31 = vmul.f32 %v5928_v0, %v2060_v39  ;;  %4407 = vmatpush3.bf16.msra.mxu0 %v4406_v11 }
 0x821   :  { %v2140_v37 = vmax.f32 %v2124_v3, 1.0  ;;  %4456 = vmatprep.subr.bf16.mxu0 %v6547_v35 }
 0x822   :  { %v2139_v52 = vmax.f32 %v2123_v31, 1.0  ;;  %v3922_v5 = vpop.f32.mrb[86].mxu0 }
 0x823   :  { %4607 = vrcp.f32 %v2140_v37  ;;  %v2126_v21 = vmul.f32 %v3922_v5, %v5937_v40  ;;  %v2070_v17 = vpop.f32.mrb[87].mxu0 }
 0x824   :  { %4609 = vrcp.f32 %v2139_v52  ;;  %v2125_v63 = vmul.f32 %v5940_v61, %v2070_v17 }
 0x825   :  { %v4600_v16 = vpop.eup %4599  ;;  %v2142_v36 = vmax.f32 %v2126_v21, 1.0 }
 0x826   :  { %v4602_v48 = vpop.eup %4601  ;;  %v2141_v38 = vmax.f32 %v2125_v63, 1.0  ;;  %v3925_v34 = vpop.f32.mrb[88].mxu0  ;;  %v2154_v25 = vmul.f32 %v4600_v16, %v5901_v23 }
 0x827   :  { %4611 = vrcp.f32 %v2142_v36  ;;  %v2128_v28 = vmul.f32 %v3925_v34, %v5950_v41  ;;  %v2080_v6 = vpop.f32.mrb[89].mxu0  ;;  %v2152_v20 = vmul.f32 %v4602_v48, %v5904_v8 }
 0x828   :  { %4613 = vrcp.f32 %v2141_v38  ;;  %v2127_v14 = vmul.f32 %v5954_v60, %v2080_v6  ;;  %2368 = vperm.xlu0 %4489, %v2154_v25  }
 0x829   :  { %v4604_v56 = vpop.eup %4603  ;;  %v2144_v12 = vmax.f32 %v2128_v28, 1.0  ;;  %2363 = vperm.xlu1 %4490, %v2152_v20  }
 0x82a   :  { %v4606_v55 = vpop.eup %4605  ;;  %v2143_v19 = vmax.f32 %v2127_v14, 1.0  ;;  %v3928_v54 = vpop.f32.mrb[90].mxu0  ;;  %v2158_v62 = vmul.f32 %v4604_v56, %v5913_v42 }
 0x82b   :  { %4615 = vrcp.f32 %v2144_v12  ;;  %v2130_v10 = vmul.f32 %v3928_v54, %v5964_v27  ;;  %v2090_v7 = vpop.f32.mrb[91].mxu0  ;;  %v2156_v3 = vmul.f32 %v4606_v55, %v5916_v53 }
 0x82c   :  { %4617 = vrcp.f32 %v2143_v19  ;;  %v2129_v39 = vmul.f32 %v5968_v45, %v2090_v7  ;;  %2378 = vperm.xlu0 %4489, %v2158_v62  }
 0x82d   :  { %v4608_v31 = vpop.eup %4607  ;;  %v2146_v37 = vmax.f32 %v2130_v10, 1.0  ;;  %2373 = vperm.xlu1 %4490, %v2156_v3  }
 0x82e   :  { %v4610_v52 = vpop.eup %4609  ;;  %v2145_v5 = vmax.f32 %v2129_v39, 1.0  ;;  %v3931_v21 = vpop.f32.mrb[92].mxu0  ;;  %v2162_v17 = vmul.f32 %v4608_v31, %v5925_v32 }
 0x82f   :  { %4619 = vrcp.f32 %v2146_v37  ;;  %v2132_v63 = vmul.f32 %v3931_v21, %v5978_v46  ;;  %v2100_v16 = vpop.f32.mrb[93].mxu0  ;;  %v2160_v36 = vmul.f32 %v4610_v52, %v5928_v0 }
 0x830   :  { %4621 = vrcp.f32 %v2145_v5  ;;  %v2131_v48 = vmul.f32 %v5982_v43, %v2100_v16  ;;  %2388 = vperm.xlu0 %4489, %v2162_v17  }
 0x831   :  { %v4612_v38 = vpop.eup %4611  ;;  %v2148_v34 = vmax.f32 %v2132_v63, 1.0  ;;  %2383 = vperm.xlu1 %4490, %v2160_v36   ;;  %v4496_v36 = vpack.i.bf16 %v5913_v42, %v5916_v53 }
 0x832   :  { %v4614_v25 = vpop.eup %4613  ;;  %v2147_v28 = vmax.f32 %v2131_v48, 1.0  ;;  %v3934_v6 = vpop.f32.mrb[94].mxu0  ;;  %v2166_v20 = vmul.f32 %v4612_v38, %v5937_v40  ;;  %v4491_v48 = vpack.i.bf16 %v5901_v23, %v5904_v8  ;;  %v4506_v38 = vpack.i.bf16 %v5937_v40, %v5940_v61 }
 0x833   :  { %4623 = vrcp.f32 %v2148_v34  ;;  %v2134_v14 = vmul.f32 %v3934_v6, %v5992_v26  ;;  %v2110_v15 = vpop.f32.mrb[95].mxu0  ;;  %v2164_v2 = vmul.f32 %v4614_v25, %v5940_v61  ;;  %v4501_v34 = vpack.i.bf16 %v5925_v32, %v5928_v0 }
 0x834   :  { %4625 = vrcp.f32 %v2147_v28  ;;  %v2133_v56 = vmul.f32 %v5996_v4, %v2110_v15  ;;  %2398 = vperm.xlu0 %4489, %v2166_v20   ;;  %v4516_v25 = vpack.i.bf16 %v5964_v27, %v5968_v45  ;;  %v4511_v28 = vpack.i.bf16 %v5950_v41, %v5954_v60 }
 0x835   :  { %v4616_v12 = vpop.eup %4615  ;;  %v2150_v11 = vmax.f32 %v2134_v14, 1.0  ;;  %2393 = vperm.xlu1 %4490, %v2164_v2   ;;  %v4526_v23 = vpack.i.bf16 %v5992_v26, %v5996_v4  ;;  %v4521_v8 = vpack.i.bf16 %v5978_v46, %v5982_v43 }
 0x836   :  { %v4618_v55 = vpop.eup %4617  ;;  %v2149_v19 = vmax.f32 %v2133_v56, 1.0  ;;  %v2170_v54 = vmul.f32 %v4616_v12, %v5950_v41 }
 0x837   :  { %4627 = vrcp.f32 %v2150_v11  ;;  %v2168_v62 = vmul.f32 %v4618_v55, %v5954_v60 }
 0x838   :  { %4629 = vrcp.f32 %v2149_v19  ;;  %2408 = vperm.xlu0 %4489, %v2170_v54  }
 0x839   :  { %v4620_v10 = vpop.eup %4619  ;;  %2403 = vperm.xlu1 %4490, %v2168_v62  }
 0x83a   :  { %v4622_v7 = vpop.eup %4621  ;;  %v2174_v3 = vmul.f32 %v4620_v10, %v5964_v27 }
 0x83b   :  { %v2172_v39 = vmul.f32 %v4622_v7, %v5968_v45 }
 0x83c   :  { %2418 = vperm.xlu0 %4489, %v2174_v3  }
 0x83d   :  { %v4624_v31 = vpop.eup %4623  ;;  %2413 = vperm.xlu1 %4490, %v2172_v39  }
 0x83e   :  { %v4626_v37 = vpop.eup %4625  ;;  %v2178_v52 = vmul.f32 %v4624_v31, %v5978_v46 }
 0x83f   :  { %v2176_v5 = vmul.f32 %v4626_v37, %v5982_v43 }
 0x840   :  { %2428 = vperm.xlu0 %4489, %v2178_v52  }
 0x841   :  { %v4628_v21 = vpop.eup %4627  ;;  %2423 = vperm.xlu1 %4490, %v2176_v5  }
 0x842   :  { %v4630_v17 = vpop.eup %4629  ;;  %v2182_v63 = vmul.f32 %v4628_v21, %v5992_v26 }
 0x843   :  { %v2180_v16 = vmul.f32 %v4630_v17, %v5996_v4 }
 0x844   :  { %2438 = vperm.xlu0 %4489, %v2182_v63  }
 0x845   :  { %2433 = vperm.xlu1 %4490, %v2180_v16  }
 0x848   :  { %4497 = vperm.xlu0 %4489, %v4496_v36  }
 0x849   :  { %4492 = vperm.xlu1 %4490, %v4491_v48  }
 0x84c   :  { %4507 = vperm.xlu0 %4489, %v4506_v38  }
 0x84d   :  { %4502 = vperm.xlu1 %4490, %v4501_v34  }
 0x850   :  { %4517 = vperm.xlu0 %4489, %v4516_v25  }
 0x851   :  { %4512 = vperm.xlu1 %4490, %v4511_v28  }
 0x854   :  { %4527 = vperm.xlu0 %4489, %v4526_v23  }
 0x855   :  { %4522 = vperm.xlu1 %4490, %v4521_v8  }
 0x89c   :  { %v3969_v42 = vpop.f32.mrb[66].mxu1 }
 0x89d   :  { %v2282_v53 = vpop.f32.mrb[67].mxu1 }
 0x8a0   :  { %v3972_v32 = vpop.f32.mrb[68].mxu1 }
 0x8a1   :  { %v2292_v0 = vpop.f32.mrb[69].mxu1 }
 0x8a4   :  { %v3975_v40 = vpop.f32.mrb[70].mxu1 }
 0x8a5   :  { %v2302_v61 = vpop.f32.mrb[71].mxu1 }
 0x8a7   :  { %v2369_v60 = vpop.permute.xlu0 %2368 }
 0x8a8   :  { %v2364_v27 = vpop.permute.xlu1 %2363  ;;  %v3978_v45 = vpop.f32.mrb[72].mxu1  ;;  %v2442_v4 = vmul.f32 %v3969_v42, %v2369_v60 }
 0x8a9   :  { %v2441_v6 = vmul.f32 %v2364_v27, %v2282_v53  ;;  %v2312_v41 = vpop.f32.mrb[73].mxu1 }
 0x8ab   :  { %2526 = vmatmul.mubr.f32.vlgmr.msra.gmra.mrb[96].mxu0 %v2441_v6  ;;  %v2379_v2 = vpop.permute.xlu0 %2378 }
 0x8ac   :  { %2530 = vmatprep.mubr.f32.mxu0 %v6050_v9  ;;  %v3981_v26 = vpop.f32.mrb[74].mxu1  ;;  %v2374_v46 = vpop.permute.xlu1 %2373  ;;  %v2444_v12 = vmul.f32 %v3972_v32, %v2379_v2 }
 0x8ad   :  { %v2322_v20 = vpop.f32.mrb[75].mxu1  ;;  %v2443_v14 = vmul.f32 %v2374_v46, %v2292_v0 }
 0x8af   :  { %2531 = vmatmul.mubr.f32.gmra.mrb[98].mxu0 %v2442_v4  ;;  %v2389_v62 = vpop.permute.xlu0 %2388 }
 0x8b0   :  { %2535 = vmatprep.mubr.f32.mxu0 %v6058_v47  ;;  %v3984_v43 = vpop.f32.mrb[76].mxu1  ;;  %v2384_v55 = vpop.permute.xlu1 %2383  ;;  %v2446_v47 = vmul.f32 %v3975_v40, %v2389_v62 }
 0x8b1   :  { %v2332_v15 = vpop.f32.mrb[77].mxu1  ;;  %v2445_v19 = vmul.f32 %v2384_v55, %v2302_v61 }
 0x8b3   :  { %2536 = vmatmul.mubr.f32.gmra.mrb[100].mxu0 %v2443_v14  ;;  %v2399_v7 = vpop.permute.xlu0 %2398 }
 0x8b4   :  { %2540 = vmatprep.mubr.f32.mxu0 %v6055_v22  ;;  %v3987_v56 = vpop.f32.mrb[78].mxu1  ;;  %v2394_v10 = vpop.permute.xlu1 %2393  ;;  %v2448_v3 = vmul.f32 %v3978_v45, %v2399_v7 }
 0x8b5   :  { %v2342_v11 = vpop.f32.mrb[79].mxu1  ;;  %v2447_v22 = vmul.f32 %v2394_v10, %v2312_v41 }
 0x8b7   :  { %2541 = vmatmul.mubr.f32.gmra.mrb[102].mxu0 %v2444_v12  ;;  %v2409_v31 = vpop.permute.xlu0 %2408 }
 0x8b8   :  { %2545 = vmatprep.mubr.f32.mxu0 %v6066_v24  ;;  %v3990_v9 = vpop.f32.mrb[80].mxu1  ;;  %v2404_v39 = vpop.permute.xlu1 %2403 }
 0x8b9   :  { %v2352_v54 = vpop.f32.mrb[81].mxu1  ;;  %v2449_v24 = vmul.f32 %v2404_v39, %v2322_v20 }
 0x8bb   :  { %2546 = vmatmul.mubr.f32.gmra.mrb[104].mxu0 %v2445_v19  ;;  %v2419_v52 = vpop.permute.xlu0 %2418 }
 0x8bc   :  { %2550 = vmatprep.mubr.f32.mxu0 %v6063_v59  ;;  %v2450_v59 = vmul.f32 %v3981_v26, %v2409_v31  ;;  %v2414_v37 = vpop.permute.xlu1 %2413 }
 0x8bf   :  { %2551 = vmatmul.mubr.f32.gmra.mrb[106].mxu0 %v2446_v47  ;;  %v2429_v21 = vpop.permute.xlu0 %2428 }
 0x8c0   :  { %2555 = vmatprep.mubr.f32.mxu0 %v6074_v50  ;;  %v2451_v50 = vmul.f32 %v2414_v37, %v2332_v15  ;;  %v2424_v5 = vpop.permute.xlu1 %2423 }
 0x8c3   :  { %2556 = vmatmul.mubr.f32.gmra.mrb[108].mxu0 %v2447_v22  ;;  %v2439_v63 = vpop.permute.xlu0 %2438 }
 0x8c4   :  { %2560 = vmatprep.mubr.f32.mxu0 %v6071_v30  ;;  %v2452_v30 = vmul.f32 %v3984_v43, %v2419_v52  ;;  %v2434_v17 = vpop.permute.xlu1 %2433 }
 0x8c7   :  { %2561 = vmatmul.mubr.f32.gmra.mrb[110].mxu0 %v2448_v3  ;;  %v4498_v26 = vpop.permute.xlu0 %4497 }
 0x8c8   :  { %2565 = vmatprep.mubr.f32.mxu0 %v6082_v57  ;;  %v2453_v57 = vmul.f32 %v2424_v5, %v2342_v11  ;;  %v4493_v25 = vpop.permute.xlu1 %4492  ;;  %v4500_v14 = vunpack.i.h.bf16 %v4498_v26  ;;  %v4499_v15 = vunpack.i.l.bf16 %v4498_v26 }
 0x8c9   :  { %v4495_v42 = vunpack.i.h.bf16 %v4493_v25  ;;  %v4494_v53 = vunpack.i.l.bf16 %v4493_v25 }
 0x8cb   :  { %2566 = vmatmul.mubr.f32.gmra.mrb[112].mxu0 %v2449_v24 }
 0x8cc   :  { %2570 = vmatprep.mubr.f32.mxu0 %v6079_v13  ;;  %v2454_v13 = vmul.f32 %v3987_v56, %v2429_v21  ;;  %v4503_v47 = vpop.permute.xlu1 %4502 }
 0x8cd   :  { %v4505_v39 = vunpack.i.h.bf16 %v4503_v47  ;;  %v4504_v24 = vunpack.i.l.bf16 %v4503_v47 }
 0x8cf   :  { %2571 = vmatmul.mubr.f32.gmra.mrb[114].mxu0 %v2450_v59 }
 0x8d0   :  { %2575 = vmatprep.mubr.f32.mxu0 %v6090_v44  ;;  %v2455_v44 = vmul.f32 %v2434_v17, %v2352_v54 }
 0x8d3   :  { %2576 = vmatmul.mubr.f32.gmra.mrb[116].mxu0 %v2451_v50 }
 0x8d4   :  { %2580 = vmatprep.mubr.f32.mxu0 %v6087_v51  ;;  %v2456_v51 = vmul.f32 %v3990_v9, %v2439_v63 }
 0x8d7   :  { %2581 = vmatmul.mubr.f32.gmra.mrb[118].mxu0 %v2452_v30 }
 0x8d8   :  { %2585 = vmatprep.mubr.f32.mxu0 %v6098_v18 }
 0x8db   :  { %2586 = vmatmul.mubr.f32.gmra.mrb[120].mxu0 %v2453_v57 }
 0x8dc   :  { %2590 = vmatprep.mubr.f32.mxu0 %v6095_v29  ;;  %v6293_v29 = vld [vmem:[%s6449_s5 + $0x2] ss:$0 sm:$0xff] }
 0x8df   :  { %2591 = vmatmul.mubr.f32.gmra.mrb[122].mxu0 %v2454_v13  ;;  %v4508_v13 = vpop.permute.xlu0 %4507 }
 0x8e0   :  { %2595 = vmatprep.mubr.f32.mxu0 %v6106_v49 }
 0x8e3   :  { %2596 = vmatmul.mubr.f32.gmra.mrb[124].mxu0 %v2455_v44 }
 0x8e4   :  { %2600 = vmatprep.mubr.f32.mxu0 %v6103_v58 }
 0x8e7   :  { %2601 = vmatmul.mubr.f32.gmra.mrb[126].mxu0 %v2456_v51 }
 0x8e8   :  { %4093 = vmatprep.mubr.msk.f32.mxu0 %vm6548_vm0, %v6543_v33 }
 0x97e   :  { %v3495_v18 = vpop.f32.mrb[96].mxu0 }
 0x97f   :  { %v3496_v16 = vpop.f32.mrb[97].mxu0 }
 0x980   :  { %v3497_v36 = vadd.f32 %v3496_v16, %v3495_v18  ;;  %v4510_v18 = vunpack.i.h.bf16 %v4508_v13  ;;  %v4509_v16 = vunpack.i.l.bf16 %v4508_v13 }
 0x982   :  { %v2528_v49 = vadd.f32 %v3497_v36, %v6293_v29  ;;  %v3498_v48 = vpop.f32.mrb[98].mxu0 }
 0x983   :  { %v3499_v38 = vpop.f32.mrb[99].mxu0 }
 0x984   :  { %v3500_v34 = vadd.f32 %v3499_v38, %v3498_v48  ;;  %v2606_v58 = vmax.f32 %v2528_v49, 0.0 }
 0x986   :  { %v2533_v28 = vadd.f32 %v3500_v34, %v6293_v29  ;;  %v3501_v23 = vpop.f32.mrb[100].mxu0  ;;  %v2705_v40 = vmul.f32 %v4494_v53, %v2606_v58 }
 0x987   :  { %v3502_v8 = vpop.f32.mrb[101].mxu0 }
 0x988   :  { %v2607_v32 = vmax.f32 %v2533_v28, 0.0  ;;  %v3503_v0 = vadd.f32 %v3502_v8, %v3501_v23  ;;  %v4513_v8 = vpop.permute.xlu1 %4512 }
 0x98a   :  { %v2706_v61 = vmul.f32 %v4495_v42, %v2607_v32  ;;  %v2538_v27 = vadd.f32 %v3503_v0, %v6293_v29  ;;  %v3504_v45 = vpop.f32.mrb[102].mxu0 }
 0x98b   :  { %v3505_v6 = vpop.f32.mrb[103].mxu0 }
 0x98c   :  { %v4409_v41 = vpack.c.bf16 %v2706_v61, %v2705_v40  ;;  %v3506_v60 = vadd.f32 %v3505_v6, %v3504_v45  ;;  %v2608_v4 = vmax.f32 %v2538_v27, 0.0  ;;  %v4515_v40 = vunpack.i.h.bf16 %v4513_v8 }
 0x98d   :  { %v4514_v61 = vunpack.i.l.bf16 %v4513_v8  ;;  %v2795_v8 = vld [vmem:[%s6448_s4 + $0x318] sm:$0xff] }
 0x98e   :  { %v2543_v20 = vadd.f32 %v3506_v60, %v6293_v29  ;;  %v3507_v46 = vpop.f32.mrb[104].mxu0  ;;  %4410 = vmatpush3.bf16.msra.mxu1 %v4409_v41  ;;  %v2707_v12 = vmul.f32 %v4499_v15, %v2608_v4 }
 0x98f   :  { %v3508_v43 = vpop.f32.mrb[105].mxu0  ;;  %4411 = vmatprep.subr.bf16.mxu1 %v6547_v35 }
 0x990   :  { %v2609_v2 = vmax.f32 %v2543_v20, 0.0  ;;  %v3509_v56 = vadd.f32 %v3508_v43, %v3507_v46  ;;  %v4518_v43 = vpop.permute.xlu0 %4517 }
 0x992   :  { %v2708_v11 = vmul.f32 %v4500_v14, %v2609_v2  ;;  %v2548_v55 = vadd.f32 %v3509_v56, %v6293_v29  ;;  %v3510_v9 = vpop.f32.mrb[106].mxu0 }
 0x993   :  { %v3511_v19 = vpop.f32.mrb[107].mxu0 }
 0x994   :  { %v4412_v54 = vpack.c.bf16 %v2708_v11, %v2707_v12  ;;  %v3512_v62 = vadd.f32 %v3511_v19, %v3510_v9  ;;  %v2610_v10 = vmax.f32 %v2548_v55, 0.0  ;;  %v4520_v12 = vunpack.i.h.bf16 %v4518_v43 }
 0x995   :  { %v4519_v11 = vunpack.i.l.bf16 %v4518_v43 }
 0x996   :  { %v2553_v22 = vadd.f32 %v3512_v62, %v6293_v29  ;;  %v3513_v7 = vpop.f32.mrb[108].mxu0  ;;  %4413 = vmatpush3.bf16.msra.mxu1 %v4412_v54  ;;  %v2709_v37 = vmul.f32 %v4504_v24, %v2610_v10 }
 0x997   :  { %v3514_v3 = vpop.f32.mrb[109].mxu0  ;;  %4414 = vmatprep.subr.bf16.mxu1 %v6547_v35 }
 0x998   :  { %v2611_v31 = vmax.f32 %v2553_v22, 0.0  ;;  %v3515_v59 = vadd.f32 %v3514_v3, %v3513_v7  ;;  %v4523_v3 = vpop.permute.xlu1 %4522 }
 0x99a   :  { %v2710_v50 = vmul.f32 %v4505_v39, %v2611_v31  ;;  %v2558_v52 = vadd.f32 %v3515_v59, %v6293_v29  ;;  %v3516_v30 = vpop.f32.mrb[110].mxu0 }
 0x99b   :  { %v3517_v5 = vpop.f32.mrb[111].mxu0 }
 0x99c   :  { %v4415_v57 = vpack.c.bf16 %v2710_v50, %v2709_v37  ;;  %v3518_v21 = vadd.f32 %v3517_v5, %v3516_v30  ;;  %v2612_v17 = vmax.f32 %v2558_v52, 0.0  ;;  %v4525_v37 = vunpack.i.h.bf16 %v4523_v3 }
 0x99d   :  { %v4524_v50 = vunpack.i.l.bf16 %v4523_v3  ;;  %v2892_v3 = vld [vmem:[%s6448_s4 + $0x3c0] sm:$0xff] }
 0x99e   :  { %v2563_v44 = vadd.f32 %v3518_v21, %v6293_v29  ;;  %v3519_v63 = vpop.f32.mrb[112].mxu0  ;;  %4416 = vmatpush3.bf16.msra.mxu1 %v4415_v57  ;;  %v2711_v48 = vmul.f32 %v4509_v16, %v2612_v17 }
 0x99f   :  { %v3520_v51 = vpop.f32.mrb[113].mxu0  ;;  %4417 = vmatprep.subr.bf16.mxu1 %v6547_v35 }
 0x9a0   :  { %v2613_v36 = vmax.f32 %v2563_v44, 0.0  ;;  %v3521_v49 = vadd.f32 %v3520_v51, %v3519_v63  ;;  %v4528_v51 = vpop.permute.xlu0 %4527 }
 0x9a2   :  { %v2712_v38 = vmul.f32 %v4510_v18, %v2613_v36  ;;  %v2568_v34 = vadd.f32 %v3521_v49, %v6293_v29  ;;  %v3522_v25 = vpop.f32.mrb[114].mxu0  ;;  %v4530_v36 = vunpack.i.h.bf16 %v4528_v51  ;;  %v4529_v49 = vunpack.i.l.bf16 %v4528_v51 }
 0x9a3   :  { %v3523_v58 = vpop.f32.mrb[115].mxu0 }
 0x9a4   :  { %v4418_v28 = vpack.c.bf16 %v2712_v38, %v2711_v48  ;;  %v3524_v23 = vadd.f32 %v3523_v58, %v3522_v25  ;;  %v2614_v42 = vmax.f32 %v2568_v34, 0.0  ;;  %v2792_v25 = vld [vmem:[%s6448_s4 + $0x300] sm:$0xff]  ;;  %v2793_v58 = vld [vmem:[%s6448_s4 + $0x308] sm:$0xff] }
 0x9a6   :  { %v2573_v53 = vadd.f32 %v3524_v23, %v6293_v29  ;;  %v3525_v32 = vpop.f32.mrb[116].mxu0  ;;  %4419 = vmatpush3.bf16.msra.mxu1 %v4418_v28  ;;  %v2713_v6 = vmul.f32 %v4514_v61, %v2614_v42  ;;  %v4433_v23 = vpack.c.bf16 %v2793_v58, %v2792_v25  ;;  %v4653_v42 = vld [vmem:[%s6446_s2] sm:$0xff]  ;;  %v2798_v61 = vld [vmem:[%s6448_s4 + $0x330] sm:$0xff] }
 0x9a7   :  { %v3526_v0 = vpop.f32.mrb[117].mxu0  ;;  %4420 = vmatprep.subr.bf16.mxu1 %v6547_v35 }
 0x9a8   :  { %v2615_v27 = vmax.f32 %v2573_v53, 0.0  ;;  %v3527_v45 = vadd.f32 %v3526_v0, %v3525_v32  ;;  %v2796_v32 = vld [vmem:[%s6448_s4 + $0x320] sm:$0xff]  ;;  %v2797_v0 = vld [vmem:[%s6448_s4 + $0x328] sm:$0xff] }
 0x9aa   :  { %v2714_v41 = vmul.f32 %v4515_v40, %v2615_v27  ;;  %v2578_v60 = vadd.f32 %v3527_v45, %v6293_v29  ;;  %v3528_v26 = vpop.f32.mrb[118].mxu0  ;;  %v4439_v40 = vpack.c.bf16 %v2797_v0, %v2796_v32  ;;  %v2800_v45 = vld [vmem:[%s6448_s4 + $0x340] sm:$0xff] }
 0x9ab   :  { %v3529_v4 = vpop.f32.mrb[119].mxu0 }
 0x9ac   :  { %v4421_v20 = vpack.c.bf16 %v2714_v41, %v2713_v6  ;;  %v3530_v46 = vadd.f32 %v3529_v4, %v3528_v26  ;;  %v2616_v14 = vmax.f32 %v2578_v60, 0.0  ;;  %v2801_v6 = vld [vmem:[%s6448_s4 + $0x348] sm:$0xff]  ;;  %v2802_v60 = vld [vmem:[%s6448_s4 + $0x350] sm:$0xff]  ;;  %v2803_v26 = vld [vmem:[%s6448_s4 + $0x358] sm:$0xff] }
 0x9ad   :  { %v4445_v41 = vpack.c.bf16 %v2801_v6, %v2800_v45  ;;  %v4448_v4 = vpack.c.bf16 %v2803_v26, %v2802_v60 }
 0x9ae   :  { %v2583_v15 = vadd.f32 %v3530_v46, %v6293_v29  ;;  %v3531_v2 = vpop.f32.mrb[120].mxu0  ;;  %4422 = vmatpush3.bf16.msra.mxu1 %v4421_v20  ;;  %v2715_v19 = vmul.f32 %v4519_v11, %v2616_v14  ;;  %v2804_v20 = vld [vmem:[%s6448_s4 + $0x360] sm:$0xff]  ;;  %v2805_v46 = vld [vmem:[%s6448_s4 + $0x368] sm:$0xff]  ;;  %v2806_v14 = vld [vmem:[%s6448_s4 + $0x370] sm:$0xff] }
 0x9af   :  { %v3532_v56 = vpop.f32.mrb[121].mxu0  ;;  %4423 = vmatprep.subr.bf16.mxu1 %v6547_v35  ;;  %v4451_v43 = vpack.c.bf16 %v2805_v46, %v2804_v20  ;;  %v2886_v11 = vld [vmem:[%s6448_s4 + $0x390] sm:$0xff] }
 0x9b0   :  { %v2617_v55 = vmax.f32 %v2583_v15, 0.0  ;;  %v3533_v9 = vadd.f32 %v3532_v56, %v3531_v2  ;;  %v2807_v15 = vld [vmem:[%s6448_s4 + $0x378] sm:$0xff]  ;;  %v2884_v56 = vld [vmem:[%s6448_s4 + $0x380] sm:$0xff] }
 0x9b1   :  { %v4454_v2 = vpack.c.bf16 %v2807_v15, %v2806_v14 }
 0x9b2   :  { %v2716_v54 = vmul.f32 %v4520_v12, %v2617_v55  ;;  %v2588_v62 = vadd.f32 %v3533_v9, %v6293_v29  ;;  %v3534_v47 = vpop.f32.mrb[122].mxu0  ;;  %v2885_v12 = vld [vmem:[%s6448_s4 + $0x388] sm:$0xff]  ;;  %v2887_v9 = vld [vmem:[%s6448_s4 + $0x398] sm:$0xff] }
 0x9b3   :  { %v3535_v10 = vpop.f32.mrb[123].mxu0  ;;  %v4457_v55 = vpack.c.bf16 %v2885_v12, %v2884_v56 }
 0x9b4   :  { %v4424_v22 = vpack.c.bf16 %v2716_v54, %v2715_v19  ;;  %v3536_v7 = vadd.f32 %v3535_v10, %v3534_v47  ;;  %v2618_v39 = vmax.f32 %v2588_v62, 0.0  ;;  %v4460_v19 = vpack.c.bf16 %v2887_v9, %v2886_v11  ;;  %v2888_v54 = vld [vmem:[%s6448_s4 + $0x3a0] sm:$0xff]  ;;  %v2889_v62 = vld [vmem:[%s6448_s4 + $0x3a8] sm:$0xff]  ;;  %v2890_v10 = vld [vmem:[%s6448_s4 + $0x3b0] sm:$0xff] }
 0x9b5   :  { %4458 = vmatpush3.bf16.msra.mxu0 %v4457_v55  ;;  %v4463_v47 = vpack.c.bf16 %v2889_v62, %v2888_v54 }
 0x9b6   :  { %v2593_v24 = vadd.f32 %v3536_v7, %v6293_v29  ;;  %v3537_v31 = vpop.f32.mrb[124].mxu0  ;;  %4425 = vmatpush3.bf16.msra.mxu1 %v4424_v22  ;;  %v2717_v5 = vmul.f32 %v4524_v50, %v2618_v39  ;;  %4459 = vmatprep.subr.bf16.mxu0 %v6547_v35  ;;  %v2891_v22 = vld [vmem:[%s6448_s4 + $0x3b8] sm:$0xff]  ;;  %v2893_v39 = vld [vmem:[%s6448_s4 + $0x3c8] sm:$0xff]  ;;  %v2896_v50 = vld [vmem:[%s6448_s4 + $0x3e0] sm:$0xff] }
 0x9b7   :  { %v3538_v59 = vpop.f32.mrb[125].mxu0  ;;  %4426 = vmatprep.subr.bf16.mxu1 %v6547_v35  ;;  %v4466_v7 = vpack.c.bf16 %v2891_v22, %v2890_v10 }
 0x9b8   :  { %v2619_v52 = vmax.f32 %v2593_v24, 0.0  ;;  %v3539_v30 = vadd.f32 %v3538_v59, %v3537_v31  ;;  %v4469_v24 = vpack.c.bf16 %v2893_v39, %v2892_v3  ;;  %v2894_v31 = vld [vmem:[%s6448_s4 + $0x3d0] sm:$0xff]  ;;  %v2895_v59 = vld [vmem:[%s6448_s4 + $0x3d8] sm:$0xff] }
 0x9b9   :  { %4461 = vmatpush3.bf16.msra.mxu0 %v4460_v19 }
 0x9ba   :  { %v2718_v57 = vmul.f32 %v4525_v37, %v2619_v52  ;;  %v2598_v21 = vadd.f32 %v3539_v30, %v6293_v29  ;;  %v3540_v13 = vpop.f32.mrb[126].mxu0  ;;  %4462 = vmatprep.subr.bf16.mxu0 %v6547_v35  ;;  %v4472_v37 = vpack.c.bf16 %v2895_v59, %v2894_v31  ;;  %v2897_v52 = vld [vmem:[%s6448_s4 + $0x3e8] sm:$0xff] }
 0x9bb   :  { %v3541_v17 = vpop.f32.mrb[127].mxu0  ;;  %v4475_v30 = vpack.c.bf16 %v2897_v52, %v2896_v50 }
 0x9bc   :  { %v4427_v44 = vpack.c.bf16 %v2718_v57, %v2717_v5  ;;  %v3542_v63 = vadd.f32 %v3541_v17, %v3540_v13  ;;  %v2620_v18 = vmax.f32 %v2598_v21, 0.0  ;;  %v2898_v5 = vld [vmem:[%s6448_s4 + $0x3f0] sm:$0xff]  ;;  %v2899_v57 = vld [vmem:[%s6448_s4 + $0x3f8] sm:$0xff]  ;;  %v2622_v13 = vmax.f32 %v5818_v1, 1.0 }
 0x9bd   :  { %4464 = vmatpush3.bf16.msra.mxu0 %v4463_v47  ;;  %v4478_v21 = vpack.c.bf16 %v2899_v57, %v2898_v5 }
 0x9be   :  { %v2603_v16 = vadd.f32 %v3542_v63, %v6293_v29  ;;  %4428 = vmatpush3.bf16.msra.mxu1 %v4427_v44  ;;  %v2719_v38 = vmul.f32 %v4529_v49, %v2620_v18  ;;  %v2794_v29 = vld [vmem:[%s6448_s4 + $0x310] sm:$0xff]  ;;  %4465 = vmatprep.subr.bf16.mxu0 %v6547_v35  ;;  %4631 = vrcp.f32 %v2622_v13  ;;  %v3075_v18 = vld [vmem:[%s6449_s5 + $0x4] ss:$0 sm:$0xff] }
 0x9bf   :  { %4429 = vmatprep.subr.bf16.mxu1 %v6547_v35  ;;  %v4436_v53 = vpack.c.bf16 %v2795_v8, %v2794_v29 }
 0x9c0   :  { %v2621_v48 = vmax.f32 %v2603_v16, 0.0 }
 0x9c1   :  { %4467 = vmatpush3.bf16.msra.mxu0 %v4466_v7 }
 0x9c2   :  { %v2720_v34 = vmul.f32 %v4530_v36, %v2621_v48  ;;  %4468 = vmatprep.subr.bf16.mxu0 %v6547_v35 }
 0x9c4   :  { %v4430_v28 = vpack.c.bf16 %v2720_v34, %v2719_v38 }
 0x9c5   :  { %4470 = vmatpush3.bf16.msra.mxu0 %v4469_v24 }
 0x9c6   :  { %4431 = vmatpush3.bf16.msra.mxu1 %v4430_v28  ;;  %4471 = vmatprep.subr.bf16.mxu0 %v6547_v35 }
 0x9c7   :  { %4432 = vmatprep.subr.bf16.mxu1 %v6547_v35 }
 0x9c8   :  { %v4632_v17 = vpop.eup %4631 }
 0x9c9   :  { %4024 = vmatmul.mubr.f32.vlgmr.msra.gmra.mrb[82].mxu1 %v4653_v42  ;;  %4473 = vmatpush3.bf16.msra.mxu0 %v4472_v37 }
 0x9ca   :  { %4434 = vmatpush3.bf16.msra.mxu1 %v4433_v23  ;;  %4058 = vmatprep.mubr.msk.f32.mxu1 %vm6548_vm0, %v6543_v33  ;;  %v2799_v33 = vld [vmem:[%s6448_s4 + $0x338] sm:$0xff] }
 0x9cb   :  { %4435 = vmatprep.subr.bf16.mxu1 %v6547_v35  ;;  %v4442_v27 = vpack.c.bf16 %v2799_v33, %v2798_v61  ;;  %4474 = vmatprep.subr.bf16.mxu0 %v6547_v35 }
 0x9cd   :  { %4476 = vmatpush3.bf16.msra.mxu0 %v4475_v30 }
 0x9ce   :  { %4437 = vmatpush3.bf16.msra.mxu1 %v4436_v53  ;;  %4477 = vmatprep.subr.bf16.mxu0 %v6547_v35 }
 0x9cf   :  { %4438 = vmatprep.subr.bf16.mxu1 %v6547_v35 }
 0x9d1   :  { %4479 = vmatpush3.bf16.msra.mxu0 %v4478_v21 }
 0x9d2   :  { %4440 = vmatpush3.bf16.msra.mxu1 %v4439_v40 }
 0x9d3   :  { %4441 = vmatprep.subr.bf16.mxu1 %v6547_v35 }
 0x9d6   :  { %4443 = vmatpush3.bf16.msra.mxu1 %v4442_v27 }
 0x9d7   :  { %4444 = vmatprep.subr.bf16.mxu1 %v6547_v35 }
 0x9da   :  { %4446 = vmatpush3.bf16.msra.mxu1 %v4445_v41 }
 0x9db   :  { %4447 = vmatprep.subr.bf16.mxu1 %v6547_v35 }
 0x9de   :  { %4449 = vmatpush3.bf16.msra.mxu1 %v4448_v4 }
 0x9df   :  { %4450 = vmatprep.subr.bf16.mxu1 %v6547_v35 }
 0x9e2   :  { %4452 = vmatpush3.bf16.msra.mxu1 %v4451_v43 }
 0x9e3   :  { %4453 = vmatprep.subr.bf16.mxu1 %v6547_v35  ;;  %v3076_v35 = vld [vmem:[%s6449_s5 + $0x5] ss:$0 sm:$0xff] }
 0x9e6   :  { %4455 = vmatpush3.bf16.msra.mxu1 %v4454_v2 }
 0xa9c   :  { %v2787_v44 = vpop.f32.mrb[82].mxu1 }
 0xa9d   :  { %v2791_v63 = vmul.f32 %v4632_v17, %v2787_v44  ;;  %v4025_v51 = vpop.f32.mrb[83].mxu1 }
 0xa9f   :  { %4059 = vmatmul.mubr.f32.vlgmr.msra.gmra.mrb[84].mxu1 %v2791_v63 }
 0xb72   :  { %v2879_v16 = vpop.f32.mrb[84].mxu1 }
 0xb73   :  { %v2880_v36 = vadd.f32 %v3075_v18, %v2879_v16  ;;  %v4060_v49 = vpop.f32.mrb[85].mxu1 }
 0xb75   :  { %v2883_v48 = vmax.f32 %v2880_v36, 0.0 }
 0xb77   :  { %4094 = vmatmul.mubr.f32.vlgmr.msra.gmra.mrb[128].mxu0 %v2883_v48 }
 0xc4a   :  { %v2971_v1 = vpop.f32.mrb[128].mxu0 }
 0xc4b   :  { %v2972_v38 = vadd.f32 %v3076_v35, %v2971_v1  ;;  %v4095_v34 = vpop.f32.mrb[129].mxu0 }
 0xc4d   :  { %2975 = vmax.xlane.f32.xlu1 %v2972_v38 }
 0xcda   :  { %v2976_v25 = vpop.xlane.xlu1 %2975 }
 0xcdb   :  { %v2977_v58 = vsub.f32 %v2972_v38, %v2976_v25 }
 0xcdd   :  { %v2978_v28 = vmul.f32 1.442695, %v2977_v58 }
 0xcdf   :  { %4633 = vpow2.f32 %v2978_v28 }
 0xce9   :  { %v4634_v23 = vpop.eup %4633 }
 0xcea   :  { %2980 = vadd.xlane.f32.xlu0 %v4634_v23 }
 0xd77   :  { %v2981_v29 = vpop.xlane.xlu0 %2980 }
 0xd78   :  { %4635 = vlog2.f32 %v2981_v29 }
 0xd82   :  { %v4636_v8 = vpop.eup %4635 }
 0xd83   :  { %v2983_v42 = vmul.f32 0.6931472, %v4636_v8 }
 0xd85   :  { %v2984_v53 = vadd.f32 %v2983_v42, %v2976_v25 }
 0xd87   :  { %v2985_v32 = vsub.f32 %v2972_v38, %v2984_v53 }
 0xd89   :  { %2986 = vst [vmem:[%s6450_s6] sm:$0xff] %v2985_v32 }
 0xd8a   :  { %2991 = vsyncpa [#allocation3], 1 }

</bundles_post_ra>
